<compile_context>
chip_gen: v5e
topology: v5e:2x2
jax: 0.10.0
libtpu: 0.0.40
codegen_flags: <defaults>
</compile_context>

<pallas_src>
import functools

import jax
import jax.numpy as jnp
from jax.experimental import pallas as pl
from jax.experimental.pallas import tpu as pltpu

EPS = 1e-5
LANE = 128
DOFF = 8          # sublane-aligned column offset of the activation inside hpad


def _round_up(x, m):
    return (x + m - 1) // m * m


def _pad_channels(c):
    # v6e/v7x MXU is 2x256^2: pad wide layers toward 256 multiples; 128 else.
    return _round_up(c, 256) if c > LANE else LANE


def _tap_weights(w_oihw, cin_pad, cout_pad):
    """OIHW (Cout, Cin, 3, 3) -> (9, cin_pad, cout_pad) bf16, tap-major."""
    cout, cin = w_oihw.shape[:2]
    w = jnp.transpose(w_oihw, (2, 3, 1, 0))                      # (3,3,Cin,Cout)
    w = jnp.pad(w, ((0, 0), (0, 0), (0, cin_pad - cin), (0, cout_pad - cout)))
    return w.reshape(9, cin_pad, cout_pad).astype(jnp.bfloat16)


# ---------------------------------------------------------------------------
# Kernel: (per-channel affine [+ ReLU] epilogue of the previous BN)
#         -> 3x3 conv (pad=1, no bias) as 9 accumulated tap matmuls
#         -> per-image per-channel sum / sum-of-squares of the conv output.
# One grid step == one image (grid axis is "parallel").
# ---------------------------------------------------------------------------
def _conv3x3_stats_kernel(x_ref, scale_ref, shift_ref, w_ref,
                          y_ref, stats_ref, hpad_ref, *, apply_relu: bool):
    H, W, CIN = x_ref.shape            # batch dim squeezed away by BlockSpec
    COUT = y_ref.shape[-1]
    Hp, WB, _ = hpad_ref.shape
    M = H * W

    # ---- fused BN epilogue of the previous layer (identity for conv1) ----
    scale = scale_ref[...].reshape(1, 1, CIN)
    shift = shift_ref[...].reshape(1, 1, CIN)
    h = x_ref[...].astype(jnp.float32) * scale + shift
    if apply_relu:
        h = jnp.maximum(h, 0.0)

    # ---- zero-bordered staging: aligned strip zeroing + aligned interior ----
    zrow = jnp.zeros((1, WB, CIN), jnp.bfloat16)
    zcol = jnp.zeros((Hp, DOFF, CIN), jnp.bfloat16)
    hpad_ref[0:1, :, :] = zrow
    hpad_ref[Hp - 1:Hp, :, :] = zrow
    hpad_ref[:, 0:DOFF, :] = zcol                     # sublanes 0..7  (aligned)
    hpad_ref[:, DOFF + W:WB, :] = zcol                # sublanes W+8.. (aligned)
    hpad_ref[1:H + 1, DOFF:DOFF + W, :] = h.astype(jnp.bfloat16)   # aligned vst

    # ---- 3x3 conv as 9 tap matmuls accumulated in f32 (no im2col buffer) ----
    acc = jnp.zeros((M, COUT), jnp.float32)
    for ky in range(3):
        for kx in range(3):
            c0 = DOFF - 1 + kx
            win = hpad_ref[ky:ky + H, c0:c0 + W, :]              # (H, W, CIN)
            acc = acc + jnp.dot(win.reshape(M, CIN), w_ref[ky * 3 + kx],
                                preferred_element_type=jnp.float32)

    # ---- bf16 conv output for the HBM round trip + f32 batch statistics ----
    y_ref[...] = acc.reshape(H, W, COUT).astype(y_ref.dtype)
    stats_ref[...] = jnp.zeros_like(stats_ref)
    stats_ref[0:1, :] = jnp.sum(acc, axis=0, keepdims=True)       # sum
    stats_ref[1:2, :] = jnp.sum(acc * acc, axis=0, keepdims=True) # sum of sq.


def _conv3x3_stats(x, scale, shift, w_taps, *, apply_relu):
    """x: (N, H, W, Cin_pad) bf16; w_taps: (9, Cin_pad, Cout_pad) bf16.
    Returns y (N, H, W, Cout_pad) bf16 pre-BN conv output and
    stats (N, 8, Cout_pad) f32 with row0 = sum, row1 = sum of squares."""
    N, H, W, CIN = x.shape
    COUT = w_taps.shape[-1]
    kernel = functools.partial(_conv3x3_stats_kernel, apply_relu=apply_relu)
    return pl.pallas_call(
        kernel,
        out_shape=(jax.ShapeDtypeStruct((N, H, W, COUT), jnp.bfloat16),
                   jax.ShapeDtypeStruct((N, 8, COUT), jnp.float32)),
        grid_spec=pltpu.PrefetchScalarGridSpec(
            num_scalar_prefetch=0,
            grid=(N,),
            in_specs=[
                pl.BlockSpec((None, H, W, CIN), lambda i: (i, 0, 0, 0)),
                # Grid-invariant operands (small here; single-buffering via
                # pipeline_mode is worthwhile once weights reach MiB scale).
                pl.BlockSpec((1, CIN), lambda i: (0, 0)),
                pl.BlockSpec((1, CIN), lambda i: (0, 0)),
                pl.BlockSpec((9, CIN, COUT), lambda i: (0, 0, 0)),
            ],
            out_specs=[
                pl.BlockSpec((None, H, W, COUT), lambda i: (i, 0, 0, 0)),
                pl.BlockSpec((None, 8, COUT), lambda i: (i, 0, 0)),
            ],
            scratch_shapes=[
                # zero-bordered staging buffer: data at columns [DOFF, DOFF+W)
                pltpu.VMEM((H + 2, W + 2 * DOFF, CIN), jnp.bfloat16),
            ],
        ),
        compiler_params=pltpu.CompilerParams(
            dimension_semantics=("parallel",),
            vmem_limit_bytes=64 * 1024 * 1024),
    )(x, scale, shift, w_taps)


# ---------------------------------------------------------------------------
# Final fused BN + ReLU (elementwise, lane-dense, bf16 input / f32 output).
# ---------------------------------------------------------------------------
def _bn_relu_kernel(y_ref, scale_ref, shift_ref, o_ref):
    C = y_ref.shape[-1]
    scale = scale_ref[...].reshape(1, 1, C)
    shift = shift_ref[...].reshape(1, 1, C)
    o_ref[...] = jnp.maximum(y_ref[...].astype(jnp.float32) * scale + shift, 0.0)


def _bn_relu(y, scale, shift):
    N, H, W, C = y.shape
    return pl.pallas_call(
        _bn_relu_kernel,
        out_shape=jax.ShapeDtypeStruct((N, H, W, C), jnp.float32),
        grid_spec=pltpu.PrefetchScalarGridSpec(
            num_scalar_prefetch=0,
            grid=(N,),
            in_specs=[
                pl.BlockSpec((None, H, W, C), lambda i: (i, 0, 0, 0)),
                pl.BlockSpec((1, C), lambda i: (0, 0)),
                pl.BlockSpec((1, C), lambda i: (0, 0)),
            ],
            out_specs=pl.BlockSpec((None, H, W, C), lambda i: (i, 0, 0, 0)),
        ),
        compiler_params=pltpu.CompilerParams(
            dimension_semantics=("parallel",),
            vmem_limit_bytes=64 * 1024 * 1024),
    )(y, scale, shift)


def _bn_affine(stats, gamma, beta, count, c_pad):
    """Fold batch stats into per-channel scale/shift (f32)."""
    s = jnp.sum(stats[:, 0, :], axis=0)
    ss = jnp.sum(stats[:, 1, :], axis=0)
    mean = s / count
    var = jnp.maximum(ss / count - mean * mean, 0.0)     # biased (PyTorch BN fwd)
    g = jnp.pad(gamma, (0, c_pad - gamma.shape[0]))
    b = jnp.pad(beta, (0, c_pad - beta.shape[0]))
    scale = g * jax.lax.rsqrt(var + EPS)
    shift = b - mean * scale
    return scale.reshape(1, c_pad), shift.reshape(1, c_pad)


def double_conv2d(x_nchw, w1, g1, b1, w2, g2, b2):
    """Forward of DoubleConv2D (training-mode BatchNorm batch statistics)."""
    N, Cin, H, W = x_nchw.shape
    # TODO(synk): support W % 8 != 0 by padding W and masking the statistics.
    assert W % 8 == 0, "W must be a multiple of 8 (sublane tile)"
    Cmid, Cout = w1.shape[0], w2.shape[0]
    CP_in, CP_mid, CP_out = (_pad_channels(c) for c in (Cin, Cmid, Cout))
    count = N * H * W

    # Wrapper-side layout plumbing: NCHW -> NHWC, pad channels, bf16 storage.
    x = jnp.transpose(x_nchw, (0, 2, 3, 1))
    x = jnp.pad(x, ((0, 0), (0, 0), (0, 0), (0, CP_in - Cin))).astype(jnp.bfloat16)
    w1t = _tap_weights(w1, CP_in, CP_mid)
    w2t = _tap_weights(w2, CP_mid, CP_out)

    one = jnp.ones((1, CP_in), jnp.float32)
    zero = jnp.zeros((1, CP_in), jnp.float32)

    # pass 1: conv1 + batch statistics (identity epilogue, no ReLU).
    y1, st1 = _conv3x3_stats(x, one, zero, w1t, apply_relu=False)
    scale1, shift1 = _bn_affine(st1, g1, b1, count, CP_mid)

    # pass 2: fused BN1 + ReLU epilogue -> conv2 + batch statistics.
    y2, st2 = _conv3x3_stats(y1, scale1, shift1, w2t, apply_relu=True)
    scale2, shift2 = _bn_affine(st2, g2, b2, count, CP_out)

    # pass 3: final BN2 + ReLU (bf16 in, f32 out), then strip channel padding
    # and return NCHW to match the PyTorch module's layout (keep NHWC when the
    # downstream consumer allows it to avoid this extra layout pass).
    out = _bn_relu(y2, scale2, shift2)
    return jnp.transpose(out[..., :Cout], (0, 3, 1, 2))


def reference(x_nchw, w1, g1, b1, w2, g2, b2):
    """Pure-JAX f32 reference matching the PyTorch training-mode forward."""
    def conv(x, w):
        return jax.lax.conv_general_dilated(
            x, w, window_strides=(1, 1), padding=((1, 1), (1, 1)),
            dimension_numbers=("NCHW", "OIHW", "NCHW"))

    def bn_relu(y, g, b):
        mean = jnp.mean(y, axis=(0, 2, 3), keepdims=True)
        var = jnp.mean((y - mean) ** 2, axis=(0, 2, 3), keepdims=True)
        y = (y - mean) * jax.lax.rsqrt(var + EPS)
        y = y * g.reshape(1, -1, 1, 1) + b.reshape(1, -1, 1, 1)
        return jnp.maximum(y, 0.0)

    h = bn_relu(conv(x_nchw, w1), g1, b1)
    return bn_relu(conv(h, w2), g2, b2)


if __name__ == "__main__":
    N, Cin, H, W = 2, 4, 16, 16
    Cmid = Cout = 8      # mid_channels defaults to out_channels

    key = jax.random.PRNGKey(0)
    kx, kw1, kw2, kg1, kb1, kg2, kb2 = jax.random.split(key, 7)

    x = jax.random.normal(kx, (N, Cin, H, W), jnp.float32)
    w1 = jax.random.normal(kw1, (Cmid, Cin, 3, 3), jnp.float32) * 0.2
    w2 = jax.random.normal(kw2, (Cout, Cmid, 3, 3), jnp.float32) * 0.2
    g1 = 1.0 + 0.1 * jax.random.normal(kg1, (Cmid,), jnp.float32)
    b1 = 0.1 * jax.random.normal(kb1, (Cmid,), jnp.float32)
    g2 = 1.0 + 0.1 * jax.random.normal(kg2, (Cout,), jnp.float32)
    b2 = 0.1 * jax.random.normal(kb2, (Cout,), jnp.float32)

    out = double_conv2d(x, w1, g1, b1, w2, g2, b2)
    jax.block_until_ready(out)

    ref = reference(x, w1, g1, b1, w2, g2, b2)
    assert out.shape == (N, Cout, H, W)
    # bf16 MXU operands and bf16 inter-pass intermediates introduce ~1e-2-level
    # deviations vs the pure-f32 reference; tolerance is sized for that while
    # still catching structural errors (which would be O(1)).
    assert jnp.allclose(out, ref, atol=5e-2, rtol=5e-2), "mismatch vs reference"

    print("KERNEL_OK")
</pallas_src>

<mosaic_0001>
module attributes {stable_mosaic.version = 11 : i64} {
  func.func @_conv3x3_stats_kernel(%arg0: i32, %arg1: memref<1x16x16x128xbf16, #tpu.memory_space<vmem>>, %arg2: memref<1x128xf32, #tpu.memory_space<vmem>>, %arg3: memref<1x128xf32, #tpu.memory_space<vmem>>, %arg4: memref<9x128x128xbf16, #tpu.memory_space<vmem>>, %arg5: memref<1x16x16x128xbf16, #tpu.memory_space<vmem>>, %arg6: memref<1x8x128xf32, #tpu.memory_space<vmem>>, %arg7: memref<18x32x128xbf16, #tpu.memory_space<vmem>>) attributes {dimension_semantics = [#tpu.dimension_semantics<parallel>], iteration_bounds = array<i64: 2>, scalar_prefetch = 0 : i64, scratch_operands = 1 : i64, tpu.core_type = #tpu.core_type<tc>, window_params = [{transform_indices = @transform_0, window_bounds = array<i64: 1, 16, 16, 128>}, {pipeline_mode = #tpu.pipeline_mode<synchronous>, transform_indices = @transform_1, window_bounds = array<i64: 1, 128>}, {pipeline_mode = #tpu.pipeline_mode<synchronous>, transform_indices = @transform_2, window_bounds = array<i64: 1, 128>}, {pipeline_mode = #tpu.pipeline_mode<synchronous>, transform_indices = @transform_3, window_bounds = array<i64: 9, 128, 128>}, {transform_indices = @transform_4, window_bounds = array<i64: 1, 16, 16, 128>}, {transform_indices = @transform_5, window_bounds = array<i64: 1, 8, 128>}]} {
    %c0 = arith.constant 0 : index
    %c0_0 = arith.constant 0 : index
    %0 = vector.load %arg2[%c0, %c0_0] : memref<1x128xf32, #tpu.memory_space<vmem>>, vector<1x128xf32>
    %1 = vector.shape_cast %0 : vector<1x128xf32> to vector<1x1x128xf32>
    %c0_1 = arith.constant 0 : index
    %c0_2 = arith.constant 0 : index
    %2 = vector.load %arg3[%c0_1, %c0_2] : memref<1x128xf32, #tpu.memory_space<vmem>>, vector<1x128xf32>
    %3 = vector.shape_cast %2 : vector<1x128xf32> to vector<1x1x128xf32>
    %c0_3 = arith.constant 0 : index
    %c0_4 = arith.constant 0 : index
    %c0_5 = arith.constant 0 : index
    %c0_6 = arith.constant 0 : index
    %4 = vector.load %arg1[%c0_3, %c0_4, %c0_5, %c0_6] : memref<1x16x16x128xbf16, #tpu.memory_space<vmem>>, vector<1x16x16x128xbf16>
    %5 = vector.shape_cast %4 : vector<1x16x16x128xbf16> to vector<16x16x128xbf16>
    %6 = arith.extf %5 : vector<16x16x128xbf16> to vector<16x16x128xf32>
    %7 = vector.broadcast %1 : vector<1x1x128xf32> to vector<16x16x128xf32>
    %8 = arith.mulf %6, %7 : vector<16x16x128xf32>
    %9 = vector.broadcast %3 : vector<1x1x128xf32> to vector<16x16x128xf32>
    %10 = arith.addf %8, %9 : vector<16x16x128xf32>
    %cst = arith.constant 0.000000e+00 : bf16
    %11 = vector.broadcast %cst : bf16 to vector<1x32x128xbf16>
    %cst_7 = arith.constant 0.000000e+00 : bf16
    %12 = vector.broadcast %cst_7 : bf16 to vector<18x8x128xbf16>
    %c0_8 = arith.constant 0 : index
    %c0_9 = arith.constant 0 : index
    %c0_10 = arith.constant 0 : index
    %13 = vector.load %arg7[%c0_8, %c0_9, %c0_10] : memref<18x32x128xbf16, #tpu.memory_space<vmem>>, vector<1x32x128xbf16>
    tpu.vector_store %arg7[%c0_8, %c0_9, %c0_10], %11 {strides = array<i32>} : memref<18x32x128xbf16, #tpu.memory_space<vmem>>, vector<1x32x128xbf16>,
    %c17 = arith.constant 17 : index
    %c0_11 = arith.constant 0 : index
    %c0_12 = arith.constant 0 : index
    %14 = vector.load %arg7[%c17, %c0_11, %c0_12] : memref<18x32x128xbf16, #tpu.memory_space<vmem>>, vector<1x32x128xbf16>
    tpu.vector_store %arg7[%c17, %c0_11, %c0_12], %11 {strides = array<i32>} : memref<18x32x128xbf16, #tpu.memory_space<vmem>>, vector<1x32x128xbf16>,
    %c0_13 = arith.constant 0 : index
    %c0_14 = arith.constant 0 : index
    %c0_15 = arith.constant 0 : index
    %15 = vector.load %arg7[%c0_13, %c0_14, %c0_15] : memref<18x32x128xbf16, #tpu.memory_space<vmem>>, vector<18x8x128xbf16>
    tpu.vector_store %arg7[%c0_13, %c0_14, %c0_15], %12 {strides = array<i32>} : memref<18x32x128xbf16, #tpu.memory_space<vmem>>, vector<18x8x128xbf16>,
    %c0_16 = arith.constant 0 : index
    %c24 = arith.constant 24 : index
    %c0_17 = arith.constant 0 : index
    %16 = vector.load %arg7[%c0_16, %c24, %c0_17] : memref<18x32x128xbf16, #tpu.memory_space<vmem>>, vector<18x8x128xbf16>
    tpu.vector_store %arg7[%c0_16, %c24, %c0_17], %12 {strides = array<i32>} : memref<18x32x128xbf16, #tpu.memory_space<vmem>>, vector<18x8x128xbf16>,
    %17 = arith.truncf %10 : vector<16x16x128xf32> to vector<16x16x128xbf16>
    %c1 = arith.constant 1 : index
    %c8 = arith.constant 8 : index
    %c0_18 = arith.constant 0 : index
    %18 = vector.load %arg7[%c1, %c8, %c0_18] : memref<18x32x128xbf16, #tpu.memory_space<vmem>>, vector<16x16x128xbf16>
    tpu.vector_store %arg7[%c1, %c8, %c0_18], %17 {strides = array<i32>} : memref<18x32x128xbf16, #tpu.memory_space<vmem>>, vector<16x16x128xbf16>,
    %cst_19 = arith.constant 0.000000e+00 : f32
    %19 = vector.broadcast %cst_19 : f32 to vector<256x128xf32>
    %c0_20 = arith.constant 0 : index
    %c7 = arith.constant 7 : index
    %c0_21 = arith.constant 0 : index
    %20 = vector.load %arg7[%c0_20, %c7, %c0_21] : memref<18x32x128xbf16, #tpu.memory_space<vmem>>, vector<16x16x128xbf16>
    %21 = vector.shape_cast %20 : vector<16x16x128xbf16> to vector<256x128xbf16>
    %c0_22 = arith.constant 0 : index
    %c0_23 = arith.constant 0 : index
    %c0_24 = arith.constant 0 : index
    %22 = vector.load %arg4[%c0_22, %c0_23, %c0_24] : memref<9x128x128xbf16, #tpu.memory_space<vmem>>, vector<1x128x128xbf16>
    %23 = vector.shape_cast %22 : vector<1x128x128xbf16> to vector<128x128xbf16>
    %cst_25 = arith.constant dense<0.000000e+00> : vector<256x128xf32>
    %24 = tpu.matmul %21, %23, %cst_25 {dimension_numbers = #tpu.dot_dimension_numbers<[1], [0], [0], [1], [0, 0, 1, 1], [], []>} : vector<256x128xbf16>, vector<128x128xbf16>, vector<256x128xf32> -> vector<256x128xf32>
    %25 = arith.addf %19, %24 : vector<256x128xf32>
    %c0_26 = arith.constant 0 : index
    %c8_27 = arith.constant 8 : index
    %c0_28 = arith.constant 0 : index
    %26 = vector.load %arg7[%c0_26, %c8_27, %c0_28] : memref<18x32x128xbf16, #tpu.memory_space<vmem>>, vector<16x16x128xbf16>
    %27 = vector.shape_cast %26 : vector<16x16x128xbf16> to vector<256x128xbf16>
    %c1_29 = arith.constant 1 : index
    %c0_30 = arith.constant 0 : index
    %c0_31 = arith.constant 0 : index
    %28 = vector.load %arg4[%c1_29, %c0_30, %c0_31] : memref<9x128x128xbf16, #tpu.memory_space<vmem>>, vector<1x128x128xbf16>
    %29 = vector.shape_cast %28 : vector<1x128x128xbf16> to vector<128x128xbf16>
    %cst_32 = arith.constant dense<0.000000e+00> : vector<256x128xf32>
    %30 = tpu.matmul %27, %29, %cst_32 {dimension_numbers = #tpu.dot_dimension_numbers<[1], [0], [0], [1], [0, 0, 1, 1], [], []>} : vector<256x128xbf16>, vector<128x128xbf16>, vector<256x128xf32> -> vector<256x128xf32>
    %31 = arith.addf %25, %30 : vector<256x128xf32>
    %c0_33 = arith.constant 0 : index
    %c9 = arith.constant 9 : index
    %c0_34 = arith.constant 0 : index
    %32 = vector.load %arg7[%c0_33, %c9, %c0_34] : memref<18x32x128xbf16, #tpu.memory_space<vmem>>, vector<16x16x128xbf16>
    %33 = vector.shape_cast %32 : vector<16x16x128xbf16> to vector<256x128xbf16>
    %c2 = arith.constant 2 : index
    %c0_35 = arith.constant 0 : index
    %c0_36 = arith.constant 0 : index
    %34 = vector.load %arg4[%c2, %c0_35, %c0_36] : memref<9x128x128xbf16, #tpu.memory_space<vmem>>, vector<1x128x128xbf16>
    %35 = vector.shape_cast %34 : vector<1x128x128xbf16> to vector<128x128xbf16>
    %cst_37 = arith.constant dense<0.000000e+00> : vector<256x128xf32>
    %36 = tpu.matmul %33, %35, %cst_37 {dimension_numbers = #tpu.dot_dimension_numbers<[1], [0], [0], [1], [0, 0, 1, 1], [], []>} : vector<256x128xbf16>, vector<128x128xbf16>, vector<256x128xf32> -> vector<256x128xf32>
    %37 = arith.addf %31, %36 : vector<256x128xf32>
    %c1_38 = arith.constant 1 : index
    %c7_39 = arith.constant 7 : index
    %c0_40 = arith.constant 0 : index
    %38 = vector.load %arg7[%c1_38, %c7_39, %c0_40] : memref<18x32x128xbf16, #tpu.memory_space<vmem>>, vector<16x16x128xbf16>
    %39 = vector.shape_cast %38 : vector<16x16x128xbf16> to vector<256x128xbf16>
    %c3 = arith.constant 3 : index
    %c0_41 = arith.constant 0 : index
    %c0_42 = arith.constant 0 : index
    %40 = vector.load %arg4[%c3, %c0_41, %c0_42] : memref<9x128x128xbf16, #tpu.memory_space<vmem>>, vector<1x128x128xbf16>
    %41 = vector.shape_cast %40 : vector<1x128x128xbf16> to vector<128x128xbf16>
    %cst_43 = arith.constant dense<0.000000e+00> : vector<256x128xf32>
    %42 = tpu.matmul %39, %41, %cst_43 {dimension_numbers = #tpu.dot_dimension_numbers<[1], [0], [0], [1], [0, 0, 1, 1], [], []>} : vector<256x128xbf16>, vector<128x128xbf16>, vector<256x128xf32> -> vector<256x128xf32>
    %43 = arith.addf %37, %42 : vector<256x128xf32>
    %c1_44 = arith.constant 1 : index
    %c8_45 = arith.constant 8 : index
    %c0_46 = arith.constant 0 : index
    %44 = vector.load %arg7[%c1_44, %c8_45, %c0_46] : memref<18x32x128xbf16, #tpu.memory_space<vmem>>, vector<16x16x128xbf16>
    %45 = vector.shape_cast %44 : vector<16x16x128xbf16> to vector<256x128xbf16>
    %c4 = arith.constant 4 : index
    %c0_47 = arith.constant 0 : index
    %c0_48 = arith.constant 0 : index
    %46 = vector.load %arg4[%c4, %c0_47, %c0_48] : memref<9x128x128xbf16, #tpu.memory_space<vmem>>, vector<1x128x128xbf16>
    %47 = vector.shape_cast %46 : vector<1x128x128xbf16> to vector<128x128xbf16>
    %cst_49 = arith.constant dense<0.000000e+00> : vector<256x128xf32>
    %48 = tpu.matmul %45, %47, %cst_49 {dimension_numbers = #tpu.dot_dimension_numbers<[1], [0], [0], [1], [0, 0, 1, 1], [], []>} : vector<256x128xbf16>, vector<128x128xbf16>, vector<256x128xf32> -> vector<256x128xf32>
    %49 = arith.addf %43, %48 : vector<256x128xf32>
    %c1_50 = arith.constant 1 : index
    %c9_51 = arith.constant 9 : index
    %c0_52 = arith.constant 0 : index
    %50 = vector.load %arg7[%c1_50, %c9_51, %c0_52] : memref<18x32x128xbf16, #tpu.memory_space<vmem>>, vector<16x16x128xbf16>
    %51 = vector.shape_cast %50 : vector<16x16x128xbf16> to vector<256x128xbf16>
    %c5 = arith.constant 5 : index
    %c0_53 = arith.constant 0 : index
    %c0_54 = arith.constant 0 : index
    %52 = vector.load %arg4[%c5, %c0_53, %c0_54] : memref<9x128x128xbf16, #tpu.memory_space<vmem>>, vector<1x128x128xbf16>
    %53 = vector.shape_cast %52 : vector<1x128x128xbf16> to vector<128x128xbf16>
    %cst_55 = arith.constant dense<0.000000e+00> : vector<256x128xf32>
    %54 = tpu.matmul %51, %53, %cst_55 {dimension_numbers = #tpu.dot_dimension_numbers<[1], [0], [0], [1], [0, 0, 1, 1], [], []>} : vector<256x128xbf16>, vector<128x128xbf16>, vector<256x128xf32> -> vector<256x128xf32>
    %55 = arith.addf %49, %54 : vector<256x128xf32>
    %c2_56 = arith.constant 2 : index
    %c7_57 = arith.constant 7 : index
    %c0_58 = arith.constant 0 : index
    %56 = vector.load %arg7[%c2_56, %c7_57, %c0_58] : memref<18x32x128xbf16, #tpu.memory_space<vmem>>, vector<16x16x128xbf16>
    %57 = vector.shape_cast %56 : vector<16x16x128xbf16> to vector<256x128xbf16>
    %c6 = arith.constant 6 : index
    %c0_59 = arith.constant 0 : index
    %c0_60 = arith.constant 0 : index
    %58 = vector.load %arg4[%c6, %c0_59, %c0_60] : memref<9x128x128xbf16, #tpu.memory_space<vmem>>, vector<1x128x128xbf16>
    %59 = vector.shape_cast %58 : vector<1x128x128xbf16> to vector<128x128xbf16>
    %cst_61 = arith.constant dense<0.000000e+00> : vector<256x128xf32>
    %60 = tpu.matmul %57, %59, %cst_61 {dimension_numbers = #tpu.dot_dimension_numbers<[1], [0], [0], [1], [0, 0, 1, 1], [], []>} : vector<256x128xbf16>, vector<128x128xbf16>, vector<256x128xf32> -> vector<256x128xf32>
    %61 = arith.addf %55, %60 : vector<256x128xf32>
    %c2_62 = arith.constant 2 : index
    %c8_63 = arith.constant 8 : index
    %c0_64 = arith.constant 0 : index
    %62 = vector.load %arg7[%c2_62, %c8_63, %c0_64] : memref<18x32x128xbf16, #tpu.memory_space<vmem>>, vector<16x16x128xbf16>
    %63 = vector.shape_cast %62 : vector<16x16x128xbf16> to vector<256x128xbf16>
    %c7_65 = arith.constant 7 : index
    %c0_66 = arith.constant 0 : index
    %c0_67 = arith.constant 0 : index
    %64 = vector.load %arg4[%c7_65, %c0_66, %c0_67] : memref<9x128x128xbf16, #tpu.memory_space<vmem>>, vector<1x128x128xbf16>
    %65 = vector.shape_cast %64 : vector<1x128x128xbf16> to vector<128x128xbf16>
    %cst_68 = arith.constant dense<0.000000e+00> : vector<256x128xf32>
    %66 = tpu.matmul %63, %65, %cst_68 {dimension_numbers = #tpu.dot_dimension_numbers<[1], [0], [0], [1], [0, 0, 1, 1], [], []>} : vector<256x128xbf16>, vector<128x128xbf16>, vector<256x128xf32> -> vector<256x128xf32>
    %67 = arith.addf %61, %66 : vector<256x128xf32>
    %c2_69 = arith.constant 2 : index
    %c9_70 = arith.constant 9 : index
    %c0_71 = arith.constant 0 : index
    %68 = vector.load %arg7[%c2_69, %c9_70, %c0_71] : memref<18x32x128xbf16, #tpu.memory_space<vmem>>, vector<16x16x128xbf16>
    %69 = vector.shape_cast %68 : vector<16x16x128xbf16> to vector<256x128xbf16>
    %c8_72 = arith.constant 8 : index
    %c0_73 = arith.constant 0 : index
    %c0_74 = arith.constant 0 : index
    %70 = vector.load %arg4[%c8_72, %c0_73, %c0_74] : memref<9x128x128xbf16, #tpu.memory_space<vmem>>, vector<1x128x128xbf16>
    %71 = vector.shape_cast %70 : vector<1x128x128xbf16> to vector<128x128xbf16>
    %cst_75 = arith.constant dense<0.000000e+00> : vector<256x128xf32>
    %72 = tpu.matmul %69, %71, %cst_75 {dimension_numbers = #tpu.dot_dimension_numbers<[1], [0], [0], [1], [0, 0, 1, 1], [], []>} : vector<256x128xbf16>, vector<128x128xbf16>, vector<256x128xf32> -> vector<256x128xf32>
    %73 = arith.addf %67, %72 : vector<256x128xf32>
    %74 = vector.shape_cast %73 : vector<256x128xf32> to vector<16x16x128xf32>
    %75 = arith.truncf %74 : vector<16x16x128xf32> to vector<16x16x128xbf16>
    %c0_76 = arith.constant 0 : index
    %c0_77 = arith.constant 0 : index
    %c0_78 = arith.constant 0 : index
    %c0_79 = arith.constant 0 : index
    %76 = vector.load %arg5[%c0_76, %c0_77, %c0_78, %c0_79] : memref<1x16x16x128xbf16, #tpu.memory_space<vmem>>, vector<1x16x16x128xbf16>
    %77 = vector.shape_cast %76 : vector<1x16x16x128xbf16> to vector<16x16x128xbf16>
    %78 = vector.shape_cast %75 : vector<16x16x128xbf16> to vector<1x16x16x128xbf16>
    tpu.vector_store %arg5[%c0_76, %c0_77, %c0_78, %c0_79], %78 {strides = array<i32>} : memref<1x16x16x128xbf16, #tpu.memory_space<vmem>>, vector<1x16x16x128xbf16>,
    %cst_80 = arith.constant 0.000000e+00 : f32
    %79 = vector.broadcast %cst_80 : f32 to vector<8x128xf32>
    %c0_81 = arith.constant 0 : index
    %c0_82 = arith.constant 0 : index
    %c0_83 = arith.constant 0 : index
    %80 = vector.load %arg6[%c0_81, %c0_82, %c0_83] : memref<1x8x128xf32, #tpu.memory_space<vmem>>, vector<1x8x128xf32>
    %81 = vector.shape_cast %80 : vector<1x8x128xf32> to vector<8x128xf32>
    %82 = vector.shape_cast %79 : vector<8x128xf32> to vector<1x8x128xf32>
    tpu.vector_store %arg6[%c0_81, %c0_82, %c0_83], %82 {strides = array<i32>} : memref<1x8x128xf32, #tpu.memory_space<vmem>>, vector<1x8x128xf32>,
    %cst_84 = arith.constant dense<0.000000e+00> : vector<128xf32>
    %83 = vector.multi_reduction <add>, %73, %cst_84 [0] : vector<256x128xf32> to vector<128xf32>
    %84 = vector.shape_cast %83 : vector<128xf32> to vector<1x128xf32>
    %c0_85 = arith.constant 0 : index
    %c0_86 = arith.constant 0 : index
    %c0_87 = arith.constant 0 : index
    %85 = vector.load %arg6[%c0_85, %c0_86, %c0_87] : memref<1x8x128xf32, #tpu.memory_space<vmem>>, vector<1x1x128xf32>
    %86 = vector.shape_cast %85 : vector<1x1x128xf32> to vector<1x128xf32>
    %87 = vector.shape_cast %84 : vector<1x128xf32> to vector<1x1x128xf32>
    tpu.vector_store %arg6[%c0_85, %c0_86, %c0_87], %87 {strides = array<i32>} : memref<1x8x128xf32, #tpu.memory_space<vmem>>, vector<1x1x128xf32>,
    %88 = arith.mulf %73, %73 : vector<256x128xf32>
    %cst_88 = arith.constant dense<0.000000e+00> : vector<128xf32>
    %89 = vector.multi_reduction <add>, %88, %cst_88 [0] : vector<256x128xf32> to vector<128xf32>
    %90 = vector.shape_cast %89 : vector<128xf32> to vector<1x128xf32>
    %c0_89 = arith.constant 0 : index
    %c1_90 = arith.constant 1 : index
    %c0_91 = arith.constant 0 : index
    %91 = vector.load %arg6[%c0_89, %c1_90, %c0_91] : memref<1x8x128xf32, #tpu.memory_space<vmem>>, vector<1x1x128xf32>
    %92 = vector.shape_cast %91 : vector<1x1x128xf32> to vector<1x128xf32>
    %93 = vector.shape_cast %90 : vector<1x128xf32> to vector<1x1x128xf32>
    tpu.vector_store %arg6[%c0_89, %c1_90, %c0_91], %93 {strides = array<i32>} : memref<1x8x128xf32, #tpu.memory_space<vmem>>, vector<1x1x128xf32>,
    return
  }
  func.func @transform_0(%arg0: i32) -> (i32, i32, i32, i32) {
    %c0_i32 = arith.constant 0 : i32
    %c0_i32_0 = arith.constant 0 : i32
    %c0_i32_1 = arith.constant 0 : i32
    %c0_i32_2 = arith.constant 0 : i32
    return %arg0, %c0_i32, %c0_i32_0, %c0_i32_1 : i32, i32, i32, i32
  }
  func.func @transform_1(%arg0: i32) -> (i32, i32) {
    %c0_i32 = arith.constant 0 : i32
    %c0_i32_0 = arith.constant 0 : i32
    %c0_i32_1 = arith.constant 0 : i32
    return %c0_i32, %c0_i32_0 : i32, i32
  }
  func.func @transform_2(%arg0: i32) -> (i32, i32) {
    %c0_i32 = arith.constant 0 : i32
    %c0_i32_0 = arith.constant 0 : i32
    %c0_i32_1 = arith.constant 0 : i32
    return %c0_i32, %c0_i32_0 : i32, i32
  }
  func.func @transform_3(%arg0: i32) -> (i32, i32, i32) {
    %c0_i32 = arith.constant 0 : i32
    %c0_i32_0 = arith.constant 0 : i32
    %c0_i32_1 = arith.constant 0 : i32
    %c0_i32_2 = arith.constant 0 : i32
    return %c0_i32, %c0_i32_0, %c0_i32_1 : i32, i32, i32
  }
  func.func @transform_4(%arg0: i32) -> (i32, i32, i32, i32) {
    %c0_i32 = arith.constant 0 : i32
    %c0_i32_0 = arith.constant 0 : i32
    %c0_i32_1 = arith.constant 0 : i32
    %c0_i32_2 = arith.constant 0 : i32
    return %arg0, %c0_i32, %c0_i32_0, %c0_i32_1 : i32, i32, i32, i32
  }
  func.func @transform_5(%arg0: i32) -> (i32, i32, i32) {
    %c0_i32 = arith.constant 0 : i32
    %c0_i32_0 = arith.constant 0 : i32
    %c0_i32_1 = arith.constant 0 : i32
    return %arg0, %c0_i32, %c0_i32_0 : i32, i32, i32
  }
}

</mosaic_0001>

<bundles_post_ra>
// kernel: tpu_custom_call.1
= control target key start
LH: loop header
LB: loop body
LE: loop exit
PB: predicated region body
PF: predicated region fallthrough
CT: control target
= control target key end

     0   :  { %s8393_s0 = inlined_call_operand.hbm [shape: bf16[2,16,16,128], index: 0, kind: input, shape index: {}]   ;;  %s8394_s1 = inlined_call_operand.hbm [shape: f32[1,128], index: 1, kind: input, shape index: {}]   ;;  %s8395_s2 = inlined_call_operand.vmem [shape: f32[1,128], index: 2, kind: input, shape index: {}]   ;;  %s8396_s3 = inlined_call_operand.hbm [shape: bf16[9,128,128], index: 3, kind: input, shape index: {}]   ;;  %s8397_s4 = inlined_call_operand.hbm [shape: bf16[2,16,16,128], index: 4, kind: output, shape index: {0}]   ;;  %s8398_s5 = inlined_call_operand.hbm [shape: f32[2,8,128], index: 5, kind: output, shape index: {1}]  }
   0x1   :  { %8400 = sst [smem:[#allocation32_spill]] %s8394_s1 }
   0x2   :  { %8401 = sst [smem:[#allocation33_spill]] %s8396_s3 }
   0x3   :  { %11 = vsyncpa [#allocation4], 0 }
   0x4   :  { %13 = vsyncpa [#allocation4 + $0x1], 0 }
   0x5   :  { %14 = vsyncpa [#allocation7], 0 }
   0x6   :  { %15 = vsyncpa [#allocation5], 0 }
   0x7   :  { %17 = vsyncpa [#allocation5 + $0x1], 0 }
   0x8   :  { %18 = vsyncpa [#allocation11], 0 }
   0x9   :  { %20 = vsyncpa [#allocation11 + $0x1], 0  ;;  %s6834_s18 = smov 0   ;;  %s6836_s19 = smov 0  }
   0xa   :  { %s6838_s20 = smov 0   ;;  %s6840_s21 = smov 0  }
   0xb LB: > { %8402 = sst [smem:[#allocation16_spill]] %s6790_s20  ;;  %s6855_s22 = sadd.s32 4294967295, %s6794_s21   ;;  %s6794_s21 = sphi %s6840_s21, %s8467_s21   ;;  %s6790_s20 = sphi %s6838_s20, %s8464_s20   ;;  %s6786_s19 = sphi %s6836_s19, %s8466_s19   ;;  %s6782_s18 = sphi %s6834_s18, %s8465_s18  }
   0xc   : > { %s5651_s23 = sadd.s32 4294967294, %s6794_s21   ;;  %s6859_s24 = sadd.s32 1, %s6794_s21  }
   0xd   : > { %s33_s25 = sadd.s32 1, %s6790_s20  ;;  %s30_s26 = ssub.s32 %s6794_s21, %s6859_s24 }
   0xe   : > { %p40_p0 = scmp.ne.s32.totalorder %s6790_s20, %s6786_s19  ;;  %p31_p1 = scmp.eq.s32.totalorder %s30_s26, 0 }
   0xf   : > { %p41_p2 = scmp.eq.s32.totalorder %s6794_s21, 0  ;;  %p46_p3 = scmp.ne.s32.totalorder %s6786_s19, %s6782_s18 }
  0x10   : > { %p47_p4 = scmp.eq.s32.totalorder %s6855_s22, 0  ;;  %p133_p7 = scmp.eq.s32.totalorder %s6855_s22, 1 }
  0x11   : > { %s6871_s27 = scalar_select %p31_p1, %s6790_s20, %s33_s25  }
  0x12   : > { %p6873_p5 = por %p41_p2, %p40_p0  ;;  %p6879_p6 = por %p47_p4, %p46_p3 }
  0x13   : > { %8403 = sst [smem:[#allocation17_spill]] %s6871_s27  ;;  %p139_p8 = scmp.eq.s32.totalorder %s5651_s23, 1 }
  0x14   : > { %p5652_p9 = scmp.ge.s32.totalorder %s6794_s21, 1  ;;  %p172_p10 = scmp.lt.s32.totalorder %s6794_s21, 3 }
  0x15   : > { %p6886_p11 = por %p133_p7, %p40_p0  ;;  %p6890_p12 = por %p139_p8, %p46_p3 }
  0x16   : > { %p6894_p13 = pnand %p5652_p9, %p172_p10  ;;  %s8409_s1 = sld [smem:[#allocation32_spill]] }
  0x17   : > { %s6796_s11 = smov [#allocation6]   ;;  %p6554_p3 = scmp.lt.s32.totalorder %s6794_s21, 2 }
  0x18   : > { %p6534_p1 = pneg %p6894_p13  ;;  %s186_s12 = sshll.u32 %s6796_s11, 4  ;;  %s187_s12 = int_to_ptr.vmem [resolvable:$true] %s186_s12 }
  0x19   : > { %s8410_s3 = sld [smem:[#allocation33_spill]]  ;;  %p6912_p7 = pnand %p6554_p3, %p6873_p5 }
  0x1a   : > { %p6535_p2 = pnand %p6534_p1, %p47_p4  ;;  %s6797_s17 = smov [#allocation8]  }
  0x1b   : > { %s200_s23 = sshll.u32 %s6797_s17, 4  ;;  %s214_s25 = sand.u32 1, %s6790_s20   ;;  %s201_s23 = int_to_ptr.vmem [resolvable:$true] %s200_s23 }
  0x1c   : > { %s184_s10 = sshll.u32 %s8409_s1, 4  ;;  %s6798_s26 = smov 64   ;;  %s185_s10 = int_to_ptr.hbm [resolvable:$true] %s184_s10 }
  0x1d   : > { %6537 = dma.hbm_to_vmem [thread:$0]  (!%p6535_p2), %s185_s10, 16, %s187_s12, [#allocation7]  }
  0x1e   : > { %s6799_s8 = smov 4   ;;  %s5656_s9 = sshll.u32 %s214_s25, 7 }
  0x1f   : > { %s198_s15 = sshll.u32 %s8410_s3, 4  ;;  %s6200_s11 = sshll.u32 %s6794_s21, 7  ;;  %s199_s15 = int_to_ptr.hbm [resolvable:$true] %s198_s15 }
  0x20   : > { %6540 = dma.hbm_to_vmem [thread:$0]  (!%p6535_p2), %s199_s15, 9216, %s201_s23, [#allocation7], %s6798_s26, %s6798_s26, %s6799_s8  }
  0x21   : > { %s223_s14 = scalar_lea.hbm %s8393_s0, %s6200_s11  ;;  %s218_s10 = scalar_lea.vmem [#allocation3], %s5656_s9 }
  0x22   : > { %s226_s28 = sshll.u32 %s218_s10, 4  ;;  %s224_s12 = sshll.u32 %s223_s14, 4  ;;  %s227_s28 = int_to_ptr.vmem [resolvable:$true] %s226_s28  ;;  %s225_s12 = int_to_ptr.hbm [resolvable:$true] %s224_s12 }
  0x23   : > { %s215_s3 = scalar_lea.sflag [#allocation4], %s214_s25  ;;  %s6662_s27 = sshra.s32 %s225_s12, 4  ;;  %s6663_s27 = int_to_ptr.hbm [resolvable:$true] %s6662_s27 }
  0x24   : > { %s6664_s17 = scalar_lea.hbm %s6663_s27, 128  ;;  %p6666_p8 = pneg %p6912_p7 }
  0x25   : > { %p6665_p5 = scmp.ne.s32.totalorder %s6663_s27, %s6664_s17  ;;  %s6669_s20 = scalar_lea.hbm %s8393_s0, 256 }
  0x26   : > { %p6670_p1 = scmp.lt.s32.totalorder %s6663_s27, %s8393_s0  ;;  %p6671_p2 = scmp.lt.s32.totalorder %s6669_s20, %s6664_s17 }
  0x27   : > { %p6667_p9 = pnand %p6666_p8, %p6665_p5 }
  0x28   : > { %p6672_p3 = por %p6671_p2, %p6670_p1 }
  0x29   : > { %p6668_p10 = pneg %p6667_p9 }
  0x2b   : > { %p6673_p0 = pnand %p6672_p3, %p6668_p10 }
  0x2d   : > { %6676 = shalt.err (!%p6673_p0)
}
  0x2e   : > { %6544 = dma.hbm_to_vmem [thread:$0]  (!%p6912_p7), %s225_s12, 2048, %s227_s28, %s215_s3, %s6798_s26, %s6798_s26, %s6799_s8  }
  0x2f   : > { %238 = sbr.rel (%p6894_p13) target bundleno = 831 (0x33f), region = 36 }
  0x34   : > { %s6934_s25 = sand.u32 1, %s6786_s19  }
  0x35   : > { %s5660_s9 = sshll.u32 %s6934_s25, 7  ;;  %s241_s13 = scalar_lea.sflag [#allocation4], %s6934_s25 }
  0x36   : > { %s6940_s20 = scalar_lea.vmem [#allocation3], %s5660_s9 }
  0x37   : > { %6765 = dma.done.wait (%p6879_p6), %s241_s13, 2048  }
  0x38   : > { %6767 = vsyncadd (%p6879_p6), %s241_s13, 4294965248 }
  0x39   : > { %6769 = dma.done.wait (%p47_p4), [#allocation7], 9232  }
  0x3a   : > { %6771 = vsyncadd (%p47_p4), [#allocation7], 4294958064  ;;  %v6800_v0 = vmov 0   ;;  %v6232_v1 = vld [vmem:[#allocation8 + $0x78] sm:$0xff]  ;;  %v6231_v2 = vld [vmem:[#allocation8 + $0x70] sm:$0xff]  ;;  %s8149_s16 = scalar_lea.vmem [#allocation9], %s5660_s9 }
  0x3b   : > { %425 = vst [vmem:[#allocation2 + $0x4] sm:$0xf] %v6800_v0  ;;  %6496 = vmatpush.bf16.msra.mxu1 %v6232_v1  ;;  %6497 = vmatpush.bf16.msra.mxu2 %v6232_v1  ;;  %v6468_v3 = vld [vmem:[%s6940_s20 + $0x18] sm:$0xff]   ;;  %v6959_v4 = vld [vmem:[#allocation6] ss:$0 sm:$0xff]  ;;  %v6230_v14 = vld [vmem:[#allocation8 + $0x68] sm:$0xff] }
  0x3c   : > { %426 = vst [vmem:[#allocation2 + $0x8] sm:$0xf] %v6800_v0  ;;  %6498 = vmatpush.bf16.msra.mxu3 %v6232_v1  ;;  %1114 = vmatpush.bf16.msra.mxu0 %v6232_v1  ;;  %v6336_v5 = vunpack.c.l.bf16 %v6468_v3  ;;  %v6337_v6 = vunpack.c.h.bf16 %v6468_v3  ;;  %v6964_v7 = vld [vmem:[%s8395_s2] ss:$0 sm:$0xff]  ;;  %v6472_v8 = vld [vmem:[%s6940_s20 + $0x38] sm:$0xff]   ;;  %v6229_v26 = vld [vmem:[#allocation8 + $0x60] sm:$0xff] }
  0x3d   : > { %424 = vst [vmem:[#allocation2] sm:$0xf] %v6800_v0  ;;  %v6476_v9 = vld [vmem:[%s6940_s20 + $0x58] sm:$0xff]   ;;  %v6352_v10 = vunpack.c.l.bf16 %v6472_v8  ;;  %v6353_v11 = vunpack.c.h.bf16 %v6472_v8  ;;  %v6226_v36 = vld [vmem:[#allocation8 + $0x48] sm:$0xff]  ;;  %v6469_v37 = vld [vmem:[%s6940_s20 + $0x20] sm:$0xff]   ;;  %s5664_s26 = sshll.u32 %s6934_s25, 3 }
  0x3e   : > { %427 = vst [vmem:[#allocation2 + $0xc] sm:$0xf] %v6800_v0  ;;  %v6368_v12 = vunpack.c.l.bf16 %v6476_v9  ;;  %v6369_v13 = vunpack.c.h.bf16 %v6476_v9  ;;  %v363_v15 = vmul.f32 %v6959_v4, %v6336_v5  ;;  %v364_v16 = vmul.f32 %v6959_v4, %v6337_v6  ;;  %v6228_v34 = vld [vmem:[#allocation8 + $0x58] sm:$0xff]  ;;  %v6227_v35 = vld [vmem:[#allocation8 + $0x50] sm:$0xff]  ;;  %v6225_v38 = vld [vmem:[#allocation8 + $0x40] sm:$0xff]  ;;  %s8334_s8 = scalar_lea.vmem [#allocation10], %s5664_s26 }
  0x3f   : > { %429 = vst [vmem:[#allocation2 + $0x110] sm:$0xf] %v6800_v0  ;;  %6499 = vmatpush.bf16.msra.mxu1 %v6231_v2  ;;  %6500 = vmatpush.bf16.msra.mxu2 %v6231_v2  ;;  %v371_v17 = vmul.f32 %v6959_v4, %v6352_v10  ;;  %v372_v18 = vmul.f32 %v6959_v4, %v6353_v11  ;;  %v6473_v39 = vld [vmem:[%s6940_s20 + $0x40] sm:$0xff]   ;;  %v6340_v42 = vunpack.c.l.bf16 %v6469_v37  ;;  %v6341_v45 = vunpack.c.h.bf16 %v6469_v37  ;;  %v6239_v52 = vld [vmem:[#allocation8 + $0xb0] sm:$0xff]  ;;  %v6470_v1 = vld [vmem:[%s6940_s20 + $0x28] sm:$0xff]   ;;  %s6321_s14 = sshll.u32 %s6855_s22, 7 }
  0x40   : > { %430 = vst [vmem:[#allocation2 + $0x114] sm:$0xf] %v6800_v0  ;;  %6501 = vmatpush.bf16.msra.mxu3 %v6231_v2  ;;  %1115 = vmatpush.bf16.msra.mxu0 %v6231_v2  ;;  %v379_v19 = vmul.f32 %v6959_v4, %v6368_v12  ;;  %v398_v20 = vadd.f32 %v6964_v7, %v363_v15  ;;  %v6240_v40 = vld [vmem:[#allocation8 + $0xb8] sm:$0xff]  ;;  %v6356_v48 = vunpack.c.l.bf16 %v6473_v39  ;;  %v6263_v53 = vld [vmem:[#allocation8 + $0xf0] sm:$0xff]  ;;  %v6357_v55 = vunpack.c.h.bf16 %v6473_v39  ;;  %v6238_v5 = vld [vmem:[#allocation8 + $0xa8] sm:$0xff]  ;;  %s5508_s12 = scalar_lea.hbm %s8397_s4, %s6321_s14  ;;  %s5509_s17 = sshll.u32 %s8149_s16, 4  ;;  %s5510_s17 = int_to_ptr.vmem [resolvable:$true] %s5509_s17 }
  0x41   : > { %431 = vst [vmem:[#allocation2 + $0x118] sm:$0xf] %v6800_v0  ;;  %v399_v21 = vadd.f32 %v6964_v7, %v364_v16  ;;  %v380_v22 = vmul.f32 %v6959_v4, %v6369_v13  ;;  %v406_v23 = vadd.f32 %v6964_v7, %v371_v17  ;;  %v407_v24 = vadd.f32 %v6964_v7, %v372_v18  ;;  %v6264_v41 = vld [vmem:[#allocation8 + $0xf8] sm:$0xff]  ;;  %v6223_v61 = vld [vmem:[#allocation8 + $0x30] sm:$0xff]  ;;  %v6262_v8 = vld [vmem:[#allocation8 + $0xe8] sm:$0xff]  ;;  %s5511_s15 = sshll.u32 %s5508_s12, 4  ;;  %s5512_s15 = int_to_ptr.hbm [resolvable:$true] %s5511_s15 }
  0x42   : > { %432 = vst [vmem:[#allocation2 + $0x11c] sm:$0xf] %v6800_v0  ;;  %v414_v25 = vadd.f32 %v6964_v7, %v379_v19  ;;  %v475_v27 = vpack.c.bf16 %v398_v20, %v398_v20  ;;  %v6477_v49 = vld [vmem:[%s6940_s20 + $0x60] sm:$0xff]   ;;  %v365_v54 = vmul.f32 %v6959_v4, %v6340_v42  ;;  %v366_v57 = vmul.f32 %v6959_v4, %v6341_v45  ;;  %v6271_v63 = vld [vmem:[#allocation8 + $0x130] sm:$0xff]  ;;  %v6474_v9 = vld [vmem:[%s6940_s20 + $0x48] sm:$0xff]   ;;  %s5492_s23 = scalar_lea.sflag [#allocation5], %s6934_s25 }
  0x43   : > { %434 = vst [vmem:[#allocation2 + $0x10] sm:$0xf] %v6800_v0  ;;  %6502 = vmatpush.bf16.msra.mxu1 %v6230_v14  ;;  %6503 = vmatpush.bf16.msra.mxu2 %v6230_v14  ;;  %v476_v28 = vpack.c.bf16 %v399_v21, %v399_v21  ;;  %v415_v29 = vadd.f32 %v6964_v7, %v380_v22  ;;  %v6201_v47 = vld [vmem:[#allocation2 + $0x4] sm:$0xff]  ;;  %v6224_v50 = vld [vmem:[#allocation8 + $0x38] sm:$0xff]  ;;  %v6372_v58 = vunpack.c.l.bf16 %v6477_v49  ;;  %v6373_v60 = vunpack.c.h.bf16 %v6477_v49  ;;  %v6471_v39 = vld [vmem:[%s6940_s20 + $0x30] sm:$0xff]   ;;  %s6706_s1 = sshra.s32 %s5512_s15, 4  ;;  %s6707_s1 = int_to_ptr.hbm [resolvable:$true] %s6706_s1 }
  0x44   : > { %435 = vst [vmem:[#allocation2 + $0x20] sm:$0xf] %v6800_v0  ;;  %6504 = vmatpush.bf16.msra.mxu3 %v6230_v14  ;;  %1116 = vmatpush.bf16.msra.mxu0 %v6230_v14  ;;  %v483_v30 = vpack.c.bf16 %v406_v23, %v406_v23  ;;  %v484_v31 = vpack.c.bf16 %v407_v24, %v407_v24  ;;  %v6272_v51 = vld [vmem:[#allocation8 + $0x138] sm:$0xff]  ;;  %v6344_v14 = vunpack.c.l.bf16 %v6470_v1  ;;  %v6478_v15 = vld [vmem:[%s6940_s20 + $0x68] sm:$0xff]   ;;  %v6345_v19 = vunpack.c.h.bf16 %v6470_v1  ;;  %s6708_s11 = scalar_lea.hbm %s6707_s1, 128  ;;  %p6713_p0 = scmp.lt.s32.totalorder %s6707_s1, %s8397_s4 }
  0x45   : > { %436 = vst [vmem:[#allocation2 + $0x30] sm:$0xf] %v6800_v0  ;;  %v491_v32 = vpack.c.bf16 %v414_v25, %v414_v25  ;;  %v492_v33 = vpack.c.bf16 %v415_v29, %v415_v29  ;;  %v6323_v56 = vld [vmem:[%s6940_s20] sm:$0xff]   ;;  %v373_v59 = vmul.f32 %v6959_v4, %v6356_v48  ;;  %v400_v2 = vadd.f32 %v6964_v7, %v365_v54  ;;  %v6222_v17 = vld [vmem:[#allocation8 + $0x28] sm:$0xff]  ;;  %p6709_p4 = scmp.ne.s32.totalorder %s6707_s1, %s6708_s11 }
  0x46   : > { %437 = vst [vmem:[#allocation2 + $0x40] sm:$0xf] %v6800_v0  ;;  %v6324_v62 = vunpack.c.l.bf16 %v6323_v56  ;;  %v374_v3 = vmul.f32 %v6959_v4, %v6357_v55  ;;  %v6325_v6 = vunpack.c.h.bf16 %v6323_v56  ;;  %v401_v10 = vadd.f32 %v6964_v7, %v366_v57  ;;  %v6270_v18 = vld [vmem:[#allocation8 + $0x128] sm:$0xff]  ;;  %v6237_v24 = vld [vmem:[#allocation8 + $0xa0] sm:$0xff]  ;;  %v6236_v42 = vld [vmem:[#allocation8 + $0x98] sm:$0xff] }
  0x47   : > { %438 = vst [vmem:[#allocation2 + $0x50] sm:$0xf] %v6800_v0  ;;  %6505 = vmatpush.bf16.msra.mxu1 %v6229_v26  ;;  %6506 = vmatpush.bf16.msra.mxu2 %v6229_v26  ;;  %v381_v11 = vmul.f32 %v6959_v4, %v6372_v58  ;;  %v7023_v12 = vadd.f32 %v6964_v7, %v373_v59  ;;  %v6360_v20 = vunpack.c.l.bf16 %v6474_v9  ;;  %v6261_v25 = vld [vmem:[#allocation8 + $0xe0] sm:$0xff]  ;;  %v6376_v29 = vunpack.c.l.bf16 %v6478_v15  ;;  %v6475_v48 = vld [vmem:[%s6940_s20 + $0x50] sm:$0xff]   ;;  %v6220_v57 = vld [vmem:[#allocation8 + $0x18] sm:$0xff]  ;;  %p6710_p6 = pnand %p6709_p4, %p6886_p11 }
  0x48   : > { %439 = vst [vmem:[#allocation2 + $0x60] sm:$0xf] %v6800_v0  ;;  %6507 = vmatpush.bf16.msra.mxu3 %v6229_v26  ;;  %1117 = vmatpush.bf16.msra.mxu0 %v6229_v26  ;;  %v382_v13 = vmul.f32 %v6959_v4, %v6373_v60  ;;  %v357_v16 = vmul.f32 %v6959_v4, %v6324_v62  ;;  %v6348_v54 = vunpack.c.l.bf16 %v6471_v39  ;;  %v6349_v58 = vunpack.c.h.bf16 %v6471_v39  ;;  %v6479_v59 = vld [vmem:[%s6940_s20 + $0x70] sm:$0xff]  }
  0x49   : > { %440 = vst [vmem:[#allocation2 + $0x70] sm:$0xf] %v6800_v0  ;;  %v477_v21 = vpack.c.bf16 %v400_v2, %v400_v2  ;;  %v409_v22 = vadd.f32 %v6964_v7, %v374_v3  ;;  %v358_v23 = vmul.f32 %v6959_v4, %v6325_v6  ;;  %v478_v26 = vpack.c.bf16 %v401_v10, %v401_v10  ;;  %v6235_v62 = vld [vmem:[#allocation8 + $0x90] sm:$0xff]  ;;  %v6268_v6 = vld [vmem:[#allocation8 + $0x118] sm:$0xff]  ;;  %p6711_p13 = pneg %p6710_p6 }
  0x4a   : > { %441 = vst [vmem:[#allocation2 + $0x80] sm:$0xf] %v6800_v0  ;;  %v368_v37 = vmul.f32 %v6959_v4, %v6345_v19  ;;  %v6364_v1 = vunpack.c.l.bf16 %v6475_v48  ;;  %vm582_vm0 = vsmask.f32 256  ;;  %vm583_vm1 = vsmask.f32 4368 }
  0x4b   : > { %508 = vst [vmem:[#allocation2 + $0x44] sm:$0xf] %v475_v27  ;;  %6508 = vmatpush.bf16.msra.mxu1 %v6228_v34  ;;  %6509 = vmatpush.bf16.msra.mxu2 %v6228_v34  ;;  %v416_v27 = vadd.f32 %v6964_v7, %v381_v11  ;;  %vm7086_vm2 = vmor %vm582_vm0, %vm583_vm1  ;;  %vm1452_vm3 = vsmask.f32 3328  ;;  %vm1453_vm4 = vsmask.f32 7440 }
  0x4c   : > { %509 = vst [vmem:[#allocation2 + $0x48] sm:$0xf] %v476_v28  ;;  %6510 = vmatpush.bf16.msra.mxu3 %v6228_v34  ;;  %1118 = vmatpush.bf16.msra.mxu0 %v6228_v34  ;;  %v6361_v28 = vunpack.c.h.bf16 %v6474_v9  ;;  %v6377_v34 = vunpack.c.h.bf16 %v6478_v15  ;;  %v403_v55 = vadd.f32 %v6964_v7, %v368_v37  ;;  %v6467_v9 = vld [vmem:[%s6940_s20 + $0x10] sm:$0xff]   ;;  %vm7094_vm5 = vmor %vm1452_vm3, %vm1453_vm4 }
  0x4d   : > { %516 = vst [vmem:[#allocation2 + $0x84] sm:$0xf] %v483_v30  ;;  %v6466_v30 = vld [vmem:[%s6940_s20 + $0x8] sm:$0xff]  }
  0x4e   : > { %517 = vst [vmem:[#allocation2 + $0x88] sm:$0xf] %v484_v31  ;;  %v485_v31 = vpack.c.bf16 %v7023_v12, %v7023_v12  ;;  %v376_v45 = vmul.f32 %v6959_v4, %v6361_v28  ;;  %v369_v12 = vmul.f32 %v6959_v4, %v6348_v54  ;;  %v6218_v54 = vld [vmem:[#allocation8 + $0x8] sm:$0xff] }
  0x4f   : > { %524 = vst [vmem:[#allocation2 + $0xc4] sm:$0xf] %v491_v32  ;;  %6511 = vmatpush.bf16.msra.mxu1 %v6227_v35  ;;  %6512 = vmatpush.bf16.msra.mxu2 %v6227_v35  ;;  %v417_v32 = vadd.f32 %v6964_v7, %v382_v13  ;;  %v6380_v13 = vunpack.c.l.bf16 %v6479_v59 }
  0x50   : > { %525 = vst [vmem:[#allocation2 + $0xc8] sm:$0xf] %v492_v33  ;;  %6513 = vmatpush.bf16.msra.mxu3 %v6227_v35  ;;  %1119 = vmatpush.bf16.msra.mxu0 %v6227_v35  ;;  %v367_v33 = vmul.f32 %v6959_v4, %v6344_v14  ;;  %v7042_v35 = vadd.f32 %v6964_v7, %v357_v16  ;;  %v6219_v16 = vld [vmem:[#allocation8 + $0x10] sm:$0xff] }
  0x51   : > { %442 = vst [vmem:[#allocation2 + $0x90] sm:$0xf] %v6800_v0  ;;  %v494_v49 = vpack.c.bf16 %v417_v32, %v417_v32  ;;  %v411_v2 = vadd.f32 %v6964_v7, %v376_v45  ;;  %v480_v14 = vpack.c.bf16 %v403_v55, %v403_v55  ;;  %v404_v28 = vadd.f32 %v6964_v7, %v369_v12  ;;  %v6280_v12 = vld [vmem:[#allocation8 + $0x178] sm:$0xff] }
  0x52   : > { %443 = vst [vmem:[#allocation2 + $0xa0] sm:$0xf] %v6800_v0 }
  0x53   : > { %444 = vst [vmem:[#allocation2 + $0xb0] sm:$0xf] %v6800_v0  ;;  %6514 = vmatpush.bf16.msra.mxu1 %v6226_v36  ;;  %6515 = vmatpush.bf16.msra.mxu2 %v6226_v36  ;;  %v6205_v43 = vld [vmem:[#allocation2 + $0x44] sm:$0xff] }
  0x54   : > { %445 = vst [vmem:[#allocation2 + $0xc0] sm:$0xf] %v6800_v0  ;;  %6516 = vmatpush.bf16.msra.mxu3 %v6226_v36  ;;  %1120 = vmatpush.bf16.msra.mxu0 %v6226_v36  ;;  %v6221_v36 = vld [vmem:[#allocation8 + $0x20] sm:$0xff] }
  0x55   : > { %446 = vst [vmem:[#allocation2 + $0xd0] sm:$0xf] %v6800_v0  ;;  %v6209_v44 = vld [vmem:[#allocation2 + $0x84] sm:$0xff] }
  0x56   : > { %447 = vst [vmem:[#allocation2 + $0xe0] sm:$0xf] %v6800_v0 }
  0x57   : > { %448 = vst [vmem:[#allocation2 + $0xf0] sm:$0xf] %v6800_v0  ;;  %6517 = vmatpush.bf16.msra.mxu1 %v6225_v38  ;;  %6518 = vmatpush.bf16.msra.mxu2 %v6225_v38  ;;  %v6213_v46 = vld [vmem:[#allocation2 + $0xc4] sm:$0xff] }
  0x58   : > { %449 = vst [vmem:[#allocation2 + $0x100] sm:$0xf] %v6800_v0  ;;  %6519 = vmatpush.bf16.msra.mxu3 %v6225_v38  ;;  %1121 = vmatpush.bf16.msra.mxu0 %v6225_v38  ;;  %v375_v38 = vmul.f32 %v6959_v4, %v6360_v20  ;;  %v377_v20 = vmul.f32 %v6959_v4, %v6364_v1  ;;  %v535_v1 = vld [vmem:[#allocation2 + $0x4] sm:$0xf] }
  0x59   : > { %452 = vst [vmem:[#allocation2 + $0x1c] sm:$0xf] %v6800_v0 }
  0x5a   : > { %453 = vst [vmem:[#allocation2 + $0x2c] sm:$0xf] %v6800_v0  ;;  %1142 = vmatmul.bf16.vlgmr.msra.gmra.mxu1 %v6205_v43  ;;  %1162 = vmatmul.bf16.vlgmr.msra.gmra.mxu2 %v6209_v44  ;;  %v6328_v43 = vunpack.c.l.bf16 %v6466_v30  ;;  %v493_v44 = vpack.c.bf16 %v416_v27, %v416_v27  ;;  %v410_v56 = vadd.f32 %v6964_v7, %v375_v38 }
  0x5b   : > { %454 = vst [vmem:[#allocation2 + $0x3c] sm:$0xf] %v6800_v0  ;;  %1968 = vmatpush.bf16.msrb.mxu2 %v6240_v40  ;;  %1182 = vmatmul.bf16.vlgmr.msra.gmra.mxu3 %v6213_v46  ;;  %v486_v40 = vpack.c.bf16 %v409_v22, %v409_v22  ;;  %v383_v46 = vmul.f32 %v6959_v4, %v6376_v29 }
  0x5c   : > { %455 = vst [vmem:[#allocation2 + $0x4c] sm:$0xf] %v6800_v0  ;;  %2618 = vmatpush.bf16.msrb.mxu3 %v6264_v41  ;;  %1122 = vmatmul.bf16.vlgmr.msra.gmra.mxu0 %v6201_v47  ;;  %v393_v41 = vadd.f32 %v6964_v7, %v358_v23  ;;  %v6329_v47 = vunpack.c.h.bf16 %v6466_v30  ;;  %v487_v15 = vpack.c.bf16 %v410_v56, %v410_v56  ;;  %v6257_v56 = vld [vmem:[#allocation8 + $0xc0] sm:$0xff] }
  0x5d   : > { %456 = vst [vmem:[#allocation2 + $0x5c] sm:$0xf] %v6800_v0  ;;  %1315 = vmatpush.bf16.msrb.mxu1 %v6224_v50  ;;  %2900 = vmatpush.bf16.msrb.mxu0 %v6272_v51  ;;  %v402_v50 = vadd.f32 %v6964_v7, %v367_v33  ;;  %v384_v51 = vmul.f32 %v6959_v4, %v6377_v34 }
  0x5e   : > { %457 = vst [vmem:[#allocation2 + $0x6c] sm:$0xf] %v6800_v0  ;;  %v470_v60 = vpack.c.bf16 %v393_v41, %v393_v41  ;;  %v418_v3 = vadd.f32 %v6964_v7, %v383_v46  ;;  %v488_v22 = vpack.c.bf16 %v411_v2, %v411_v2  ;;  %v385_v29 = vmul.f32 %v6959_v4, %v6380_v13  ;;  %v536_v2 = vld [vmem:[#allocation2 + $0x8] sm:$0xf]  ;;  %v6320_v13 = vld [vmem:[#allocation8 + $0x238] sm:$0xff] }
  0x5f   : > { %458 = vst [vmem:[#allocation2 + $0x7c] sm:$0xf] %v6800_v0  ;;  %1969 = vmatpush.bf16.msrb.mxu2 %v6239_v52  ;;  %v6260_v52 = vld [vmem:[#allocation8 + $0xd8] sm:$0xff]  ;;  %v479_v10 = vpack.c.bf16 %v402_v50, %v402_v50  ;;  %v419_v11 = vadd.f32 %v6964_v7, %v384_v51  ;;  %v481_v41 = vpack.c.bf16 %v404_v28, %v404_v28  ;;  %v6258_v51 = vld [vmem:[#allocation8 + $0xc8] sm:$0xff] }
  0x60   : > { %459 = vst [vmem:[#allocation2 + $0x8c] sm:$0xf] %v6800_v0  ;;  %2619 = vmatpush.bf16.msrb.mxu3 %v6263_v53  ;;  %v6269_v53 = vld [vmem:[#allocation8 + $0x120] sm:$0xff]  ;;  %v495_v27 = vpack.c.bf16 %v418_v3, %v418_v3 }
  0x61   : > { %460 = vst [vmem:[#allocation2 + $0x9c] sm:$0xf] %v6800_v0  ;;  %1316 = vmatpush.bf16.msrb.mxu1 %v6223_v61  ;;  %2901 = vmatpush.bf16.msrb.mxu0 %v6271_v63  ;;  %v359_v61 = vmul.f32 %v6959_v4, %v6328_v43  ;;  %v6259_v63 = vld [vmem:[#allocation8 + $0xd0] sm:$0xff]  ;;  %v496_v30 = vpack.c.bf16 %v419_v11, %v419_v11  ;;  %v1404_v3 = vld [vmem:[#allocation2 + $0x4] sm:$0xf]  ;;  %v6312_v11 = vld [vmem:[#allocation8 + $0x1f8] sm:$0xff] }
  0x62   : > { %461 = vst [vmem:[#allocation2 + $0xac] sm:$0xf] %v6800_v0 }
  0x63   : > { %462 = vst [vmem:[#allocation2 + $0xbc] sm:$0xf] %v6800_v0  ;;  %1970 = vmatpush.bf16.msrb.mxu2 %v6238_v5  ;;  %v360_v5 = vmul.f32 %v6959_v4, %v6329_v47  ;;  %v394_v19 = vadd.f32 %v6964_v7, %v359_v61  ;;  %v6234_v47 = vld [vmem:[#allocation8 + $0x88] sm:$0xff] }
  0x64   : > { %463 = vst [vmem:[#allocation2 + $0xcc] sm:$0xf] %v6800_v0  ;;  %2620 = vmatpush.bf16.msrb.mxu3 %v6262_v8  ;;  %v6365_v8 = vunpack.c.h.bf16 %v6475_v48 }
  0x65   : > { %464 = vst [vmem:[#allocation2 + $0xdc] sm:$0xf] %v6800_v0  ;;  %1317 = vmatpush.bf16.msrb.mxu1 %v6222_v17  ;;  %2902 = vmatpush.bf16.msrb.mxu0 %v6270_v18  ;;  %v370_v17 = vmul.f32 %v6959_v4, %v6349_v58  ;;  %v6381_v18 = vunpack.c.h.bf16 %v6479_v59  ;;  %v395_v23 = vadd.f32 %v6964_v7, %v360_v5  ;;  %v1405_v5 = vld [vmem:[#allocation2 + $0x8] sm:$0xf] }
  0x66   : > { %465 = vst [vmem:[#allocation2 + $0xec] sm:$0xf] %v6800_v0  ;;  %v471_v34 = vpack.c.bf16 %v394_v19, %v394_v19 }
  0x67   : > { %466 = vst [vmem:[#allocation2 + $0xfc] sm:$0xf] %v6800_v0  ;;  %1971 = vmatpush.bf16.msrb.mxu2 %v6237_v24  ;;  %v378_v24 = vmul.f32 %v6959_v4, %v6365_v8  ;;  %v386_v32 = vmul.f32 %v6959_v4, %v6381_v18  ;;  %v472_v37 = vpack.c.bf16 %v395_v23, %v395_v23 }
  0x68   : > { %467 = vst [vmem:[#allocation2 + $0x10c] sm:$0xf] %v6800_v0  ;;  %2621 = vmatpush.bf16.msrb.mxu3 %v6261_v25  ;;  %v6333_v25 = vunpack.c.h.bf16 %v6467_v9 }
  0x69   : > { %433 = vst [vmem:[#allocation2] sm:$0xf] %v6800_v0  ;;  %1318 = vmatpush.bf16.msrb.mxu1 %v6221_v36  ;;  %2903 = vmatpush.bf16.msrb.mxu0 %v6269_v53  ;;  %v413_v38 = vadd.f32 %v6964_v7, %v378_v24  ;;  %v603_v24 = vshll.u32 %v536_v2, 16 }
  0x6a   : > { %450 = vst [vmem:[#allocation2 + $0x110] sm:$0xf] %v6800_v0  ;;  %v362_v39 = vmul.f32 %v6959_v4, %v6333_v25 }
  0x6b   : > { %451 = vst [vmem:[#allocation2 + $0xc] sm:$0xf] %v6800_v0  ;;  %1972 = vmatpush.bf16.msrb.mxu2 %v6236_v42  ;;  %v420_v42 = vadd.f32 %v6964_v7, %v385_v29 }
  0x6c   : > { %468 = vst [vmem:[#allocation2 + $0x11c] sm:$0xf] %v6800_v0  ;;  %v469_v0 = vpack.c.bf16 %v7042_v35, %v7042_v35  ;;  %2622 = vmatpush.bf16.msrb.mxu3 %v6260_v52  ;;  %v412_v35 = vadd.f32 %v6964_v7, %v377_v20  ;;  %v6267_v52 = vld [vmem:[#allocation8 + $0x110] sm:$0xff] }
  0x6d   : > { %510 = vst [vmem:[#allocation2 + $0x54] sm:$0xf] %v477_v21  ;;  %1319 = vmatpush.bf16.msrb.mxu1 %v6220_v57  ;;  %v6332_v21 = vunpack.c.l.bf16 %v6467_v9  ;;  %2904 = vmatpush.bf16.msrb.mxu0 %v6268_v6  ;;  %v497_v50 = vpack.c.bf16 %v420_v42, %v420_v42  ;;  %v6266_v57 = vld [vmem:[#allocation8 + $0x108] sm:$0xff]  ;;  %v6304_v6 = vld [vmem:[#allocation8 + $0x1b8] sm:$0xff]  ;;  %v591_v9 = vshrl.u32 %v535_v1, 16 }
  0x6e   : > { %511 = vst [vmem:[#allocation2 + $0x58] sm:$0xf] %v478_v26  ;;  %v489_v46 = vpack.c.bf16 %v412_v35, %v412_v35 }
  0x6f   : > { %518 = vst [vmem:[#allocation2 + $0x94] sm:$0xf] %v485_v31  ;;  %1973 = vmatpush.bf16.msrb.mxu2 %v6235_v62  ;;  %v405_v31 = vadd.f32 %v6964_v7, %v370_v17  ;;  %v361_v36 = vmul.f32 %v6959_v4, %v6332_v21  ;;  %v397_v4 = vadd.f32 %v6964_v7, %v362_v39  ;;  %v1469_v17 = vshrl.u32 %v1405_v5, 16 }
  0x70   : > { %519 = vst [vmem:[#allocation2 + $0x98] sm:$0xf] %v486_v40  ;;  %2623 = vmatpush.bf16.msrb.mxu3 %v6259_v63  ;;  %v534_v8 = vld [vmem:[#allocation2] sm:$0x8]  ;;  %v593_v21 = vrot.slane %v591_v9, 7 }
  0x71   : > { %526 = vst [vmem:[#allocation2 + $0xd4] sm:$0xf] %v493_v44  ;;  %1320 = vmatpush.bf16.msrb.mxu1 %v6219_v16  ;;  %v482_v43 = vpack.c.bf16 %v405_v31, %v405_v31  ;;  %v421_v44 = vadd.f32 %v6964_v7, %v386_v32  ;;  %v396_v48 = vadd.f32 %v6964_v7, %v361_v36  ;;  %v6217_v7 = vld [vmem:[#allocation8] sm:$0xff]  ;;  %v1465_v16 = vshll.u32 %v1405_v5, 16  ;;  %v2089_v31 = vld [vmem:[#allocation2 + $0x10] sm:$0x8] }
  0x72   : > { %527 = vst [vmem:[#allocation2 + $0xd8] sm:$0xf] %v494_v49  ;;  %v490_v49 = vpack.c.bf16 %v413_v38, %v413_v38  ;;  %2905 = vmatpush.bf16.msrb.mxu0 %v6267_v52  ;;  %v474_v58 = vpack.c.bf16 %v397_v4, %v397_v4  ;;  %v586_v18 = vshrl.u32 %v534_v8, 16  ;;  %v1471_v29 = vrot.slane %v1469_v17, 4 }
  0x73   : > { %502 = vst [vmem:[#allocation2 + $0x14] sm:$0xf] %v469_v0  ;;  %1974 = vmatpush.bf16.msrb.mxu2 %v6234_v47  ;;  %v498_v53 = vpack.c.bf16 %v421_v44, %v421_v44  ;;  %v6233_v0 = vld [vmem:[#allocation8 + $0x80] sm:$0xff]  ;;  %v473_v55 = vpack.c.bf16 %v396_v48, %v396_v48  ;;  %v1467_v28 = vrot.slane %v1465_v16, 5 }
  0x74   : > { %503 = vst [vmem:[#allocation2 + $0x18] sm:$0xf] %v470_v60  ;;  %2624 = vmatpush.bf16.msrb.mxu3 %v6258_v51  ;;  %v6265_v60 = vld [vmem:[#allocation8 + $0x100] sm:$0xff]  ;;  %v5665_v35 = vrot.slane %v586_v18, 11 }
  0x75   : > { %v6206_v26 = vld [vmem:[#allocation2 + $0x54] sm:$0xff]  ;;  %512 = vst [vmem:[#allocation2 + $0x64] sm:$0xf] %v479_v10  ;;  %1321 = vmatpush.bf16.msrb.mxu1 %v6218_v54  ;;  %v600_v10 = vshrl.u32 %v536_v2, 16 }
  0x76   : > { %513 = vst [vmem:[#allocation2 + $0x68] sm:$0xf] %v480_v14  ;;  %1147 = vmatmul.bf16.gmra.mxu1 %v6206_v26  ;;  %2906 = vmatpush.bf16.msrb.mxu0 %v6266_v57  ;;  %v1456_v14 = vshrl.u32 %v1404_v3, 16 }
  0x77   : > { %v6210_v33 = vld [vmem:[#allocation2 + $0x94] sm:$0xff]  ;;  %520 = vst [vmem:[#allocation2 + $0xa4] sm:$0xf] %v487_v15  ;;  %1975 = vmatpush.bf16.msrb.mxu2 %v6233_v0  ;;  %v1459_v15 = vshll.u32 %v1404_v3, 16  ;;  %v602_v23 = vrot.slane %v600_v10, 7 }
  0x78   : > { %521 = vst [vmem:[#allocation2 + $0xa8] sm:$0xf] %v488_v22  ;;  %1167 = vmatmul.bf16.gmra.mxu2 %v6210_v33  ;;  %2625 = vmatpush.bf16.msrb.mxu3 %v6257_v56  ;;  %v594_v22 = vshll.u32 %v535_v1, 16  ;;  %v1458_v26 = vrot.slane %v1456_v14, 4  ;;  %v1409_v14 = vld [vmem:[#allocation2 + $0x1c] sm:$0x1] }
  0x79   : > { %v6214_v40 = vld [vmem:[#allocation2 + $0xd4] sm:$0xff]  ;;  %528 = vst [vmem:[#allocation2 + $0xe4] sm:$0xf] %v495_v27  ;;  %1322 = vmatpush.bf16.msrb.mxu1 %v6217_v7  ;;  %v1461_v27 = vrot.slane %v1459_v15, 5  ;;  %v605_v38 = vor.u32 %v603_v24, %v602_v23 }
  0x7a   : > { %529 = vst [vmem:[#allocation2 + $0xe8] sm:$0xf] %v496_v30  ;;  %1187 = vmatmul.bf16.gmra.mxu3 %v6214_v40  ;;  %2907 = vmatpush.bf16.msrb.mxu0 %v6265_v60  ;;  %v2090_v19 = vld [vmem:[#allocation2 + $0x14] sm:$0xf]  ;;  %v1406_v30 = vld [vmem:[#allocation2 + $0xc] sm:$0x1]  ;;  %v596_v36 = vor.u32 %v594_v22, %v593_v21 }
  0x7b   : > { %v6202_v45 = vld [vmem:[#allocation2 + $0x14] sm:$0xff]  ;;  %504 = vst [vmem:[#allocation2 + $0x24] sm:$0xf] %v471_v34  ;;  %4233 = vmatpush.bf16.msra.mxu2 %v6304_v6  ;;  %v2143_v32 = vshrl.u32 %v2090_v19, 16  ;;  %v1462_v40 = vor.u32 %v1461_v27, %v1458_v26  ;;  %v1475_v42 = vshll.u32 %v1406_v30, 16  ;;  %v1499_v30 = vshll.u32 %v1409_v14, 16 }
  0x7c   : > { %505 = vst [vmem:[#allocation2 + $0x28] sm:$0xf] %v472_v37  ;;  %1127 = vmatmul.bf16.gmra.mxu0 %v6202_v45  ;;  %4515 = vmatpush.bf16.msra.mxu3 %v6312_v11  ;;  %v2091_v20 = vld [vmem:[#allocation2 + $0x18] sm:$0xf]  ;;  %v598_v37 = vrot.slane %v593_v21, 4  ;;  %v597_v4 = vsel %vm7086_vm2, %v5665_v35, %v596_v36 }
  0x7d   : > { %514 = vst [vmem:[#allocation2 + $0x74] sm:$0xf] %v481_v41  ;;  %v6207_v59 = vld [vmem:[#allocation2 + $0x64] sm:$0xff]  ;;  %3582 = vmatpush.bf16.msra.mxu1 %v6280_v12  ;;  %v2152_v33 = vshrl.u32 %v2091_v20, 16  ;;  %v1472_v41 = vor.u32 %v1471_v29, %v1467_v28  ;;  %v2145_v45 = vrot.slane %v2143_v32, 7  ;;  %v2155_v48 = vshll.u32 %v2091_v20, 16 }
  0x7e   : > { %515 = vst [vmem:[#allocation2 + $0x78] sm:$0xf] %v482_v43  ;;  %5197 = vmatpush.bf16.msra.mxu0 %v6320_v13  ;;  %v2138_v43 = vshrl.u32 %v2089_v31, 16  ;;  %v1408_v51 = vld [vmem:[#allocation2 + $0x18] sm:$0xf]  ;;  %v606_v52 = vsel %vm7086_vm2, %v598_v37, %v605_v38  ;;  %v1477_v0 = vrot.slane %v1475_v42, 5  ;;  %v1203_v5 = vunpack.c.l.b16 %v597_v4 }
  0x7f   : > { %522 = vst [vmem:[#allocation2 + $0xb4] sm:$0xf] %v489_v46  ;;  %v6211_v61 = vld [vmem:[#allocation2 + $0xa4] sm:$0xff]  ;;  %v2146_v46 = vshll.u32 %v2090_v19, 16  ;;  %v2154_v47 = vrot.slane %v2152_v33, 7  ;;  %v1473_v54 = vrot.slane %v1472_v41, 4  ;;  %v1204_v10 = vunpack.c.l.b16 %v606_v52 }
  0x80   : > { %523 = vst [vmem:[#allocation2 + $0xb8] sm:$0xf] %v490_v49  ;;  %v5841_v57 = vrot.slane %v2138_v43, 11  ;;  %v2150_v7 = vrot.slane %v2145_v45, 4  ;;  %v539_v60 = vld [vmem:[#allocation2 + $0x18] sm:$0xf] }
  0x81   : > { %530 = vst [vmem:[#allocation2 + $0xf4] sm:$0xf] %v497_v50  ;;  %v6215_v62 = vld [vmem:[#allocation2 + $0xe4] sm:$0xff]  ;;  %v1407_v50 = vld [vmem:[#allocation2 + $0x14] sm:$0xf]  ;;  %v1489_v1 = vshll.u32 %v1408_v51, 16  ;;  %v1478_v8 = vsel %vm7094_vm5, %v1473_v54, %v1477_v0  ;;  %v1235_v29 = vpack.c.b16 %v1204_v10, %v1203_v5 }
  0x82   : > { %531 = vst [vmem:[#allocation2 + $0xf8] sm:$0xf] %v498_v53  ;;  %v1463_v53 = vrot.slane %v1462_v40, 4  ;;  %v1493_v2 = vshrl.u32 %v1408_v51, 16  ;;  %v622_v9 = vshrl.u32 %v539_v60, 16  ;;  %v1857_v21 = vunpack.c.l.b16 %v1478_v8  ;;  %v6311_v5 = vld [vmem:[#allocation8 + $0x1f0] sm:$0xff] }
  0x83   : > { %506 = vst [vmem:[#allocation2 + $0x34] sm:$0xf] %v473_v55  ;;  %v6203_v63 = vld [vmem:[#allocation2 + $0x24] sm:$0xff]  ;;  %v538_v55 = vld [vmem:[#allocation2 + $0x14] sm:$0xf]  ;;  %v1491_v17 = vrot.slane %v1489_v1, 5  ;;  %4516 = vmatpush.bf16.msra.mxu3 %v6311_v5 }
  0x84   : > { %507 = vst [vmem:[#allocation2 + $0x38] sm:$0xf] %v474_v58  ;;  %v2148_v58 = vor.u32 %v2146_v46, %v2145_v45  ;;  %v613_v3 = vshrl.u32 %v538_v55, 16  ;;  %v1468_v6 = vsel %vm7094_vm5, %v1463_v53, %v1467_v28  ;;  %v1495_v18 = vrot.slane %v1493_v2, 4  ;;  %v2093_v19 = vld [vmem:[#allocation2 + $0x24] sm:$0xf] }
  0x85   : > { %v6208_v25 = vld [vmem:[#allocation2 + $0x74] sm:$0xff]  ;;  %v1856_v20 = vunpack.c.l.b16 %v1468_v6  ;;  %v616_v23 = vshll.u32 %v538_v55, 16  ;;  %v2094_v24 = vld [vmem:[#allocation2 + $0x28] sm:$0xf]  ;;  %v624_v27 = vrot.slane %v622_v9, 7  ;;  %v625_v28 = vshll.u32 %v539_v60, 16 }
  0x86   : > { %1152 = vmatmul.bf16.gmra.mxu1 %v6207_v59  ;;  %v2157_v59 = vor.u32 %v2155_v48, %v2154_v47  ;;  %v2149_v11 = vsel %vm7086_vm2, %v5841_v57, %v2148_v58  ;;  %v615_v22 = vrot.slane %v613_v3, 7  ;;  %v2165_v31 = vshrl.u32 %v2093_v19, 16  ;;  %v1410_v51 = vld [vmem:[#allocation2 + $0x24] sm:$0xf]  ;;  %v1411_v53 = vld [vmem:[#allocation2 + $0x28] sm:$0xf] }
  0x87   : > { %v6212_v34 = vld [vmem:[#allocation2 + $0xb4] sm:$0xff]  ;;  %v1496_v33 = vor.u32 %v1495_v18, %v1491_v17  ;;  %v2174_v35 = vshrl.u32 %v2094_v24, 16  ;;  %v1888_v36 = vpack.c.b16 %v1857_v21, %v1856_v20  ;;  %v627_v42 = vor.u32 %v625_v28, %v624_v27 }
  0x88   : > { %1172 = vmatmul.bf16.gmra.mxu2 %v6211_v61  ;;  %v537_v61 = vld [vmem:[#allocation2 + $0x10] sm:$0x8]  ;;  %v2158_v12 = vsel %vm7086_vm2, %v2150_v7, %v2157_v59  ;;  %v618_v40 = vor.u32 %v616_v23, %v615_v22  ;;  %v620_v41 = vrot.slane %v615_v22, 4  ;;  %v1501_v43 = vrot.slane %v1499_v30, 5 }
  0x89   : > { %v6216_v44 = vld [vmem:[#allocation2 + $0xf4] sm:$0xff]  ;;  %v608_v13 = vshrl.u32 %v537_v61, 16  ;;  %v2507_v26 = vunpack.c.l.b16 %v2158_v12  ;;  %v2167_v45 = vrot.slane %v2165_v31, 7  ;;  %v2168_v46 = vshll.u32 %v2093_v19, 16  ;;  %v541_v61 = vld [vmem:[#allocation2 + $0x24] sm:$0xf] }
  0x8a   : > { %1192 = vmatmul.bf16.gmra.mxu3 %v6215_v62  ;;  %v1480_v62 = vshrl.u32 %v1407_v50, 16  ;;  %v1497_v48 = vrot.slane %v1496_v33, 4  ;;  %v2177_v4 = vshll.u32 %v2094_v24, 16  ;;  %v628_v54 = vsel %vm7086_vm2, %v620_v41, %v627_v42  ;;  %v6303_v58 = vld [vmem:[#allocation8 + $0x1b0] sm:$0xff] }
  0x8b   : > { %v6204_v49 = vld [vmem:[#allocation2 + $0x34] sm:$0xff]  ;;  %v5666_v37 = vrot.slane %v608_v13, 11  ;;  %v2170_v55 = vor.u32 %v2168_v46, %v2167_v45  ;;  %v2172_v57 = vrot.slane %v2167_v45, 4  ;;  %v1507_v1 = vshll.u32 %v1410_v51, 16  ;;  %4234 = vmatpush.bf16.msra.mxu2 %v6303_v58 }
  0x8c   : > { %1132 = vmatmul.bf16.gmra.mxu0 %v6203_v63  ;;  %v1483_v63 = vshll.u32 %v1407_v50, 16  ;;  %v1482_v15 = vrot.slane %v1480_v62, 4  ;;  %v6241_v50 = vld [vmem:[#allocation2 + $0x14] sm:$0xff]  ;;  %v1502_v59 = vsel %vm7094_vm5, %v1497_v48, %v1501_v43  ;;  %v542_v62 = vld [vmem:[#allocation2 + $0x28] sm:$0xf]  ;;  %v1513_v2 = vshll.u32 %v1411_v53, 16 }
  0x8d   : > { %v619_v52 = vsel %vm7086_vm2, %v5666_v37, %v618_v40  ;;  %v1517_v3 = vshrl.u32 %v1411_v53, 16  ;;  %v6279_v6 = vld [vmem:[#allocation8 + $0x170] sm:$0xff]  ;;  %v1206_v10 = vunpack.c.l.b16 %v628_v54  ;;  %v1859_v12 = vunpack.c.l.b16 %v1502_v59 }
  0x8e   : > { %v1485_v16 = vrot.slane %v1483_v63, 5  ;;  %v1504_v63 = vshrl.u32 %v1410_v51, 16  ;;  %v6319_v8 = vld [vmem:[#allocation8 + $0x230] sm:$0xff]  ;;  %v1205_v9 = vunpack.c.l.b16 %v619_v52  ;;  %3583 = vmatpush.bf16.msra.mxu1 %v6279_v6  ;;  %v635_v18 = vshrl.u32 %v541_v61, 16  ;;  %v6242_v51 = vld [vmem:[#allocation2 + $0x24] sm:$0xff] }
  0x8f   : > { %v2096_v13 = vld [vmem:[#allocation2 + $0x34] sm:$0xf]  ;;  %v2097_v14 = vld [vmem:[#allocation2 + $0x38] sm:$0xf]  ;;  %v644_v19 = vshrl.u32 %v542_v62, 16  ;;  %5198 = vmatpush.bf16.msra.mxu0 %v6319_v8  ;;  %v1509_v21 = vrot.slane %v1507_v1, 5 }
  0x90   : > { %v1486_v32 = vor.u32 %v1485_v16, %v1482_v15  ;;  %v1506_v20 = vrot.slane %v1504_v63, 4  ;;  %v1515_v22 = vrot.slane %v1513_v2, 5  ;;  %v1519_v23 = vrot.slane %v1517_v3, 4  ;;  %v544_v59 = vld [vmem:[#allocation2 + $0x34] sm:$0xf] }
  0x91   : > { %v1236_v24 = vpack.c.b16 %v1206_v10, %v1205_v9  ;;  %v2187_v27 = vshrl.u32 %v2096_v13, 16  ;;  %v2196_v28 = vshrl.u32 %v2097_v14, 16  ;;  %v2190_v43 = vshll.u32 %v2096_v13, 16  ;;  %v543_v10 = vld [vmem:[#allocation2 + $0x30] sm:$0x8] }
  0x92   : > { %v1487_v47 = vrot.slane %v1486_v32, 4  ;;  %v638_v32 = vshll.u32 %v541_v61, 16  ;;  %v1510_v37 = vor.u32 %v1509_v21, %v1506_v20  ;;  %v2199_v45 = vshll.u32 %v2097_v14, 16  ;;  %v2099_v20 = vld [vmem:[#allocation2 + $0x44] sm:$0xf] }
  0x93   : > { %v2189_v42 = vrot.slane %v2187_v27, 7 }
  0x94   : > { %v1492_v7 = vsel %vm7094_vm5, %v1487_v47, %v1491_v17  ;;  %v540_v17 = vld [vmem:[#allocation2 + $0x20] sm:$0x8]  ;;  %v1511_v52 = vrot.slane %v1510_v37, 4 }
  0x95   : > { %v630_v31 = vshrl.u32 %v540_v17, 16  ;;  %v2194_v58 = vrot.slane %v2189_v42, 4 }
  0x96   : > { %1157 = vmatmul.bf16.gmra.mxu1 %v6208_v25  ;;  %v2506_v25 = vunpack.c.l.b16 %v2149_v11  ;;  %v1858_v11 = vunpack.c.l.b16 %v1492_v7  ;;  %v1516_v5 = vsel %vm7094_vm5, %v1511_v52, %v1515_v22  ;;  %v6243_v52 = vld [vmem:[#allocation2 + $0x34] sm:$0xff] }
  0x97   : > { %v5667_v47 = vrot.slane %v630_v31, 11  ;;  %v1860_v17 = vunpack.c.l.b16 %v1516_v5 }
  0x98   : > { %1177 = vmatmul.bf16.gmra.mxu2 %v6212_v34  ;;  %v2092_v34 = vld [vmem:[#allocation2 + $0x20] sm:$0x8]  ;;  %v2538_v38 = vpack.c.b16 %v2507_v26, %v2506_v25  ;;  %v1412_v25 = vld [vmem:[#allocation2 + $0x2c] sm:$0x1]  ;;  %v2095_v26 = vld [vmem:[#allocation2 + $0x30] sm:$0x8]  ;;  %v1889_v33 = vpack.c.b16 %v1859_v12, %v1858_v11 }
  0x99   : > { %v1523_v40 = vshll.u32 %v1412_v25, 16  ;;  %v2182_v41 = vshrl.u32 %v2095_v26, 16  ;;  %v657_v11 = vshrl.u32 %v544_v59, 16  ;;  %v1415_v25 = vld [vmem:[#allocation2 + $0x3c] sm:$0x1] }
  0x9a   : > { %1197 = vmatmul.bf16.gmra.mxu3 %v6216_v44  ;;  %v2160_v44 = vshrl.u32 %v2092_v34, 16  ;;  %v637_v34 = vrot.slane %v635_v18, 7  ;;  %v2100_v26 = vld [vmem:[#allocation2 + $0x48] sm:$0xf] }
  0x9b   : > { %v1525_v54 = vrot.slane %v1523_v40, 5  ;;  %v659_v27 = vrot.slane %v657_v11, 7  ;;  %v2218_v37 = vshrl.u32 %v2100_v26, 16 }
  0x9c   : > { %1137 = vmatmul.bf16.gmra.mxu0 %v6204_v49  ;;  %v2176_v49 = vrot.slane %v2174_v35, 7  ;;  %v5842_v0 = vrot.slane %v2160_v44, 11  ;;  %v646_v35 = vrot.slane %v644_v19, 7  ;;  %v2198_v44 = vrot.slane %v2196_v28, 7 }
  0x9d   : > { %v640_v48 = vor.u32 %v638_v32, %v637_v34  ;;  %v660_v28 = vshll.u32 %v544_v59, 16  ;;  %v6302_v59 = vld [vmem:[#allocation8 + $0x1a8] sm:$0xff] }
  0x9e   : > { %v2179_v60 = vor.u32 %v2177_v4, %v2176_v49  ;;  %v2171_v15 = vsel %vm7086_vm2, %v5842_v0, %v2170_v55  ;;  %v642_v49 = vrot.slane %v637_v34, 4  ;;  %v1414_v0 = vld [vmem:[#allocation2 + $0x38] sm:$0xf]  ;;  %v5843_v55 = vrot.slane %v2182_v41, 11  ;;  %4235 = vmatpush.bf16.msra.mxu2 %v6302_v59 }
  0x9f   : > { %v2201_v7 = vor.u32 %v2199_v45, %v2198_v44  ;;  %v641_v63 = vsel %vm7086_vm2, %v5667_v47, %v640_v48  ;;  %v1537_v2 = vshll.u32 %v1414_v0, 16  ;;  %v1541_v3 = vshrl.u32 %v1414_v0, 16  ;;  %v1417_v0 = vld [vmem:[#allocation2 + $0x48] sm:$0xf] }
  0xa0   : > { %v2180_v16 = vsel %vm7086_vm2, %v2172_v57, %v2179_v60  ;;  %v2192_v57 = vor.u32 %v2190_v43, %v2189_v42  ;;  %v545_v60 = vld [vmem:[#allocation2 + $0x38] sm:$0xf]  ;;  %v1207_v13 = vunpack.c.l.b16 %v641_v63  ;;  %v662_v42 = vor.u32 %v660_v28, %v659_v27  ;;  %v547_v63 = vld [vmem:[#allocation2 + $0x44] sm:$0xf]  ;;  %v2101_v28 = vld [vmem:[#allocation2 + $0x50] sm:$0x8] }
  0xa1   : > { %v2509_v30 = vunpack.c.l.b16 %v2180_v16  ;;  %v2202_v9 = vsel %vm7086_vm2, %v2194_v58, %v2201_v7  ;;  %v666_v12 = vshrl.u32 %v545_v60, 16  ;;  %v1539_v18 = vrot.slane %v1537_v2, 5 }
  0xa2   : > { %v2193_v8 = vsel %vm7086_vm2, %v5843_v55, %v2192_v57  ;;  %v1543_v19 = vrot.slane %v1541_v3, 4  ;;  %v664_v43 = vrot.slane %v659_v27, 4  ;;  %v2212_v48 = vshll.u32 %v2099_v20, 16  ;;  %v1418_v27 = vld [vmem:[#allocation2 + $0x4c] sm:$0x1] }
  0xa3   : > { %v1561_v5 = vshll.u32 %v1417_v0, 16 }
  0xa4   : > { %v1544_v34 = vor.u32 %v1543_v19, %v1539_v18  ;;  %v546_v19 = vld [vmem:[#allocation2 + $0x40] sm:$0x8] }
  0xa6   : > { %1323 = vmatmul.bf16.vlgmr.msrb.gmra.mxu1 %v1235_v29  ;;  %v2508_v29 = vunpack.c.l.b16 %v2171_v15 }
  0xa8   : > { %1976 = vmatmul.bf16.vlgmr.msrb.gmra.mxu2 %v1888_v36  ;;  %v647_v36 = vshll.u32 %v542_v62, 16  ;;  %v2539_v46 = vpack.c.b16 %v2509_v30, %v2508_v29  ;;  %v668_v29 = vrot.slane %v666_v12, 7  ;;  %v669_v30 = vshll.u32 %v545_v60, 16 }
  0xaa   : > { %2626 = vmatmul.bf16.vlgmr.msrb.gmra.mxu3 %v2538_v38  ;;  %v1520_v38 = vor.u32 %v1519_v23, %v1515_v22  ;;  %v649_v4 = vor.u32 %v647_v36, %v646_v35  ;;  %v2510_v22 = vunpack.c.l.b16 %v2193_v8  ;;  %v2511_v23 = vunpack.c.l.b16 %v2202_v9  ;;  %v2098_v36 = vld [vmem:[#allocation2 + $0x40] sm:$0x8]  ;;  %v6310_v8 = vld [vmem:[#allocation8 + $0x1e8] sm:$0xff] }
  0xab   : > { %v1547_v35 = vshll.u32 %v1415_v25, 16  ;;  %v671_v44 = vor.u32 %v669_v30, %v668_v29  ;;  %v6278_v9 = vld [vmem:[#allocation8 + $0x168] sm:$0xff]  ;;  %4517 = vmatpush.bf16.msra.mxu3 %v6310_v8 }
  0xac   : > { %2908 = vmatmul.bf16.vlgmr.msrb.gmra.mxu0 %v6241_v50  ;;  %v1413_v50 = vld [vmem:[#allocation2 + $0x34] sm:$0xf]  ;;  %v1521_v53 = vrot.slane %v1520_v38, 4  ;;  %v650_v1 = vsel %vm7086_vm2, %v642_v49, %v649_v4  ;;  %v2540_v40 = vpack.c.b16 %v2511_v23, %v2510_v22  ;;  %v1545_v49 = vrot.slane %v1544_v34, 4  ;;  %3584 = vmatpush.bf16.msra.mxu1 %v6278_v9 }
  0xad   : > { %v1528_v61 = vshrl.u32 %v1413_v50, 16  ;;  %v1531_v62 = vshll.u32 %v1413_v50, 16  ;;  %v1208_v14 = vunpack.c.l.b16 %v650_v1  ;;  %v1549_v4 = vrot.slane %v1547_v35, 5  ;;  %v548_v1 = vld [vmem:[#allocation2 + $0x48] sm:$0xf] }
  0xae   : > { %v1526_v6 = vsel %vm7094_vm5, %v1521_v53, %v1525_v54  ;;  %v2220_v50 = vrot.slane %v2218_v37, 7  ;;  %v1416_v53 = vld [vmem:[#allocation2 + $0x44] sm:$0xf]  ;;  %v672_v55 = vsel %vm7086_vm2, %v664_v43, %v671_v44  ;;  %v674_v34 = vshrl.u32 %v546_v19, 16 }
  0xaf   : > { %v1530_v15 = vrot.slane %v1528_v61, 4  ;;  %v1533_v16 = vrot.slane %v1531_v62, 5  ;;  %v1861_v21 = vunpack.c.l.b16 %v1526_v6  ;;  %v1237_v31 = vpack.c.b16 %v1208_v14, %v1207_v13 }
  0xb0   : > { %v1550_v60 = vsel %vm7094_vm5, %v1545_v49, %v1549_v4  ;;  %v1552_v2 = vshrl.u32 %v1416_v53, 16  ;;  %v1555_v3 = vshll.u32 %v1416_v53, 16  ;;  %v1565_v6 = vshrl.u32 %v1417_v0, 16  ;;  %v6244_v53 = vld [vmem:[#allocation2 + $0x44] sm:$0xff] }
  0xb1   : > { %v1534_v32 = vor.u32 %v1533_v16, %v1530_v15  ;;  %v1890_v38 = vpack.c.b16 %v1861_v21, %v1860_v17  ;;  %v1210_v12 = vunpack.c.l.b16 %v672_v55  ;;  %v1863_v14 = vunpack.c.l.b16 %v1550_v60  ;;  %v2102_v15 = vld [vmem:[#allocation2 + $0x54] sm:$0xf]  ;;  %v2103_v16 = vld [vmem:[#allocation2 + $0x58] sm:$0xf] }
  0xb2   : > { %v688_v21 = vshrl.u32 %v548_v1, 16  ;;  %v1554_v22 = vrot.slane %v1552_v2, 4  ;;  %v1557_v23 = vrot.slane %v1555_v3, 5  ;;  %v1567_v25 = vrot.slane %v1565_v6, 4 }
  0xb3   : > { %v1535_v45 = vrot.slane %v1534_v32, 4  ;;  %v2231_v29 = vshrl.u32 %v2102_v15, 16  ;;  %v2240_v30 = vshrl.u32 %v2103_v16, 16  ;;  %v2226_v43 = vshrl.u32 %v2101_v28, 16  ;;  %v1421_v28 = vld [vmem:[#allocation2 + $0x5c] sm:$0x1] }
  0xb4   : > { %v690_v37 = vrot.slane %v688_v21, 7  ;;  %v5669_v49 = vrot.slane %v674_v34, 11 }
  0xb5   : > { %v1540_v57 = vsel %vm7094_vm5, %v1535_v45, %v1539_v18  ;;  %v2233_v44 = vrot.slane %v2231_v29, 7  ;;  %v2234_v45 = vshll.u32 %v2102_v15, 16  ;;  %v2106_v29 = vld [vmem:[#allocation2 + $0x68] sm:$0xf] }
  0xb6   : > { %1328 = vmatmul.bf16.gmra.mxu1 %v1236_v24  ;;  %v652_v24 = vshrl.u32 %v543_v10, 16  ;;  %v6318_v10 = vld [vmem:[#allocation8 + $0x228] sm:$0xff]  ;;  %v1862_v13 = vunpack.c.l.b16 %v1540_v57  ;;  %v1420_v57 = vld [vmem:[#allocation2 + $0x58] sm:$0xf] }
  0xb7   : > { %5199 = vmatpush.bf16.msra.mxu0 %v6318_v10  ;;  %v2238_v59 = vrot.slane %v2233_v44, 4  ;;  %v1589_v6 = vshrl.u32 %v1420_v57, 16 }
  0xb8   : > { %1981 = vmatmul.bf16.gmra.mxu2 %v1889_v33  ;;  %v2209_v33 = vshrl.u32 %v2099_v20, 16  ;;  %v5668_v41 = vrot.slane %v652_v24, 11  ;;  %v679_v20 = vshrl.u32 %v547_v63, 16  ;;  %v1563_v24 = vrot.slane %v1561_v5, 5 }
  0xb9   : > { %v1585_v5 = vshll.u32 %v1420_v57, 16 }
  0xba   : > { %2631 = vmatmul.bf16.gmra.mxu3 %v2539_v46  ;;  %v2204_v46 = vshrl.u32 %v2098_v36, 16  ;;  %v2211_v47 = vrot.slane %v2209_v33, 7  ;;  %v663_v54 = vsel %vm7086_vm2, %v5668_v41, %v662_v42  ;;  %v681_v35 = vrot.slane %v679_v20, 7 }
  0xbb   : > { %v1209_v11 = vunpack.c.l.b16 %v663_v54  ;;  %v682_v36 = vshll.u32 %v547_v63, 16  ;;  %v1568_v41 = vor.u32 %v1567_v25, %v1563_v24  ;;  %v1571_v42 = vshll.u32 %v1418_v27, 16 }
  0xbc   : > { %2913 = vmatmul.bf16.gmra.mxu0 %v6242_v51  ;;  %v2221_v51 = vshll.u32 %v2100_v26, 16  ;;  %v5844_v58 = vrot.slane %v2204_v46, 11  ;;  %v2214_v7 = vor.u32 %v2212_v48, %v2211_v47  ;;  %v2216_v61 = vrot.slane %v2211_v47, 4 }
  0xbd   : > { %v1238_v26 = vpack.c.b16 %v1210_v12, %v1209_v11  ;;  %v2242_v46 = vrot.slane %v2240_v30, 7  ;;  %v2243_v47 = vshll.u32 %v2103_v16, 16  ;;  %v684_v4 = vor.u32 %v682_v36, %v681_v35  ;;  %v549_v12 = vld [vmem:[#allocation2 + $0x50] sm:$0x8] }
  0xbe   : > { %v2223_v62 = vor.u32 %v2221_v51, %v2220_v50  ;;  %v2215_v17 = vsel %vm7086_vm2, %v5844_v58, %v2214_v7  ;;  %v686_v50 = vrot.slane %v681_v35, 4  ;;  %v1569_v0 = vrot.slane %v1568_v41, 4 }
  0xbf   : > { %v2512_v32 = vunpack.c.l.b16 %v2215_v17  ;;  %v1573_v55 = vrot.slane %v1571_v42, 5  ;;  %v5845_v58 = vrot.slane %v2226_v43, 11  ;;  %v2236_v7 = vor.u32 %v2234_v45, %v2233_v44 }
  0xc0   : > { %v2224_v18 = vsel %vm7086_vm2, %v2216_v61, %v2223_v62  ;;  %v2245_v60 = vor.u32 %v2243_v47, %v2242_v46  ;;  %v550_v61 = vld [vmem:[#allocation2 + $0x54] sm:$0xf]  ;;  %v551_v62 = vld [vmem:[#allocation2 + $0x58] sm:$0xf]  ;;  %v685_v2 = vsel %vm7086_vm2, %v5669_v49, %v684_v4  ;;  %v7156_v21 = vrot.slane %v1585_v5, 5 }
  0xc1   : > { %v2513_v33 = vunpack.c.l.b16 %v2224_v18  ;;  %v1574_v9 = vsel %vm7094_vm5, %v1569_v0, %v1573_v55  ;;  %v2237_v10 = vsel %vm7086_vm2, %v5845_v58, %v2236_v7  ;;  %v1211_v15 = vunpack.c.l.b16 %v685_v2  ;;  %v1422_v49 = vld [vmem:[#allocation2 + $0x64] sm:$0xf]  ;;  %v6245_v7 = vld [vmem:[#allocation2 + $0x54] sm:$0xff]  ;;  %v554_v2 = vld [vmem:[#allocation2 + $0x68] sm:$0xf] }
  0xc2   : > { %v2246_v11 = vsel %vm7086_vm2, %v2238_v59, %v2245_v60  ;;  %v2514_v25 = vunpack.c.l.b16 %v2237_v10  ;;  %v696_v27 = vshrl.u32 %v549_v12, 16  ;;  %v2262_v41 = vshrl.u32 %v2106_v29, 16  ;;  %v553_v59 = vld [vmem:[#allocation2 + $0x64] sm:$0xf] }
  0xc3   : > { %v2541_v48 = vpack.c.b16 %v2513_v33, %v2512_v32  ;;  %v713_v33 = vshll.u32 %v551_v62, 16  ;;  %v2265_v58 = vshll.u32 %v2106_v29, 16  ;;  %v1600_v60 = vshrl.u32 %v1422_v49, 16 }
  0xc4   : > { %v5670_v45 = vrot.slane %v696_v27, 11  ;;  %v2264_v57 = vrot.slane %v2262_v41, 7  ;;  %v2109_v41 = vld [vmem:[#allocation2 + $0x78] sm:$0xf] }
  0xc6   : > { %1333 = vmatmul.bf16.gmra.mxu1 %v1237_v31  ;;  %v1891_v31 = vpack.c.b16 %v1863_v14, %v1862_v13  ;;  %v701_v13 = vshrl.u32 %v550_v61, 16  ;;  %v710_v14 = vshrl.u32 %v551_v62, 16 }
  0xc8   : > { %1986 = vmatmul.bf16.gmra.mxu2 %v1890_v38  ;;  %v691_v38 = vshll.u32 %v548_v1, 16  ;;  %v703_v30 = vrot.slane %v701_v13, 7  ;;  %v712_v32 = vrot.slane %v710_v14, 7  ;;  %v2267_v14 = vor.u32 %v2265_v58, %v2264_v57 }
  0xc9   : > { %v2284_v57 = vshrl.u32 %v2109_v41, 16 }
  0xca   : > { %2636 = vmatmul.bf16.gmra.mxu3 %v2540_v40  ;;  %v1558_v40 = vor.u32 %v1557_v23, %v1554_v22  ;;  %v693_v51 = vor.u32 %v691_v38, %v690_v37  ;;  %v1591_v22 = vrot.slane %v1589_v6, 4  ;;  %v2105_v23 = vld [vmem:[#allocation2 + $0x64] sm:$0xf]  ;;  %v1595_v38 = vshll.u32 %v1421_v28, 16 }
  0xcb   : > { %v2253_v36 = vshrl.u32 %v2105_v23, 16  ;;  %v708_v47 = vrot.slane %v703_v30, 4 }
  0xcc   : > { %2918 = vmatmul.bf16.gmra.mxu0 %v6243_v52  ;;  %v1419_v52 = vld [vmem:[#allocation2 + $0x54] sm:$0xf]  ;;  %v1559_v54 = vrot.slane %v1558_v40, 4  ;;  %v694_v3 = vsel %vm7086_vm2, %v686_v50, %v693_v51  ;;  %v1592_v37 = vor.u32 %v1591_v22, %v7156_v21  ;;  %v2104_v40 = vld [vmem:[#allocation2 + $0x60] sm:$0x8]  ;;  %v1597_v55 = vrot.slane %v1595_v38, 5 }
  0xcd   : > { %v1576_v63 = vshrl.u32 %v1419_v52, 16  ;;  %v1579_v1 = vshll.u32 %v1419_v52, 16  ;;  %v1212_v16 = vunpack.c.l.b16 %v694_v3  ;;  %v2248_v50 = vshrl.u32 %v2104_v40, 16  ;;  %v6309_v22 = vld [vmem:[#allocation8 + $0x1e0] sm:$0xff] }
  0xce   : > { %v1564_v8 = vsel %vm7094_vm5, %v1559_v54, %v1563_v24  ;;  %v1865_v24 = vunpack.c.l.b16 %v1574_v9  ;;  %v2255_v51 = vrot.slane %v2253_v36, 7  ;;  %v2256_v52 = vshll.u32 %v2105_v23, 16  ;;  %4518 = vmatpush.bf16.msra.mxu3 %v6309_v22  ;;  %v557_v22 = vld [vmem:[#allocation2 + $0x78] sm:$0xf] }
  0xcf   : > { %v1578_v17 = vrot.slane %v1576_v63, 4  ;;  %v1581_v18 = vrot.slane %v1579_v1, 5  ;;  %v1864_v20 = vunpack.c.l.b16 %v1564_v8  ;;  %v1239_v34 = vpack.c.b16 %v1212_v16, %v1211_v15  ;;  %v552_v16 = vld [vmem:[#allocation2 + $0x60] sm:$0x8] }
  0xd0   : > { %v1593_v0 = vrot.slane %v1592_v37, 4  ;;  %v5846_v9 = vrot.slane %v2248_v50, 11  ;;  %v2258_v10 = vor.u32 %v2256_v52, %v2255_v51  ;;  %v2260_v13 = vrot.slane %v2255_v51, 4 }
  0xd1   : > { %v1582_v35 = vor.u32 %v1581_v18, %v1578_v17  ;;  %v1892_v42 = vpack.c.b16 %v1865_v24, %v1864_v20  ;;  %v723_v15 = vshrl.u32 %v553_v59, 16  ;;  %v732_v17 = vshrl.u32 %v554_v2, 16 }
  0xd2   : > { %v1598_v12 = vsel %vm7094_vm5, %v1593_v0, %v1597_v55  ;;  %v1602_v18 = vrot.slane %v1600_v60, 4  ;;  %v2259_v29 = vsel %vm7086_vm2, %v5846_v9, %v2258_v10  ;;  %v726_v36 = vshll.u32 %v553_v59, 16  ;;  %v1425_v9 = vld [vmem:[#allocation2 + $0x74] sm:$0xf]  ;;  %v1426_v10 = vld [vmem:[#allocation2 + $0x78] sm:$0xf] }
  0xd3   : > { %v1583_v4 = vrot.slane %v1582_v35, 4  ;;  %v1867_v28 = vunpack.c.l.b16 %v1598_v12  ;;  %v725_v35 = vrot.slane %v723_v15, 7  ;;  %v734_v37 = vrot.slane %v732_v17, 7 }
  0xd4   : > { %v735_v38 = vshll.u32 %v554_v2, 16 }
  0xd5   : > { %v1588_v8 = vsel %vm7094_vm5, %v1583_v4, %v7156_v21  ;;  %v2516_v4 = vunpack.c.l.b16 %v2259_v29  ;;  %v728_v55 = vor.u32 %v726_v36, %v725_v35  ;;  %v730_v58 = vrot.slane %v725_v35, 4 }
  0xd6   : > { %1338 = vmatmul.bf16.gmra.mxu1 %v1238_v26  ;;  %v2515_v26 = vunpack.c.l.b16 %v2246_v11  ;;  %v6301_v11 = vld [vmem:[#allocation8 + $0x1a0] sm:$0xff]  ;;  %v1866_v27 = vunpack.c.l.b16 %v1588_v8  ;;  %v2287_v8 = vshll.u32 %v2109_v41, 16 }
  0xd7   : > { %v7154_v19 = vpop.f32.mrf.mxu1  ;;  %4236 = vmatpush.bf16.msra.mxu2 %v6301_v11  ;;  %v6246_v11 = vld [vmem:[#allocation2 + $0x64] sm:$0xff] }
  0xd8   : > { %1991 = vmatmul.bf16.gmra.mxu2 %v1891_v31  ;;  %v704_v31 = vshll.u32 %v550_v61, 16  ;;  %v2542_v43 = vpack.c.b16 %v2515_v26, %v2514_v25  ;;  %v1603_v61 = vshll.u32 %v1422_v49, 16  ;;  %v6277_v25 = vld [vmem:[#allocation8 + $0x160] sm:$0xff] }
  0xd9   : > { %v7159_v44 = vpop.f32.mrf.mxu0  ;;  %3585 = vmatpush.bf16.msra.mxu1 %v6277_v25  ;;  %v1633_v25 = vshll.u32 %v1426_v10, 16  ;;  %v2111_v41 = vld [vmem:[#allocation2 + $0x84] sm:$0xf] }
  0xda   : > { %2641 = vmatmul.bf16.gmra.mxu3 %v2541_v48  ;;  %v706_v46 = vor.u32 %v704_v31, %v703_v30  ;;  %v715_v48 = vor.u32 %v713_v33, %v712_v32  ;;  %v1605_v20 = vrot.slane %v1603_v61, 5  ;;  %v1424_v30 = vld [vmem:[#allocation2 + $0x6c] sm:$0x1]  ;;  %v2108_v31 = vld [vmem:[#allocation2 + $0x74] sm:$0xf]  ;;  %v2268_v33 = vsel %vm7086_vm2, %v2260_v13, %v2267_v14 }
  0xdb   : > { %v2517_v50 = vunpack.c.l.b16 %v2268_v33  ;;  %v556_v14 = vld [vmem:[#allocation2 + $0x74] sm:$0xf] }
  0xdc   : > { %2923 = vmatmul.bf16.gmra.mxu0 %v6244_v53  ;;  %v1423_v53 = vld [vmem:[#allocation2 + $0x68] sm:$0xf]  ;;  %v707_v1 = vsel %vm7086_vm2, %v5670_v45, %v706_v46  ;;  %v716_v6 = vsel %vm7086_vm2, %v708_v47, %v715_v48  ;;  %v1606_v40 = vor.u32 %v1605_v20, %v1602_v18  ;;  %v1619_v45 = vshll.u32 %v1424_v30, 16  ;;  %v2107_v46 = vld [vmem:[#allocation2 + $0x70] sm:$0x8] }
  0xdd   : > { %v7161_v54 = vpop.f32.mrf.mxu2  ;;  %v1609_v3 = vshll.u32 %v1423_v53, 16  ;;  %v1613_v5 = vshrl.u32 %v1423_v53, 16  ;;  %v1213_v23 = vunpack.c.l.b16 %v707_v1  ;;  %v1214_v26 = vunpack.c.l.b16 %v716_v6  ;;  %v6317_v48 = vld [vmem:[#allocation8 + $0x220] sm:$0xff] }
  0xde   : > { %v7163_v62 = vpop.f32.mrf.mxu3  ;;  %v2275_v47 = vshrl.u32 %v2108_v31, 16  ;;  %v1893_v53 = vpack.c.b16 %v1867_v28, %v1866_v27  ;;  %5200 = vmatpush.bf16.msra.mxu0 %v6317_v48  ;;  %v1607_v59 = vrot.slane %v1606_v40, 4  ;;  %v2270_v60 = vshrl.u32 %v2107_v46, 16 }
  0xdf   : > { %8416 = vst [vmem:[#allocation18_spill] sm:$0xff] %v7163_v62  ;;  %v7165_v63 = vpop.f32.mrf.mxu1  ;;  %v7176_v24 = vrot.slane %v1609_v3, 5  ;;  %v1615_v21 = vrot.slane %v1613_v5, 4  ;;  %v1240_v49 = vpack.c.b16 %v1214_v26, %v1213_v23  ;;  %v1621_v1 = vrot.slane %v1619_v45, 5 }
  0xe0   : > { %v2277_v2 = vrot.slane %v2275_v47, 7  ;;  %v2278_v3 = vshll.u32 %v2108_v31, 16  ;;  %v2543_v5 = vpack.c.b16 %v2517_v50, %v2516_v4  ;;  %v2286_v6 = vrot.slane %v2284_v57, 7 }
  0xe1   : > { %v7180_v32 = vpop.f32.mrf.mxu0  ;;  %v5847_v18 = vrot.slane %v2270_v60, 11  ;;  %v1624_v23 = vshrl.u32 %v1425_v9, 16  ;;  %v1637_v26 = vshrl.u32 %v1426_v10, 16  ;;  %v745_v31 = vshrl.u32 %v556_v14, 16 }
  0xe2   : > { %v2280_v20 = vor.u32 %v2278_v3, %v2277_v2  ;;  %v2282_v29 = vrot.slane %v2277_v2, 4  ;;  %v2289_v30 = vor.u32 %v2287_v8, %v2286_v6  ;;  %v754_v40 = vshrl.u32 %v557_v22, 16 }
  0xe3   : > { %v1626_v45 = vrot.slane %v1624_v23, 4  ;;  %v7210_v47 = vrot.slane %v1633_v25, 5  ;;  %v1639_v48 = vrot.slane %v1637_v26, 4  ;;  %v747_v50 = vrot.slane %v745_v31, 7 }
  0xe4   : > { %v2297_v57 = vshrl.u32 %v2111_v41, 16 }
  0xe6   : > { %1343 = vmatmul.bf16.gmra.mxu1 %v1239_v34  ;;  %v718_v34 = vshrl.u32 %v552_v16, 16  ;;  %v7187_v51 = vpop.f32.mrf.mxu3  ;;  %v1612_v16 = vsel %vm7094_vm5, %v1607_v59, %v7176_v24 }
  0xe7   : > { %8417 = vst [vmem:[#allocation19_spill] sm:$0xff] %v7187_v51  ;;  %v1868_v36 = vunpack.c.l.b16 %v1612_v16  ;;  %v2300_v16 = vshll.u32 %v2111_v41, 16 }
  0xe8   : > { %1996 = vmatmul.bf16.gmra.mxu2 %v1892_v42  ;;  %v7184_v42 = vpop.f32.mrf.mxu2  ;;  %v5671_v0 = vrot.slane %v718_v34, 11  ;;  %v555_v34 = vld [vmem:[#allocation2 + $0x70] sm:$0x8] }
  0xe9   : > { %v740_v4 = vshrl.u32 %v555_v34, 16 }
  0xea   : > { %2646 = vmatmul.bf16.gmra.mxu3 %v2542_v43  ;;  %v1616_v43 = vor.u32 %v1615_v21, %v7176_v24  ;;  %v729_v12 = vsel %vm7086_vm2, %v5671_v0, %v728_v55  ;;  %v1627_v21 = vshll.u32 %v1425_v9, 16  ;;  %v1427_v0 = vld [vmem:[#allocation2 + $0x7c] sm:$0x1]  ;;  %v2110_v55 = vld [vmem:[#allocation2 + $0x80] sm:$0x8] }
  0xeb   : > { %v1215_v24 = vunpack.c.l.b16 %v729_v12  ;;  %v1643_v6 = vshll.u32 %v1427_v0, 16 }
  0xec   : > { %2928 = vmatmul.bf16.gmra.mxu0 %v6245_v7  ;;  %v737_v7 = vor.u32 %v735_v38, %v734_v37  ;;  %v1617_v61 = vrot.slane %v1616_v43, 4  ;;  %v2281_v38 = vsel %vm7086_vm2, %v5847_v18, %v2280_v20  ;;  %v2112_v43 = vld [vmem:[#allocation2 + $0x88] sm:$0xf]  ;;  %v1629_v46 = vrot.slane %v1627_v21, 5 }
  0xed   : > { %v2518_v60 = vunpack.c.l.b16 %v2281_v38  ;;  %v2309_v18 = vshll.u32 %v2112_v43, 16 }
  0xee   : > { %v738_v13 = vsel %vm7086_vm2, %v730_v58, %v737_v7  ;;  %v1622_v17 = vsel %vm7094_vm5, %v1617_v61, %v1621_v1  ;;  %v2306_v58 = vshrl.u32 %v2112_v43, 16  ;;  %v756_v61 = vrot.slane %v754_v40, 7  ;;  %v560_v40 = vld [vmem:[#allocation2 + $0x88] sm:$0xf] }
  0xef   : > { %v1216_v33 = vunpack.c.l.b16 %v738_v13  ;;  %v1869_v37 = vunpack.c.l.b16 %v1622_v17  ;;  %v757_v1 = vshll.u32 %v557_v22, 16  ;;  %v1630_v3 = vor.u32 %v1629_v46, %v1626_v45  ;;  %v1429_v45 = vld [vmem:[#allocation2 + $0x88] sm:$0xf] }
  0xf0   : > { %v2292_v13 = vshrl.u32 %v2110_v55, 16  ;;  %v2308_v17 = vrot.slane %v2306_v58, 7  ;;  %v752_v22 = vrot.slane %v747_v50, 4  ;;  %v558_v58 = vld [vmem:[#allocation2 + $0x80] sm:$0x8] }
  0xf1   : > { %v1241_v59 = vpack.c.b16 %v1216_v33, %v1215_v24  ;;  %v1894_v10 = vpack.c.b16 %v1869_v37, %v1868_v36  ;;  %v759_v23 = vor.u32 %v757_v1, %v756_v61  ;;  %v1631_v25 = vrot.slane %v1630_v3, 4  ;;  %v559_v24 = vld [vmem:[#allocation2 + $0x84] sm:$0xf]  ;;  %v6247_v33 = vld [vmem:[#allocation2 + $0x74] sm:$0xff] }
  0xf2   : > { %v5848_v34 = vrot.slane %v2292_v13, 11  ;;  %v2311_v38 = vor.u32 %v2309_v18, %v2308_v17  ;;  %v1657_v61 = vshll.u32 %v1429_v45, 16  ;;  %v1661_v1 = vshrl.u32 %v1429_v45, 16  ;;  %v7244_v13 = vld [vmem:[#allocation2 + $0x98] sm:$0xf] }
  0xf3   : > { %v7189_v52 = vpop.f32.mrf.mxu1  ;;  %v760_v43 = vsel %vm7086_vm2, %v752_v22, %v759_v23  ;;  %v770_v17 = vshll.u32 %v559_v24, 16  ;;  %v6276_v22 = vld [vmem:[#allocation8 + $0x158] sm:$0xff] }
  0xf4   : > { %3586 = vmatpush.bf16.msra.mxu1 %v6276_v22  ;;  %v561_v22 = vld [vmem:[#allocation2 + $0x90] sm:$0x8] }
  0xf6   : > { %1348 = vmatmul.bf16.gmra.mxu1 %v1240_v49  ;;  %v2290_v49 = vsel %vm7086_vm2, %v2282_v29, %v2289_v30  ;;  %v1645_v29 = vrot.slane %v1643_v6, 5  ;;  %v1428_v30 = vld [vmem:[#allocation2 + $0x84] sm:$0xf] }
  0xf7   : > { %v2519_v2 = vunpack.c.l.b16 %v2290_v49  ;;  %v1648_v46 = vshrl.u32 %v1428_v30, 16 }
  0xf8   : > { %2001 = vmatmul.bf16.gmra.mxu2 %v1893_v53  ;;  %v748_v53 = vshll.u32 %v556_v14, 16  ;;  %v2299_v14 = vrot.slane %v2297_v57, 7 }
  0xf9   : > { %v7195_v15 = vpop.f32.mrf.mxu0  ;;  %v2544_v21 = vpack.c.b16 %v2519_v2, %v2518_v60  ;;  %v6308_v2 = vld [vmem:[#allocation8 + $0x1d8] sm:$0xff] }
  0xfa   : > { %2651 = vmatmul.bf16.gmra.mxu3 %v2543_v5  ;;  %v1640_v5 = vor.u32 %v1639_v48, %v7210_v47  ;;  %v750_v12 = vor.u32 %v748_v53, %v747_v50  ;;  %v2302_v36 = vor.u32 %v2300_v16, %v2299_v14  ;;  %v2304_v37 = vrot.slane %v2299_v14, 4  ;;  %v6300_v53 = vld [vmem:[#allocation8 + $0x198] sm:$0xff] }
  0xfb   : > { %v7202_v27 = vpop.f32.mrf.mxu2  ;;  %v7204_v28 = vpop.f32.mrf.mxu1  ;;  %v1636_v48 = vsel %vm7094_vm5, %v1631_v25, %v7210_v47  ;;  %v1651_v50 = vshll.u32 %v1428_v30, 16  ;;  %4237 = vmatpush.bf16.msra.mxu2 %v6300_v53  ;;  %v762_v14 = vshrl.u32 %v558_v58, 16  ;;  %4519 = vmatpush.bf16.msra.mxu3 %v6308_v2  ;;  %v7246_v30 = vrot.slane %v1657_v61, 5 }
  0xfc   : > { %2933 = vmatmul.bf16.gmra.mxu0 %v6246_v11  ;;  %v5672_v11 = vrot.slane %v740_v4, 11  ;;  %v1641_v26 = vrot.slane %v1640_v5, 4  ;;  %v767_v4 = vshrl.u32 %v559_v24, 16  ;;  %v2303_v60 = vsel %vm7086_vm2, %v5848_v34, %v2302_v36  ;;  %v6316_v24 = vld [vmem:[#allocation8 + $0x218] sm:$0xff] }
  0xfd   : > { %v7206_v35 = vpop.f32.mrf.mxu3  ;;  %v2312_v47 = vsel %vm7086_vm2, %v2304_v37, %v2311_v38  ;;  %v1218_v5 = vunpack.c.l.b16 %v760_v43  ;;  %v1870_v6 = vunpack.c.l.b16 %v1636_v48  ;;  %v1653_v18 = vrot.slane %v1651_v50, 5  ;;  %v2113_v37 = vld [vmem:[#allocation2 + $0x90] sm:$0x8]  ;;  %5201 = vmatpush.bf16.msra.mxu0 %v6316_v24 }
  0xfe   : > { %8418 = vst [vmem:[#allocation20_spill] sm:$0xff] %v7206_v35  ;;  %v751_v31 = vsel %vm7086_vm2, %v5672_v11, %v750_v12  ;;  %v1646_v49 = vsel %vm7094_vm5, %v1641_v26, %v1645_v29  ;;  %v1650_v11 = vrot.slane %v1648_v46, 4  ;;  %v2114_v12 = vld [vmem:[#allocation2 + $0x94] sm:$0xf]  ;;  %v769_v16 = vrot.slane %v767_v4, 7 }
  0xff   : > { %v1217_v57 = vunpack.c.l.b16 %v751_v31  ;;  %v2520_v23 = vunpack.c.l.b16 %v2303_v60  ;;  %v779_v26 = vshll.u32 %v560_v40, 16  ;;  %v1430_v29 = vld [vmem:[#allocation2 + $0x8c] sm:$0x1]  ;;  %v1663_v31 = vrot.slane %v1661_v1, 4  ;;  %v562_v60 = vld [vmem:[#allocation2 + $0x94] sm:$0xf] }
 0x100   : > { %v2328_v38 = vshrl.u32 %v7244_v13, 16  ;;  %v5673_v45 = vrot.slane %v762_v14, 11  ;;  %v772_v46 = vor.u32 %v770_v17, %v769_v16  ;;  %v1654_v48 = vor.u32 %v1653_v18, %v1650_v11 }
 0x101   : > { %v7214_v7 = vpop.f32.mrf.mxu0  ;;  %v1242_v36 = vpack.c.b16 %v1218_v5, %v1217_v57  ;;  %v774_v53 = vrot.slane %v769_v16, 4  ;;  %v563_v57 = vld [vmem:[#allocation2 + $0x98] sm:$0xf]  ;;  %v2314_v61 = vshrl.u32 %v2113_v37, 16  ;;  %v2322_v2 = vshll.u32 %v2114_v12, 16 }
 0x102   : > { %v1432_v5 = vld [vmem:[#allocation2 + $0x98] sm:$0xf]  ;;  %v2331_v11 = vshll.u32 %v7244_v13, 16  ;;  %v773_v16 = vsel %vm7086_vm2, %v5673_v45, %v772_v46  ;;  %v1655_v18 = vrot.slane %v1654_v48, 4  ;;  %v784_v45 = vshrl.u32 %v561_v22, 16 }
 0x103   : > { %v7217_v8 = vpop.f32.mrf.mxu2  ;;  %v7219_v9 = vpop.f32.mrf.mxu1  ;;  %v5849_v13 = vrot.slane %v2314_v61, 11 }
 0x105   : > { %v7221_v20 = vpop.f32.mrf.mxu3 }
 0x106   : > { %8419 = vst [vmem:[#allocation21_spill] sm:$0xff] %v7221_v20  ;;  %1353 = vmatmul.bf16.gmra.mxu1 %v1241_v59  ;;  %v776_v59 = vshrl.u32 %v560_v40, 16 }
 0x108   : > { %2006 = vmatmul.bf16.gmra.mxu2 %v1894_v10  ;;  %v1871_v10 = vunpack.c.l.b16 %v1646_v49  ;;  %v778_v25 = vrot.slane %v776_v59, 7  ;;  %v1431_v49 = vld [vmem:[#allocation2 + $0x94] sm:$0xf]  ;;  %v1667_v59 = vshll.u32 %v1430_v29, 16  ;;  %v1685_v29 = vshrl.u32 %v1432_v5, 16 }
 0x109   : > { %v7225_v41 = vpop.f32.mrf.mxu0  ;;  %v1672_v14 = vshrl.u32 %v1431_v49, 16  ;;  %v1675_v17 = vshll.u32 %v1431_v49, 16 }
 0x10a   : > { %2656 = vmatmul.bf16.gmra.mxu3 %v2544_v21  ;;  %v2521_v21 = vunpack.c.l.b16 %v2312_v47  ;;  %v1895_v43 = vpack.c.b16 %v1871_v10, %v1870_v6  ;;  %v781_v58 = vor.u32 %v779_v26, %v778_v25  ;;  %v1664_v47 = vor.u32 %v1663_v31, %v7246_v30  ;;  %v6248_v31 = vld [vmem:[#allocation2 + $0x84] sm:$0xff] }
 0x10b   : > { %v7234_v0 = vpop.f32.mrf.mxu2  ;;  %v7236_v55 = vpop.f32.mrf.mxu1  ;;  %v2330_v10 = vrot.slane %v2328_v38, 7  ;;  %v1681_v26 = vshll.u32 %v1432_v5, 16  ;;  %v1674_v46 = vrot.slane %v1672_v14, 4  ;;  %v1677_v48 = vrot.slane %v1675_v17, 5 }
 0x10c   : > { %2938 = vmatmul.bf16.gmra.mxu0 %v6247_v33  ;;  %v2319_v33 = vshrl.u32 %v2114_v12, 16  ;;  %v2545_v50 = vpack.c.b16 %v2521_v21, %v2520_v23  ;;  %v789_v23 = vshrl.u32 %v562_v60, 16  ;;  %v798_v21 = vshrl.u32 %v563_v57, 16 }
 0x10d   : > { %v7242_v3 = vpop.f32.mrf.mxu3  ;;  %v782_v25 = vsel %vm7086_vm2, %v774_v53, %v781_v58  ;;  %v1669_v12 = vrot.slane %v1667_v59, 5  ;;  %v2333_v24 = vor.u32 %v2331_v11, %v2330_v10  ;;  %v801_v53 = vshll.u32 %v563_v57, 16  ;;  %v2118_v57 = vld [vmem:[#allocation2 + $0xa8] sm:$0xf] }
 0x10e   : > { %8420 = vst [vmem:[#allocation22_spill] sm:$0xff] %v7242_v3  ;;  %v2321_v1 = vrot.slane %v2319_v33, 7  ;;  %v1665_v33 = vrot.slane %v1664_v47, 4  ;;  %v791_v49 = vrot.slane %v789_v23, 7  ;;  %v800_v3 = vrot.slane %v798_v21, 7 }
 0x10f   : > { %v7269_v47 = vrot.slane %v1681_v26, 5  ;;  %v1687_v61 = vrot.slane %v1685_v29, 4  ;;  %v1660_v5 = vsel %vm7094_vm5, %v1655_v18, %v7246_v30  ;;  %v5674_v17 = vrot.slane %v784_v45, 11  ;;  %v2116_v30 = vld [vmem:[#allocation2 + $0xa0] sm:$0x8] }
 0x110   : > { %v2324_v37 = vor.u32 %v2322_v2, %v2321_v1  ;;  %v2326_v38 = vrot.slane %v2321_v1, 4  ;;  %v1219_v1 = vunpack.c.l.b16 %v773_v16  ;;  %v1220_v2 = vunpack.c.l.b16 %v782_v25 }
 0x111   : > { %v7248_v34 = vpop.f32.mrf.mxu0  ;;  %v1678_v16 = vor.u32 %v1677_v48, %v1674_v46  ;;  %v796_v23 = vrot.slane %v791_v49, 4  ;;  %v803_v21 = vor.u32 %v801_v53, %v800_v3  ;;  %v1688_v18 = vor.u32 %v1687_v61, %v7269_v47  ;;  %v565_v48 = vld [vmem:[#allocation2 + $0xa4] sm:$0xf] }
 0x112   : > { %v2325_v11 = vsel %vm7086_vm2, %v5849_v13, %v2324_v37  ;;  %v2334_v14 = vsel %vm7086_vm2, %v2326_v38, %v2333_v24  ;;  %v2350_v26 = vshrl.u32 %v2118_v57, 16  ;;  %v1872_v29 = vunpack.c.l.b16 %v1660_v5  ;;  %v1434_v24 = vld [vmem:[#allocation2 + $0xa4] sm:$0xf] }
 0x113   : > { %v7251_v4 = vpop.f32.mrf.mxu2  ;;  %v7253_v40 = vpop.f32.mrf.mxu1  ;;  %v1243_v13 = vpack.c.b16 %v1220_v2, %v1219_v1  ;;  %v1679_v37 = vrot.slane %v1678_v16, 4  ;;  %v2336_v38 = vshrl.u32 %v2116_v30, 16  ;;  %v804_v3 = vsel %vm7086_vm2, %v796_v23, %v803_v21  ;;  %v1435_v1 = vld [vmem:[#allocation2 + $0xa8] sm:$0xf] }
 0x114   : > { %v2352_v5 = vrot.slane %v2350_v26, 7  ;;  %v1696_v16 = vshrl.u32 %v1434_v24, 16  ;;  %v7297_v23 = vld [vmem:[#allocation2 + $0xa8] sm:$0xf]  ;;  %v811_v21 = vshrl.u32 %v565_v48, 16  ;;  %v1222_v30 = vunpack.c.l.b16 %v804_v3 }
 0x115   : > { %v7256_v6 = vpop.f32.mrf.mxu3 }
 0x116   : > { %8421 = vst [vmem:[#allocation23_spill] sm:$0xff] %v7256_v6  ;;  %1358 = vmatmul.bf16.gmra.mxu1 %v1242_v36  ;;  %v792_v6 = vshll.u32 %v562_v60, 16  ;;  %v2117_v60 = vld [vmem:[#allocation2 + $0xa4] sm:$0xf]  ;;  %v7304_v3 = vrot.slane %v811_v21, 7 }
 0x117   : > { %v2344_v46 = vshll.u32 %v2117_v60, 16 }
 0x118   : > { %2011 = vmatmul.bf16.gmra.mxu2 %v1895_v43  ;;  %v1433_v43 = vld [vmem:[#allocation2 + $0x9c] sm:$0x1]  ;;  %v794_v22 = vor.u32 %v792_v6, %v791_v49 }
 0x119   : > { %v7263_v36 = vpop.f32.mrf.mxu0  ;;  %v1691_v25 = vshll.u32 %v1433_v43, 16  ;;  %v1689_v43 = vrot.slane %v1688_v18, 4  ;;  %v564_v18 = vld [vmem:[#allocation2 + $0xa0] sm:$0x8] }
 0x11a   : > { %2661 = vmatmul.bf16.gmra.mxu3 %v2545_v50  ;;  %v1670_v50 = vsel %vm7094_vm5, %v1665_v33, %v1669_v12  ;;  %v2341_v12 = vshrl.u32 %v2117_v60, 16  ;;  %v2522_v33 = vunpack.c.l.b16 %v2325_v11  ;;  %v795_v6 = vsel %vm7086_vm2, %v5674_v17, %v794_v22 }
 0x11b   : > { %v7265_v58 = vpop.f32.mrf.mxu2  ;;  %v7267_v59 = vpop.f32.mrf.mxu1  ;;  %v1693_v45 = vrot.slane %v1691_v25, 5  ;;  %v1221_v22 = vunpack.c.l.b16 %v795_v6  ;;  %v1684_v60 = vsel %vm7094_vm5, %v1679_v37, %v7269_v47  ;;  %v1699_v25 = vshll.u32 %v1434_v24, 16  ;;  %v7302_v6 = vld [vmem:[#allocation2 + $0xb4] sm:$0xf] }
 0x11c   : > { %2943 = vmatmul.bf16.gmra.mxu0 %v6248_v31  ;;  %v1873_v31 = vunpack.c.l.b16 %v1670_v50  ;;  %v2343_v61 = vrot.slane %v2341_v12, 7  ;;  %v2353_v50 = vshll.u32 %v2118_v57, 16  ;;  %v5850_v57 = vrot.slane %v2336_v38, 11 }
 0x11d   : > { %v7276_v10 = vpop.f32.mrf.mxu3  ;;  %v1705_v12 = vshll.u32 %v1435_v1, 16  ;;  %v820_v47 = vshrl.u32 %v7297_v23, 16  ;;  %v1698_v37 = vrot.slane %v1696_v16, 4  ;;  %v814_v38 = vshll.u32 %v565_v48, 16 }
 0x11e   : > { %8422 = vst [vmem:[#allocation24_spill] sm:$0xff] %v7276_v10  ;;  %v2523_v10 = vunpack.c.l.b16 %v2334_v14  ;;  %v1896_v11 = vpack.c.b16 %v1873_v31, %v1872_v29  ;;  %v2346_v26 = vor.u32 %v2344_v46, %v2343_v61  ;;  %v2348_v29 = vrot.slane %v2343_v61, 4 }
 0x11f   : > { %v2355_v31 = vor.u32 %v2353_v50, %v2352_v5  ;;  %v6299_v5 = vld [vmem:[#allocation8 + $0x190] sm:$0xff]  ;;  %v7314_v16 = vpack.c.b16 %v1222_v30, %v1221_v22  ;;  %v816_v35 = vor.u32 %v814_v38, %v7304_v3  ;;  %v2366_v38 = vshll.u32 %v7302_v6, 16 }
 0x120   : > { %v2546_v14 = vpack.c.b16 %v2523_v10, %v2522_v33  ;;  %v1694_v10 = vsel %vm7094_vm5, %v1689_v43, %v1693_v45  ;;  %v6249_v33 = vld [vmem:[#allocation2 + $0x94] sm:$0xff]  ;;  %v7308_v45 = vunpack.c.l.b16 %v1684_v60  ;;  %v7312_v43 = vrot.slane %v1705_v12, 5  ;;  %4238 = vmatpush.bf16.msra.mxu2 %v6299_v5 }
 0x121   : > { %v7283_v20 = vpop.f32.mrf.mxu0  ;;  %v7310_v46 = vunpack.c.l.b16 %v1694_v10  ;;  %v2347_v21 = vsel %vm7086_vm2, %v5850_v57, %v2346_v26  ;;  %v2356_v48 = vsel %vm7086_vm2, %v2348_v29, %v2355_v31  ;;  %v822_v12 = vrot.slane %v820_v47, 7 }
 0x122   : > { %v823_v57 = vshll.u32 %v7297_v23, 16  ;;  %v2524_v47 = vunpack.c.l.b16 %v2347_v21  ;;  %v6315_v21 = vld [vmem:[#allocation8 + $0x210] sm:$0xff] }
 0x123   : > { %v7289_v49 = vpop.f32.mrf.mxu2  ;;  %v1324_v53 = vpop.f32.mrf.mxu1  ;;  %v1897_v31 = vpack.c.b16 %v7310_v46, %v7308_v45  ;;  %5202 = vmatpush.bf16.msra.mxu0 %v6315_v21 }
 0x124   : > { %8423 = vst [vmem:[#allocation25_spill] sm:$0xff] %v7289_v49  ;;  %v1325_v2 = vadd.f32 %v1324_v53, %v7159_v44  ;;  %v1709_v44 = vshrl.u32 %v1435_v1, 16  ;;  %v1701_v53 = vrot.slane %v1699_v25, 5  ;;  %v7306_v1 = vld [vmem:[#allocation2 + $0xb8] sm:$0xf] }
 0x125   : > { %v7292_v17 = vpop.f32.mrf.mxu3  ;;  %v1436_v25 = vld [vmem:[#allocation2 + $0xac] sm:$0x1]  ;;  %v2372_v10 = vshrl.u32 %v7306_v1, 16  ;;  %v2375_v23 = vshll.u32 %v7306_v1, 16 }
 0x126   : > { %8424 = vst [vmem:[#allocation26_spill] sm:$0xff] %v7292_v17  ;;  %1363 = vmatmul.bf16.gmra.mxu1 %v1243_v13  ;;  %v806_v13 = vshrl.u32 %v564_v18, 16  ;;  %v1711_v61 = vrot.slane %v1709_v44, 4  ;;  %v2119_v44 = vld [vmem:[#allocation2 + $0xb0] sm:$0x8]  ;;  %v1702_v26 = vor.u32 %v1701_v53, %v1698_v37 }
 0x127   : > { %v6307_v17 = vld [vmem:[#allocation8 + $0x1d0] sm:$0xff]  ;;  %v2374_v62 = vrot.slane %v2372_v10, 7 }
 0x128   : > { %2016 = vmatmul.bf16.gmra.mxu2 %v1896_v11  ;;  %v5675_v30 = vrot.slane %v806_v13, 11  ;;  %4520 = vmatpush.bf16.msra.mxu3 %v6307_v17  ;;  %v1437_v13 = vld [vmem:[#allocation2 + $0xb4] sm:$0xf]  ;;  %v1438_v37 = vld [vmem:[#allocation2 + $0xb8] sm:$0xf]  ;;  %v818_v17 = vrot.slane %v7304_v3, 4 }
 0x129   : > { %v2909_v24 = vpop.f32.mrf.mxu0  ;;  %v1703_v5 = vrot.slane %v1702_v26, 4 }
 0x12a   : > { %2666 = vmatmul.bf16.gmra.mxu3 %v2546_v14  ;;  %v2363_v14 = vshrl.u32 %v7302_v6, 16  ;;  %v817_v46 = vsel %vm7086_vm2, %v5675_v30, %v816_v35  ;;  %v1720_v6 = vshrl.u32 %v1437_v13, 16  ;;  %v2377_v30 = vor.u32 %v2375_v23, %v2374_v62  ;;  %v1439_v62 = vld [vmem:[#allocation2 + $0xbc] sm:$0x1] }
 0x12b   : > { %v1977_v50 = vpop.f32.mrf.mxu2  ;;  %v1326_v11 = vpop.f32.mrf.mxu1 }
 0x12c   : > { %2948 = vmatmul.bf16.gmra.mxu0 %v6249_v33  ;;  %v2057_v60 = vadd.f32 %v1977_v50, %v1325_v2  ;;  %v1327_v18 = vadd.f32 %v1326_v11, %v7180_v32  ;;  %v1712_v2 = vor.u32 %v1711_v61, %v7312_v43  ;;  %v1715_v32 = vshll.u32 %v1436_v25, 16  ;;  %v6275_v33 = vld [vmem:[#allocation8 + $0x150] sm:$0xff] }
 0x12d   : > { %v2627_v22 = vpop.f32.mrf.mxu3  ;;  %v2525_v50 = vunpack.c.l.b16 %v2356_v48  ;;  %v2358_v11 = vshrl.u32 %v2119_v44, 16  ;;  %v2365_v51 = vrot.slane %v2363_v14, 7  ;;  %3587 = vmatpush.bf16.msra.mxu1 %v6275_v33  ;;  %v825_v61 = vor.u32 %v823_v57, %v822_v12  ;;  %v7335_v14 = vld [vmem:[#allocation2 + $0xb4] sm:$0xf] }
 0x12e   : > { %v2707_v29 = vadd.f32 %v2627_v22, %v2057_v60  ;;  %v1713_v48 = vrot.slane %v1712_v2, 4  ;;  %v1717_v25 = vrot.slane %v1715_v32, 5  ;;  %v1723_v60 = vshll.u32 %v1437_v13, 16  ;;  %v569_v22 = vld [vmem:[#allocation2 + $0xb8] sm:$0xf] }
 0x12f   : > { %v5851_v10 = vrot.slane %v2358_v11, 11  ;;  %v1733_v33 = vshrl.u32 %v1438_v37, 16  ;;  %v2368_v12 = vor.u32 %v2366_v38, %v2365_v51  ;;  %v2547_v26 = vpack.c.b16 %v2525_v50, %v2524_v47  ;;  %v567_v11 = vld [vmem:[#allocation2 + $0xb0] sm:$0x8]  ;;  %v6250_v47 = vld [vmem:[#allocation2 + $0xa4] sm:$0xff] }
 0x130   : > { %v7330_v53 = vadd.f32 %v2909_v24, %v2707_v29  ;;  %v2370_v24 = vrot.slane %v2365_v51, 4  ;;  %v1729_v29 = vshll.u32 %v1438_v37, 16  ;;  %v826_v2 = vsel %vm7086_vm2, %v818_v17, %v825_v61 }
 0x131   : > { %v2911_v45 = vpop.f32.mrf.mxu0  ;;  %v833_v32 = vshrl.u32 %v7335_v14, 16  ;;  %v842_v21 = vshrl.u32 %v569_v22, 16  ;;  %v1725_v49 = vrot.slane %v1723_v60, 5  ;;  %v1223_v37 = vunpack.c.l.b16 %v817_v46  ;;  %v2123_v46 = vld [vmem:[#allocation2 + $0xc4] sm:$0xf] }
 0x132   : > { %8425 = vst [vmem:[#allocation27_spill] sm:$0xff] %v7330_v53  ;;  %v1722_v53 = vrot.slane %v1720_v6, 4  ;;  %v1708_v51 = vsel %vm7094_vm5, %v1703_v5, %v7312_v43  ;;  %v1224_v50 = vunpack.c.l.b16 %v826_v2  ;;  %v1718_v38 = vsel %vm7094_vm5, %v1713_v48, %v1717_v25  ;;  %v2124_v6 = vld [vmem:[#allocation2 + $0xc8] sm:$0xf] }
 0x133   : > { %v1979_v1 = vpop.f32.mrf.mxu2  ;;  %v1329_v44 = vpop.f32.mrf.mxu1  ;;  %v2378_v23 = vsel %vm7086_vm2, %v2370_v24, %v2377_v30  ;;  %v828_v61 = vshrl.u32 %v567_v11, 16  ;;  %v835_v43 = vrot.slane %v833_v32, 7  ;;  %v836_v5 = vshll.u32 %v7335_v14, 16 }
 0x134   : > { %v2058_v35 = vadd.f32 %v1979_v1, %v1327_v18  ;;  %v1330_v3 = vadd.f32 %v1329_v44, %v7195_v15  ;;  %v7345_v15 = vrot.slane %v1729_v29, 5  ;;  %v1735_v18 = vrot.slane %v1733_v33, 4 }
 0x135   : > { %v2629_v57 = vpop.f32.mrf.mxu3  ;;  %v845_v1 = vshll.u32 %v569_v22, 16  ;;  %v1726_v44 = vor.u32 %v1725_v49, %v1722_v53  ;;  %v1739_v48 = vshll.u32 %v1439_v62, 16  ;;  %v1877_v33 = vunpack.c.l.b16 %v1718_v38 }
 0x136   : > { %v2708_v13 = vadd.f32 %v2629_v57, %v2058_v35  ;;  %1368 = vmatmul.bf16.gmra.mxu1 %v7314_v16  ;;  %v2369_v16 = vsel %vm7086_vm2, %v5851_v10, %v2368_v12  ;;  %v7356_v10 = vunpack.c.l.b16 %v1708_v51  ;;  %v1736_v24 = vor.u32 %v1735_v18, %v7345_v15  ;;  %v1440_v51 = vld [vmem:[#allocation2 + $0xc4] sm:$0xf] }
 0x137   : > { %v2385_v35 = vshrl.u32 %v2123_v46, 16  ;;  %v2526_v30 = vunpack.c.l.b16 %v2369_v16  ;;  %v2394_v57 = vshrl.u32 %v2124_v6, 16  ;;  %v2527_v2 = vunpack.c.l.b16 %v2378_v23 }
 0x138   : > { %2021 = vmatmul.bf16.gmra.mxu2 %v1897_v31  ;;  %v7354_v60 = vadd.f32 %v2911_v45, %v2708_v13  ;;  %v844_v31 = vrot.slane %v842_v21, 7  ;;  %v2122_v45 = vld [vmem:[#allocation2 + $0xc0] sm:$0x8]  ;;  %v5676_v22 = vrot.slane %v828_v61, 11  ;;  %v838_v49 = vor.u32 %v836_v5, %v835_v43 }
 0x139   : > { %v2914_v17 = vpop.f32.mrf.mxu0  ;;  %v840_v53 = vrot.slane %v835_v43, 4  ;;  %v1727_v11 = vrot.slane %v1726_v44, 4  ;;  %v1741_v21 = vrot.slane %v1739_v48, 5  ;;  %v1737_v62 = vrot.slane %v1736_v24, 4  ;;  %v572_v43 = vld [vmem:[#allocation2 + $0xc8] sm:$0xf] }
 0x13a   : > { %8426 = vst [vmem:[#allocation28_spill] sm:$0xff] %v7354_v60  ;;  %2671 = vmatmul.bf16.gmra.mxu3 %v2547_v26  ;;  %v847_v13 = vor.u32 %v845_v1, %v844_v31  ;;  %v2380_v18 = vshrl.u32 %v2122_v45, 16  ;;  %v2387_v38 = vrot.slane %v2385_v35, 7  ;;  %v2397_v16 = vshll.u32 %v2124_v6, 16  ;;  %v570_v35 = vld [vmem:[#allocation2 + $0xc0] sm:$0x8] }
 0x13b   : > { %v1982_v25 = vpop.f32.mrf.mxu2  ;;  %v1331_v29 = vpop.f32.mrf.mxu1  ;;  %v1898_v23 = vpack.c.b16 %v1877_v33, %v7356_v10  ;;  %v2548_v61 = vpack.c.b16 %v2527_v2, %v2526_v30  ;;  %v1744_v5 = vshrl.u32 %v1440_v51, 16  ;;  %v1747_v31 = vshll.u32 %v1440_v51, 16 }
 0x13c   : > { %2953 = vmatmul.bf16.gmra.mxu0 %v6250_v47  ;;  %v2059_v12 = vadd.f32 %v1982_v25, %v1330_v3  ;;  %v1332_v14 = vadd.f32 %v1331_v29, %v7214_v7  ;;  %v2388_v47 = vshll.u32 %v2123_v46, 16  ;;  %v571_v3 = vld [vmem:[#allocation2 + $0xc4] sm:$0xf]  ;;  %v1245_v25 = vpack.c.b16 %v1224_v50, %v1223_v37  ;;  %v1441_v46 = vld [vmem:[#allocation2 + $0xc8] sm:$0xf] }
 0x13d   : > { %v2632_v26 = vpop.f32.mrf.mxu3  ;;  %v2396_v7 = vrot.slane %v2394_v57, 7  ;;  %v839_v1 = vsel %vm7086_vm2, %v5676_v22, %v838_v49  ;;  %v848_v44 = vsel %vm7086_vm2, %v840_v53, %v847_v13  ;;  %v1732_v37 = vsel %vm7094_vm5, %v1727_v11, %v7345_v15 }
 0x13e   : > { %v2709_v32 = vadd.f32 %v2632_v26, %v2059_v12  ;;  %v855_v50 = vshrl.u32 %v571_v3, 16  ;;  %v1742_v48 = vsel %vm7094_vm5, %v1737_v62, %v1741_v21  ;;  %v5852_v10 = vrot.slane %v2380_v18, 11  ;;  %v6251_v62 = vld [vmem:[#allocation2 + $0xb4] sm:$0xff] }
 0x13f   : > { %v2390_v33 = vor.u32 %v2388_v47, %v2387_v38  ;;  %v2392_v24 = vrot.slane %v2387_v38, 4  ;;  %v2399_v45 = vor.u32 %v2397_v16, %v2396_v7  ;;  %v864_v57 = vshrl.u32 %v572_v43, 16 }
 0x140   : > { %v7360_v29 = vadd.f32 %v2914_v17, %v2709_v32  ;;  %v1746_v2 = vrot.slane %v1744_v5, 4  ;;  %v1749_v22 = vrot.slane %v1747_v31, 5  ;;  %v1753_v15 = vshll.u32 %v1441_v46, 16 }
 0x141   : > { %v2916_v60 = vpop.f32.mrf.mxu0  ;;  %v1757_v49 = vshrl.u32 %v1441_v46, 16  ;;  %v850_v32 = vshrl.u32 %v570_v35, 16  ;;  %v857_v13 = vrot.slane %v855_v50, 7  ;;  %v858_v11 = vshll.u32 %v571_v3, 16 }
 0x142   : > { %v1225_v21 = vunpack.c.l.b16 %v839_v1  ;;  %v1226_v51 = vunpack.c.l.b16 %v848_v44  ;;  %v866_v18 = vrot.slane %v864_v57, 7  ;;  %v867_v38 = vshll.u32 %v572_v43, 16  ;;  %v6298_v44 = vld [vmem:[#allocation8 + $0x188] sm:$0xff] }
 0x143   : > { %v1984_v17 = vpop.f32.mrf.mxu2  ;;  %v1334_v6 = vpop.f32.mrf.mxu1  ;;  %v7377_v7 = vunpack.c.l.b16 %v1732_v37  ;;  %v7379_v16 = vunpack.c.l.b16 %v1742_v48  ;;  %v5677_v3 = vrot.slane %v850_v32, 11  ;;  %v7383_v31 = vrot.slane %v1753_v15, 5  ;;  %v1442_v43 = vld [vmem:[#allocation2 + $0xcc] sm:$0x1]  ;;  %4239 = vmatpush.bf16.msra.mxu2 %v6298_v44  ;;  %v7399_v32 = vld [vmem:[#allocation2 + $0xd4] sm:$0xf] }
 0x144   : > { %v2060_v12 = vadd.f32 %v1984_v17, %v1332_v14  ;;  %v1335_v30 = vadd.f32 %v1334_v6, %v7225_v41  ;;  %v2391_v14 = vsel %vm7086_vm2, %v5852_v10, %v2390_v33  ;;  %v2400_v41 = vsel %vm7086_vm2, %v2392_v24, %v2399_v45  ;;  %v1443_v24 = vld [vmem:[#allocation2 + $0xd4] sm:$0xf] }
 0x145   : > { %v2634_v26 = vpop.f32.mrf.mxu3  ;;  %v1759_v1 = vrot.slane %v1757_v49, 4  ;;  %v2528_v17 = vunpack.c.l.b16 %v2391_v14  ;;  %v2529_v6 = vunpack.c.l.b16 %v2400_v41  ;;  %v862_v10 = vrot.slane %v857_v13, 4  ;;  %v7397_v49 = vld [vmem:[#allocation2 + $0xd8] sm:$0xf] }
 0x146   : > { %v2710_v53 = vadd.f32 %v2634_v26, %v2060_v12  ;;  %1373 = vmatmul.bf16.gmra.mxu1 %v1245_v25  ;;  %v1750_v25 = vor.u32 %v1749_v22, %v1746_v2  ;;  %v869_v33 = vor.u32 %v867_v38, %v866_v18  ;;  %v1246_v12 = vpack.c.b16 %v1226_v51, %v1225_v21  ;;  %v7392_v26 = vld [vmem:[#allocation2 + $0xd4] sm:$0xf]  ;;  %v1444_v2 = vld [vmem:[#allocation2 + $0xd8] sm:$0xf] }
 0x147   : > { %v1899_v45 = vpack.c.b16 %v7379_v16, %v7377_v7  ;;  %v1760_v22 = vor.u32 %v1759_v1, %v7383_v31  ;;  %v1763_v15 = vshll.u32 %v1442_v43, 16  ;;  %v7402_v21 = vld [vmem:[#allocation2 + $0xd8] sm:$0xf]  ;;  %v1768_v51 = vshrl.u32 %v1443_v24, 16 }
 0x148   : > { %2026 = vmatmul.bf16.gmra.mxu2 %v1898_v23  ;;  %v7381_v5 = vadd.f32 %v2916_v60, %v2710_v53  ;;  %v860_v23 = vor.u32 %v858_v11, %v857_v13  ;;  %v7386_v60 = vld [vmem:[#allocation2 + $0xd0] sm:$0x8]  ;;  %v7390_v57 = vrot.slane %v1750_v25, 4  ;;  %v6274_v53 = vld [vmem:[#allocation8 + $0x148] sm:$0xff]  ;;  %v2549_v13 = vpack.c.b16 %v2529_v6, %v2528_v17 }
 0x149   : > { %v2919_v47 = vpop.f32.mrf.mxu0  ;;  %v2402_v11 = vshrl.u32 %v7386_v60, 16  ;;  %v7406_v14 = vsel %vm7086_vm2, %v862_v10, %v869_v33  ;;  %v2407_v41 = vshrl.u32 %v7392_v26, 16  ;;  %3588 = vmatpush.bf16.msra.mxu1 %v6274_v53  ;;  %v1777_v18 = vshll.u32 %v1444_v2, 16 }
 0x14a   : > { %8427 = vst [vmem:[#allocation29_spill] sm:$0xff] %v7381_v5  ;;  %2676 = vmatmul.bf16.gmra.mxu3 %v2548_v61  ;;  %v6306_v61 = vld [vmem:[#allocation8 + $0x1c8] sm:$0xff]  ;;  %v877_v1 = vshrl.u32 %v7399_v32, 16  ;;  %v7419_v44 = vrot.slane %v1760_v22, 4  ;;  %v886_v17 = vshrl.u32 %v7402_v21, 16  ;;  %v1770_v10 = vrot.slane %v1768_v51, 4 }
 0x14b   : > { %v1987_v50 = vpop.f32.mrf.mxu2  ;;  %v1336_v46 = vpop.f32.mrf.mxu1  ;;  %4521 = vmatpush.bf16.msra.mxu3 %v6306_v61  ;;  %v1781_v60 = vshrl.u32 %v1444_v2, 16  ;;  %v889_v2 = vshll.u32 %v7402_v21, 16 }
 0x14c   : > { %2958 = vmatmul.bf16.gmra.mxu0 %v6251_v62  ;;  %v2061_v37 = vadd.f32 %v1987_v50, %v1335_v30  ;;  %v1337_v48 = vadd.f32 %v1336_v46, %v7248_v34  ;;  %v861_v34 = vsel %vm7086_vm2, %v5677_v3, %v860_v23  ;;  %v1771_v62 = vshll.u32 %v1443_v24, 16  ;;  %v6314_v23 = vld [vmem:[#allocation8 + $0x208] sm:$0xff] }
 0x14d   : > { %v2637_v35 = vpop.f32.mrf.mxu3  ;;  %v7411_v16 = vunpack.c.l.b16 %v861_v34  ;;  %v2416_v3 = vshrl.u32 %v7397_v49, 16  ;;  %v1765_v50 = vrot.slane %v1763_v15, 5  ;;  %v2410_v46 = vshll.u32 %v7392_v26, 16  ;;  %5203 = vmatpush.bf16.msra.mxu0 %v6314_v23  ;;  %v6252_v23 = vld [vmem:[#allocation2 + $0xc4] sm:$0xff] }
 0x14e   : > { %v2711_v30 = vadd.f32 %v2637_v35, %v2061_v37  ;;  %v2419_v37 = vshll.u32 %v7397_v49, 16  ;;  %v1773_v33 = vrot.slane %v1771_v62, 5  ;;  %v2409_v35 = vrot.slane %v2407_v41, 7 }
 0x14f   : > { %v7425_v34 = vrot.slane %v1777_v18, 5  ;;  %v2418_v26 = vrot.slane %v2416_v3, 7  ;;  %v879_v53 = vrot.slane %v877_v1, 7  ;;  %v1783_v25 = vrot.slane %v1781_v60, 4 }
 0x150   : > { %v7409_v38 = vadd.f32 %v2919_v47, %v2711_v30  ;;  %v573_v47 = vld [vmem:[#allocation2 + $0xd0] sm:$0x8]  ;;  %v1445_v30 = vld [vmem:[#allocation2 + $0xdc] sm:$0x1]  ;;  %v880_v49 = vshll.u32 %v7399_v32, 16  ;;  %v888_v51 = vrot.slane %v886_v17, 7  ;;  %v1774_v41 = vor.u32 %v1773_v33, %v1770_v10 }
 0x151   : > { %v2921_v7 = vpop.f32.mrf.mxu0  ;;  %v872_v15 = vshrl.u32 %v573_v47, 16  ;;  %v5853_v62 = vrot.slane %v2402_v11, 11  ;;  %v1787_v18 = vshll.u32 %v1445_v30, 16  ;;  %v1766_v3 = vsel %vm7094_vm5, %v7419_v44, %v1765_v50  ;;  %v2128_v47 = vld [vmem:[#allocation2 + $0xe0] sm:$0x8] }
 0x152   : > { %8428 = vst [vmem:[#allocation30_spill] sm:$0xff] %v7409_v38  ;;  %v2129_v38 = vld [vmem:[#allocation2 + $0xe4] sm:$0xf]  ;;  %v2412_v1 = vor.u32 %v2410_v46, %v2409_v35  ;;  %v2414_v21 = vrot.slane %v2409_v35, 4  ;;  %v884_v10 = vrot.slane %v879_v53, 4  ;;  %v891_v33 = vor.u32 %v889_v2, %v888_v51 }
 0x153   : > { %v1989_v6 = vpop.f32.mrf.mxu2  ;;  %v1339_v43 = vpop.f32.mrf.mxu1  ;;  %v2429_v32 = vshrl.u32 %v2129_v38, 16  ;;  %v5678_v11 = vrot.slane %v872_v15, 11  ;;  %v1775_v44 = vrot.slane %v1774_v41, 4  ;;  %v1789_v50 = vrot.slane %v1787_v18, 5  ;;  %v1446_v41 = vld [vmem:[#allocation2 + $0xe4] sm:$0xf] }
 0x154   : > { %v2062_v61 = vadd.f32 %v1989_v6, %v1337_v48  ;;  %v1340_v24 = vadd.f32 %v1339_v43, %v7263_v36  ;;  %v2130_v48 = vld [vmem:[#allocation2 + $0xe8] sm:$0xf]  ;;  %v1228_v36 = vunpack.c.l.b16 %v7406_v14  ;;  %v2421_v6 = vor.u32 %v2419_v37, %v2418_v26 }
 0x155   : > { %v2639_v22 = vpop.f32.mrf.mxu3  ;;  %v2438_v43 = vshrl.u32 %v2130_v48, 16  ;;  %v2424_v46 = vshrl.u32 %v2128_v47, 16  ;;  %v2431_v37 = vrot.slane %v2429_v32, 7  ;;  %v892_v51 = vsel %vm7086_vm2, %v884_v10, %v891_v33 }
 0x156   : > { %v2712_v5 = vadd.f32 %v2639_v22, %v2062_v61  ;;  %1378 = vmatmul.bf16.gmra.mxu1 %v1246_v12  ;;  %v1784_v12 = vor.u32 %v1783_v25, %v7425_v34  ;;  %v2432_v25 = vshll.u32 %v2129_v38, 16  ;;  %v2413_v38 = vsel %vm7086_vm2, %v5853_v62, %v2412_v1 }
 0x157   : > { %v2440_v15 = vrot.slane %v2438_v43, 7  ;;  %v5854_v2 = vrot.slane %v2424_v46, 11  ;;  %v1247_v18 = vpack.c.b16 %v1228_v36, %v7411_v16  ;;  %v2530_v47 = vunpack.c.l.b16 %v2413_v38  ;;  %v7460_v43 = vld [vmem:[#allocation2 + $0xe4] sm:$0xf] }
 0x158   : > { %2031 = vmatmul.bf16.gmra.mxu2 %v1899_v45  ;;  %v7436_v14 = vadd.f32 %v2921_v7, %v2712_v5  ;;  %v882_v45 = vor.u32 %v880_v49, %v879_v53  ;;  %v1785_v35 = vrot.slane %v1784_v12, 4  ;;  %v8429_v5 = vsel %vm7094_vm5, %v7390_v57, %v7383_v31  ;;  %v1447_v12 = vld [vmem:[#allocation2 + $0xe8] sm:$0xf] }
 0x159   : > { %v7434_v17 = vpop.f32.mrf.mxu0  ;;  %v1881_v7 = vunpack.c.l.b16 %v1766_v3  ;;  %v2441_v53 = vshll.u32 %v2130_v48, 16  ;;  %v1780_v31 = vsel %vm7094_vm5, %v1775_v44, %v7425_v34  ;;  %v2434_v48 = vor.u32 %v2432_v25, %v2431_v37  ;;  %v7462_v34 = vld [vmem:[#allocation2 + $0xe8] sm:$0xf] }
 0x15a   : > { %2681 = vmatmul.bf16.gmra.mxu3 %v2549_v13  ;;  %v1880_v13 = vunpack.c.l.b16 %v8429_v5  ;;  %v1790_v57 = vsel %vm7094_vm5, %v1785_v35, %v1789_v50  ;;  %v2436_v3 = vrot.slane %v2431_v37, 4  ;;  %v7464_v10 = vunpack.c.l.b16 %v1780_v31  ;;  %v7475_v37 = vld [vmem:[%s6940_s20 + $0x78] sm:$0xff]   ;;  %s6712_s20 = scalar_lea.hbm %s8397_s4, 256 }
 0x15b   : > { %v1992_v60 = vpop.f32.mrf.mxu2  ;;  %v1341_v61 = vpop.f32.mrf.mxu1  ;;  %v2443_v1 = vor.u32 %v2441_v53, %v2440_v15  ;;  %v7466_v33 = vunpack.c.l.b16 %v1790_v57  ;;  %v1792_v16 = vshrl.u32 %v1446_v41, 16  ;;  %v1795_v36 = vshll.u32 %v1446_v41, 16  ;;  %v7481_v15 = vld [vmem:[#allocation2 + $0xf8] sm:$0xf]  ;;  %v1448_v57 = vld [vmem:[#allocation2 + $0xec] sm:$0x1]  ;;  %p6714_p7 = scmp.lt.s32.totalorder %s6712_s20, %s6708_s11 }
 0x15c   : > { %2963 = vmatmul.bf16.gmra.mxu0 %v6252_v23  ;;  %v2063_v30 = vadd.f32 %v1992_v60, %v1340_v24  ;;  %v1342_v22 = vadd.f32 %v1341_v61, %v7283_v20  ;;  %v2422_v20 = vsel %vm7086_vm2, %v2414_v21, %v2421_v6  ;;  %v883_v24 = vsel %vm7086_vm2, %v5678_v11, %v882_v45 }
 0x15d   : > { %v2642_v26 = vpop.f32.mrf.mxu3  ;;  %v1900_v23 = vpack.c.b16 %v1881_v7, %v1880_v13  ;;  %v2531_v32 = vunpack.c.l.b16 %v2422_v20  ;;  %v1229_v21 = vunpack.c.l.b16 %v883_v24  ;;  %v1230_v6 = vunpack.c.l.b16 %v892_v51  ;;  %v7479_v7 = vld [vmem:[#allocation2 + $0xf4] sm:$0xf]  ;;  %p6715_p5 = por %p6714_p7, %p6713_p0 }
 0x15e   : > { %v7444_v49 = vadd.f32 %v2642_v26, %v2063_v30  ;;  %v2435_v61 = vsel %vm7086_vm2, %v5854_v2, %v2434_v48  ;;  %v1801_v44 = vshll.u32 %v1447_v12, 16  ;;  %v1805_v50 = vshrl.u32 %v1447_v12, 16  ;;  %v6253_v51 = vld [vmem:[#allocation2 + $0xd4] sm:$0xff]  ;;  %v2131_v12 = vld [vmem:[#allocation2 + $0xf0] sm:$0x8] }
 0x15f   : > { %v2444_v25 = vsel %vm7086_vm2, %v2436_v3, %v2443_v1  ;;  %v899_v30 = vshrl.u32 %v7460_v43, 16  ;;  %v908_v35 = vshrl.u32 %v7462_v34, 16  ;;  %v2550_v5 = vpack.c.b16 %v2531_v32, %v2530_v47  ;;  %p6716_p8 = pnand %p6715_p5, %p6711_p13 }
 0x160   : > { %v7477_v13 = vpack.c.b16 %v1230_v6, %v1229_v21  ;;  %v1901_v53 = vpack.c.b16 %v7466_v33, %v7464_v10  ;;  %v2532_v38 = vunpack.c.l.b16 %v2435_v61  ;;  %v1794_v20 = vrot.slane %v1792_v16, 4 }
 0x161   : > { %v2926_v62 = vpop.f32.mrf.mxu0  ;;  %v1797_v24 = vrot.slane %v1795_v36, 5  ;;  %v2533_v31 = vunpack.c.l.b16 %v2444_v25  ;;  %v7485_v2 = vrot.slane %v1801_v44, 5  ;;  %v1807_v48 = vrot.slane %v1805_v50, 4 }
 0x162   : > { %v6384_v41 = vunpack.c.l.bf16 %v7475_v37  ;;  %v901_v1 = vrot.slane %v899_v30, 7  ;;  %v2451_v47 = vshrl.u32 %v7479_v7, 16  ;;  %v2460_v32 = vshrl.u32 %v7481_v15, 16 }
 0x163   : > { %v1994_v11 = vpop.f32.mrf.mxu2  ;;  %v1344_v45 = vpop.f32.mrf.mxu1  ;;  %v910_v6 = vrot.slane %v908_v35, 7  ;;  %v7496_v16 = vadd.f32 %v7434_v17, %v7444_v49  ;;  %v911_v61 = vshll.u32 %v7462_v34, 16  ;;  %v1798_v44 = vor.u32 %v1797_v24, %v1794_v20  ;;  %v6273_v24 = vld [vmem:[#allocation8 + $0x140] sm:$0xff] }
 0x164   : > { %v2064_v60 = vadd.f32 %v1994_v11, %v1342_v22  ;;  %v576_v22 = vld [vmem:[#allocation2 + $0xe0] sm:$0x8]  ;;  %v1345_v21 = vadd.f32 %v1344_v45, %v7154_v19  ;;  %v1811_v50 = vshll.u32 %v1448_v57, 16  ;;  %v1808_v19 = vor.u32 %v1807_v48, %v7485_v2  ;;  %3589 = vmatpush.bf16.msra.mxu1 %v6273_v24 }
 0x165   : > { %v2644_v46 = vpop.f32.mrf.mxu3  ;;  %v894_v3 = vshrl.u32 %v576_v22, 16  ;;  %v6297_v11 = vld [vmem:[#allocation8 + $0x180] sm:$0xff]  ;;  %v2446_v45 = vshrl.u32 %v2131_v12, 16  ;;  %v6385_v30 = vunpack.c.h.bf16 %v7475_v37  ;;  %v2453_v17 = vrot.slane %v2451_v47, 7  ;;  %v7507_v37 = vld [vmem:[#allocation2 + $0xf4] sm:$0xf] }
 0x166   : > { %v2714_v26 = vadd.f32 %v2644_v46, %v2064_v60  ;;  %1383 = vmatmul.bf16.gmra.mxu1 %v1247_v18  ;;  %4240 = vmatpush.bf16.msra.mxu2 %v6297_v11  ;;  %v2454_v49 = vshll.u32 %v7479_v7, 16  ;;  %v2463_v34 = vshll.u32 %v7481_v15, 16  ;;  %v7505_v20 = vpack.c.b16 %v2533_v31, %v2532_v38  ;;  %v7509_v7 = vld [vmem:[#allocation2 + $0xf8] sm:$0xf] }
 0x167   : > { %v906_v57 = vrot.slane %v901_v1, 4  ;;  %v913_v48 = vor.u32 %v911_v61, %v910_v6  ;;  %v1799_v12 = vrot.slane %v1798_v44, 4  ;;  %v1809_v47 = vrot.slane %v1808_v19, 4  ;;  %v1450_v15 = vld [vmem:[#allocation2 + $0xf8] sm:$0xf] }
 0x168   : > { %2036 = vmatmul.bf16.gmra.mxu2 %v1900_v23  ;;  %v902_v23 = vshll.u32 %v7460_v43, 16  ;;  %v7499_v46 = vadd.f32 %v2926_v62, %v2714_v26  ;;  %v6305_v43 = vld [vmem:[#allocation8 + $0x1c0] sm:$0xff]  ;;  %v5679_v62 = vrot.slane %v894_v3, 11  ;;  %v5855_v11 = vrot.slane %v2446_v45, 11 }
 0x169   : > { %v7488_v18 = vpop.f32.mrf.mxu0  ;;  %4522 = vmatpush.bf16.msra.mxu3 %v6305_v43  ;;  %v6313_v43 = vld [vmem:[#allocation8 + $0x200] sm:$0xff]  ;;  %v921_v44 = vshrl.u32 %v7507_v37, 16 }
 0x16a   : > { %2686 = vmatmul.bf16.gmra.mxu3 %v2550_v5  ;;  %v2462_v5 = vrot.slane %v2460_v32, 7  ;;  %v904_v26 = vor.u32 %v902_v23, %v901_v1  ;;  %v6600_v32 = vld [vmem:[#allocation6] ss:$0 sm:$0xff]  ;;  %v2456_v23 = vor.u32 %v2454_v49, %v2453_v17  ;;  %5204 = vmatpush.bf16.msra.mxu0 %v6313_v43 }
 0x16b   : > { %v1997_v36 = vpop.f32.mrf.mxu2  ;;  %v1346_v60 = vpop.f32.mrf.mxu1  ;;  %v387_v38 = vmul.f32 %v6600_v32, %v6384_v41  ;;  %v388_v31 = vmul.f32 %v6600_v32, %v6385_v30  ;;  %v7517_v41 = vsel %vm7086_vm2, %v906_v57, %v913_v48  ;;  %v1804_v30 = vsel %vm7094_vm5, %v1799_v12, %v7485_v2 }
 0x16c   : > { %2968 = vmatmul.bf16.gmra.mxu0 %v6253_v51  ;;  %v2065_v25 = vadd.f32 %v1997_v36, %v1345_v21  ;;  %v1449_v51 = vld [vmem:[#allocation2 + $0xf4] sm:$0xf]  ;;  %v1813_v21 = vrot.slane %v1811_v50, 5  ;;  %v2458_v36 = vrot.slane %v2453_v17, 4  ;;  %v1347_v6 = vadd.f32 %v1346_v60, %v7165_v63 }
 0x16d   : > { %v2647_v35 = vpop.f32.mrf.mxu3  ;;  %v1816_v1 = vshrl.u32 %v1449_v51, 16  ;;  %v905_v61 = vsel %vm7086_vm2, %v5679_v62, %v904_v26  ;;  %v1819_v50 = vshll.u32 %v1449_v51, 16  ;;  %v930_v63 = vshrl.u32 %v7509_v7, 16 }
 0x16e   : > { %v2715_v22 = vadd.f32 %v2647_v35, %v2065_v25  ;;  %v2465_v25 = vor.u32 %v2463_v34, %v2462_v5  ;;  %v579_v35 = vld [vmem:[#allocation2 + $0xf0] sm:$0x8]  ;;  %v1825_v60 = vshll.u32 %v1450_v15, 16  ;;  %v1814_v49 = vsel %vm7094_vm5, %v1809_v47, %v1813_v21  ;;  %v6601_v34 = vld [vmem:[%s8395_s2] ss:$0 sm:$0xff] }
 0x16f   : > { %v1829_v5 = vshrl.u32 %v1450_v15, 16  ;;  %v422_v62 = vadd.f32 %v6601_v34, %v387_v38  ;;  %v2457_v24 = vsel %vm7086_vm2, %v5855_v11, %v2456_v23  ;;  %v1818_v51 = vrot.slane %v1816_v1, 4  ;;  %v6254_v11 = vld [vmem:[#allocation2 + $0xe4] sm:$0xff] }
 0x170   : > { %v2466_v2 = vsel %vm7086_vm2, %v2458_v36, %v2465_v25  ;;  %v423_v57 = vadd.f32 %v6601_v34, %v388_v31  ;;  %v916_v12 = vshrl.u32 %v579_v35, 16  ;;  %v923_v21 = vrot.slane %v921_v44, 7 }
 0x171   : > { %v2931_v3 = vpop.f32.mrf.mxu0  ;;  %v1821_v47 = vrot.slane %v1819_v50, 5  ;;  %v924_v15 = vshll.u32 %v7507_v37, 16  ;;  %v932_v32 = vrot.slane %v930_v63, 7  ;;  %v933_v38 = vshll.u32 %v7509_v7, 16  ;;  %v1451_v7 = vld [vmem:[#allocation2 + $0xfc] sm:$0x1] }
 0x172   : > { %v7535_v43 = vrot.slane %v1825_v60, 5  ;;  %v1831_v23 = vrot.slane %v1829_v5, 4  ;;  %v499_v31 = vpack.c.bf16 %v422_v62, %v422_v62  ;;  %v500_v36 = vpack.c.bf16 %v423_v57, %v423_v57 }
 0x173   : > { %v1999_v19 = vpop.f32.mrf.mxu2  ;;  %v1349_v45 = vpop.f32.mrf.mxu1  ;;  %v1231_v1 = vunpack.c.l.b16 %v905_v61  ;;  %v1232_v37 = vunpack.c.l.b16 %v7517_v41  ;;  %v7550_v10 = vunpack.c.l.b16 %v1814_v49  ;;  %v2534_v33 = vunpack.c.l.b16 %v2457_v24 }
 0x174   : > { %v2066_v17 = vadd.f32 %v1999_v19, %v1347_v6  ;;  %v7544_v6 = vunpack.c.l.b16 %v1804_v30  ;;  %v1350_v50 = vadd.f32 %v1349_v45, %v7189_v52  ;;  %532 = vst [vmem:[#allocation2 + $0x104] sm:$0xf] %v499_v31  ;;  %v5680_v19 = vrot.slane %v916_v12, 11  ;;  %v3021_v45 = vld [vmem:[#allocation2 + $0x14] sm:$0xf] }
 0x175   : > { %v2649_v26 = vpop.f32.mrf.mxu3  ;;  %v926_v61 = vor.u32 %v924_v15, %v923_v21  ;;  %v928_v35 = vrot.slane %v923_v21, 4  ;;  %v1822_v41 = vor.u32 %v1821_v47, %v1818_v51  ;;  %533 = vst [vmem:[#allocation2 + $0x108] sm:$0xf] %v500_v36  ;;  %v1832_v63 = vor.u32 %v1831_v23, %v7535_v43  ;;  %v2134_v15 = vld [vmem:[#allocation2 + $0x100] sm:$0x8] }
 0x176   : > { %v2716_v48 = vadd.f32 %v2649_v26, %v2066_v17  ;;  %1388 = vmatmul.bf16.gmra.mxu1 %v7477_v13  ;;  %v7541_v13 = vadd.f32 %v7488_v18, %v2715_v22  ;;  %v1835_v52 = vshll.u32 %v1451_v7, 16  ;;  %v3070_v17 = vshrl.u32 %v3021_v45, 16 }
 0x177   : > { %v3073_v49 = vshll.u32 %v3021_v45, 16  ;;  %v1249_v26 = vpack.c.b16 %v1232_v37, %v1231_v1  ;;  %v1902_v24 = vpack.c.b16 %v7550_v10, %v7544_v6  ;;  %v927_v21 = vsel %vm7086_vm2, %v5680_v19, %v926_v61 }
 0x178   : > { %2041 = vmatmul.bf16.gmra.mxu2 %v1901_v53  ;;  %v7546_v44 = vadd.f32 %v2931_v3, %v2716_v48  ;;  %v2535_v53 = vunpack.c.l.b16 %v2466_v2  ;;  %v935_v3 = vor.u32 %v933_v38, %v932_v32  ;;  %v3072_v2 = vrot.slane %v3070_v17, 4  ;;  %v3023_v32 = vld [vmem:[#allocation2 + $0x1c] sm:$0x1] }
 0x179   : > { %v2934_v25 = vpop.f32.mrf.mxu0  ;;  %v3075_v51 = vrot.slane %v3073_v49, 5  ;;  %v1823_v47 = vrot.slane %v1822_v41, 4  ;;  %v1833_v36 = vrot.slane %v1832_v63, 4  ;;  %v1837_v1 = vrot.slane %v1835_v52, 5 }
 0x17a   : > { %2691 = vmatmul.bf16.gmra.mxu3 %v7505_v20  ;;  %v3022_v20 = vld [vmem:[#allocation2 + $0x18] sm:$0xf]  ;;  %v2552_v12 = vpack.c.b16 %v2535_v53, %v2534_v33  ;;  %v936_v31 = vsel %vm7086_vm2, %v928_v35, %v935_v3  ;;  %v3089_v33 = vshll.u32 %v3023_v32, 16  ;;  %v7567_v53 = vld [vmem:[#allocation2 + $0x24] sm:$0xf]  ;;  %v2468_v19 = vshrl.u32 %v2134_v15, 16 }
 0x17b   : > { %v2002_v18 = vpop.f32.mrf.mxu2  ;;  %v1351_v22 = vpop.f32.mrf.mxu1  ;;  %v3079_v5 = vshll.u32 %v3022_v20, 16  ;;  %v3083_v34 = vshrl.u32 %v3022_v20, 16  ;;  %v2135_v37 = vld [vmem:[#allocation2 + $0x104] sm:$0xf]  ;;  %v1828_v35 = vsel %vm7094_vm5, %v1823_v47, %v7535_v43  ;;  %v1234_v52 = vunpack.c.l.b16 %v936_v31  ;;  %v6255_v47 = vld [vmem:[#allocation2 + $0xf4] sm:$0xff] }
 0x17c   : > { %2973 = vmatmul.bf16.gmra.mxu0 %v6254_v11  ;;  %v2067_v30 = vadd.f32 %v2002_v18, %v1350_v50  ;;  %v1352_v11 = vadd.f32 %v1351_v22, %v7204_v28  ;;  %v2136_v6 = vld [vmem:[#allocation2 + $0x108] sm:$0xf]  ;;  %v2473_v7 = vshrl.u32 %v2135_v37, 16  ;;  %v3076_v50 = vor.u32 %v3075_v51, %v3072_v2  ;;  %v3704_v2 = vld [vmem:[#allocation2 + $0x20] sm:$0x8] }
 0x17d   : > { %v2652_v60 = vpop.f32.mrf.mxu3  ;;  %v7555_v57 = vrot.slane %v3079_v5, 5  ;;  %v3085_v48 = vrot.slane %v3083_v34, 4  ;;  %v2476_v28 = vshll.u32 %v2135_v37, 16  ;;  %v2482_v22 = vshrl.u32 %v2136_v6, 16  ;;  %v4637_v37 = vld [vmem:[#allocation2 + $0x28] sm:$0xf] }
 0x17e   : > { %v2717_v62 = vadd.f32 %v2652_v60, %v2067_v30  ;;  %v2485_v61 = vshll.u32 %v2136_v6, 16  ;;  %v1233_v30 = vunpack.c.l.b16 %v927_v21  ;;  %v2475_v3 = vrot.slane %v2473_v7, 7  ;;  %v7574_v60 = vld [vmem:[#allocation2 + $0x28] sm:$0xf] }
 0x17f   : > { %v3086_v10 = vor.u32 %v3085_v48, %v7555_v57  ;;  %v1838_v45 = vsel %vm7094_vm5, %v1833_v36, %v1837_v1  ;;  %v2484_v20 = vrot.slane %v2482_v22, 7  ;;  %v3758_v17 = vshrl.u32 %v7567_v53, 16 }
 0x180   : > { %v7559_v38 = vadd.f32 %v2934_v25, %v2717_v62  ;;  %v3077_v5 = vrot.slane %v3076_v50, 4  ;;  %v3091_v62 = vrot.slane %v3089_v33, 5  ;;  %v5856_v51 = vrot.slane %v2468_v19, 11 }
 0x181   : > { %v7562_v23 = vpop.f32.mrf.mxu0  ;;  %v3087_v34 = vrot.slane %v3086_v10, 4  ;;  %v2478_v48 = vor.u32 %v2476_v28, %v2475_v3  ;;  %v2480_v43 = vrot.slane %v2475_v3, 4  ;;  %v2487_v21 = vor.u32 %v2485_v61, %v2484_v20  ;;  %v3024_v61 = vld [vmem:[#allocation2 + $0x24] sm:$0xf] }
 0x182   : > { %v7577_v15 = vunpack.c.l.b16 %v1828_v35  ;;  %v7579_v32 = vunpack.c.l.b16 %v1838_v45  ;;  %v7583_v36 = vpack.c.b16 %v1234_v52, %v1233_v30  ;;  %v3767_v1 = vshrl.u32 %v7574_v60, 16 }
 0x183   : > { %v2004_v25 = vpop.f32.mrf.mxu2  ;;  %v1354_v18 = vpop.f32.mrf.mxu1  ;;  %v3092_v7 = vsel %vm7094_vm5, %v3087_v34, %v3091_v62  ;;  %v7592_v50 = vrot.slane %v3758_v17, 7  ;;  %v2488_v19 = vsel %vm7086_vm2, %v2480_v43, %v2487_v21  ;;  %v4698_v22 = vshrl.u32 %v4637_v37, 16  ;;  %v4638_v43 = vld [vmem:[#allocation2 + $0x2c] sm:$0x1] }
 0x184   : > { %v2068_v41 = vadd.f32 %v2004_v25, %v1352_v11  ;;  %v4636_v11 = vld [vmem:[#allocation2 + $0x24] sm:$0xf]  ;;  %v1355_v6 = vadd.f32 %v1354_v18, %v7219_v9  ;;  %v2479_v25 = vsel %vm7086_vm2, %v5856_v51, %v2478_v48  ;;  %v4694_v18 = vshll.u32 %v4637_v37, 16  ;;  %v3708_v48 = vld [vmem:[#allocation2 + $0x34] sm:$0xf] }
 0x185   : > { %v2654_v63 = vpop.f32.mrf.mxu3  ;;  %v4685_v28 = vshrl.u32 %v4636_v11, 16  ;;  %v4688_v9 = vshll.u32 %v4636_v11, 16  ;;  %v7602_v3 = vunpack.c.l.b16 %v3092_v7  ;;  %v3761_v52 = vshll.u32 %v7567_v53, 16 }
 0x186   : > { %v2718_v49 = vadd.f32 %v2654_v63, %v2068_v41  ;;  %1393 = vmatmul.bf16.gmra.mxu1 %v1249_v26  ;;  %v3753_v26 = vshrl.u32 %v3704_v2, 16  ;;  %v3025_v41 = vld [vmem:[#allocation2 + $0x28] sm:$0xf]  ;;  %v2536_v20 = vunpack.c.l.b16 %v2479_v25  ;;  %v2537_v17 = vunpack.c.l.b16 %v2488_v19  ;;  %v3707_v19 = vld [vmem:[#allocation2 + $0x30] sm:$0x8] }
 0x187   : > { %v4687_v34 = vrot.slane %v4685_v28, 4  ;;  %v4690_v62 = vrot.slane %v4688_v9, 5  ;;  %v3097_v2 = vshll.u32 %v3024_v61, 16  ;;  %v3103_v51 = vshll.u32 %v3025_v41, 16 }
 0x188   : > { %2046 = vmatmul.bf16.gmra.mxu2 %v1902_v24  ;;  %v3082_v24 = vsel %vm7094_vm5, %v3077_v5, %v7555_v57  ;;  %v1903_v57 = vpack.c.b16 %v7579_v32, %v7577_v15  ;;  %v7604_v63 = vrot.slane %v3753_v26, 11  ;;  %v3094_v5 = vshrl.u32 %v3024_v61, 16  ;;  %v3026_v26 = vld [vmem:[#allocation2 + $0x2c] sm:$0x1]  ;;  %v3709_v61 = vld [vmem:[#allocation2 + $0x38] sm:$0xf] }
 0x189   : > { %v7581_v31 = vpop.f32.mrf.mxu0  ;;  %v7600_v35 = vunpack.c.l.b16 %v3082_v24  ;;  %v7609_v21 = vrot.slane %v4694_v18, 5  ;;  %v3107_v15 = vshrl.u32 %v3025_v41, 16  ;;  %v7612_v32 = vadd.f32 %v7562_v23, %v2718_v49 }
 0x18a   : > { %2696 = vmatmul.bf16.gmra.mxu3 %v2552_v12  ;;  %v3763_v53 = vor.u32 %v3761_v52, %v7592_v50  ;;  %v3096_v37 = vrot.slane %v3094_v5, 4  ;;  %v7617_v24 = vrot.slane %v3103_v51, 5  ;;  %v3780_v28 = vshrl.u32 %v3708_v48, 16 }
 0x18b   : > { %v2007_v10 = vpop.f32.mrf.mxu2  ;;  %v1356_v33 = vpop.f32.mrf.mxu1  ;;  %v3109_v25 = vrot.slane %v3107_v15, 4  ;;  %v3769_v23 = vrot.slane %v3767_v1, 7  ;;  %v3770_v49 = vshll.u32 %v7574_v60, 16  ;;  %v4691_v18 = vor.u32 %v4690_v62, %v4687_v34  ;;  %v4639_v62 = vld [vmem:[#allocation2 + $0x34] sm:$0xf] }
 0x18c   : > { %2978 = vmatmul.bf16.gmra.mxu0 %v6255_v47  ;;  %v2069_v12 = vadd.f32 %v2007_v10, %v1355_v6  ;;  %v4700_v47 = vrot.slane %v4698_v22, 4  ;;  %v3099_v6 = vrot.slane %v3097_v2, 5  ;;  %v1357_v7 = vadd.f32 %v1356_v33, %v7236_v55 }
 0x18d   : > { %v2657_v30 = vpop.f32.mrf.mxu3  ;;  %v3765_v10 = vrot.slane %v7592_v50, 4  ;;  %v4704_v22 = vshll.u32 %v4638_v43, 16  ;;  %v3113_v5 = vshll.u32 %v3026_v26, 16  ;;  %v3110_v50 = vor.u32 %v3109_v25, %v7617_v24 }
 0x18e   : > { %v7607_v45 = vadd.f32 %v2657_v30, %v2069_v12  ;;  %v2553_v30 = vpack.c.b16 %v2537_v17, %v2536_v20  ;;  %v4701_v52 = vor.u32 %v4700_v47, %v7609_v21  ;;  %v3100_v55 = vor.u32 %v3099_v6, %v3096_v37  ;;  %v6256_v37 = vld [vmem:[#allocation2 + $0x104] sm:$0xff] }
 0x18f   : > { %v3775_v33 = vshrl.u32 %v3707_v19, 16  ;;  %v3783_v51 = vshll.u32 %v3708_v48, 16  ;;  %v3782_v1 = vrot.slane %v3780_v28, 7  ;;  %v3789_v60 = vshrl.u32 %v3709_v61, 16 }
 0x190   : > { %v3792_v34 = vshll.u32 %v3709_v61, 16  ;;  %v3764_v20 = vsel %vm7086_vm2, %v7604_v63, %v3763_v53  ;;  %v3772_v17 = vor.u32 %v3770_v49, %v3769_v23  ;;  %v4692_v43 = vrot.slane %v4691_v18, 4 }
 0x191   : > { %v7614_v11 = vpop.f32.mrf.mxu0  ;;  %v4706_v47 = vrot.slane %v4704_v22, 5  ;;  %v4702_v48 = vrot.slane %v4701_v52, 4  ;;  %v3115_v6 = vrot.slane %v3113_v5, 5  ;;  %v3111_v19 = vrot.slane %v3110_v50, 4 }
 0x192   : > { %v6018_v28 = vrot.slane %v3775_v33, 11  ;;  %v4709_v61 = vshrl.u32 %v4639_v62, 16  ;;  %v3787_v63 = vrot.slane %v3782_v1, 4  ;;  %v4712_v23 = vshll.u32 %v4639_v62, 16 }
 0x193   : > { %v2009_v9 = vpop.f32.mrf.mxu2  ;;  %v1359_v12 = vpop.f32.mrf.mxu1  ;;  %v4697_v52 = vsel %vm7094_vm5, %v4692_v43, %v7609_v21  ;;  %v4707_v33 = vsel %vm7094_vm5, %v4702_v48, %v4706_v47 }
 0x194   : > { %v2070_v41 = vadd.f32 %v2009_v9, %v1357_v7  ;;  %v1360_v26 = vadd.f32 %v1359_v12, %v7253_v40  ;;  %v3791_v7 = vrot.slane %v3789_v60, 7  ;;  %v4640_v9 = vld [vmem:[#allocation2 + $0x38] sm:$0xf]  ;;  %v3502_v40 = vpack.c.b16 %v7602_v3, %v7600_v35 }
 0x195   : > { %v2659_v2 = vpop.f32.mrf.mxu3  ;;  %v4121_v12 = vunpack.c.l.b16 %v3764_v20  ;;  %v4722_v5 = vshrl.u32 %v4640_v9, 16  ;;  %v3116_v3 = vsel %vm7094_vm5, %v3111_v19, %v3115_v6  ;;  %v4714_v60 = vrot.slane %v4712_v23, 5 }
 0x196   : > { %v7624_v15 = vadd.f32 %v2659_v2, %v2070_v41  ;;  %1398 = vmatmul.bf16.gmra.mxu1 %v7583_v36  ;;  %v3101_v36 = vrot.slane %v3100_v55, 4  ;;  %v3785_v41 = vor.u32 %v3783_v51, %v3782_v1  ;;  %v3794_v53 = vor.u32 %v3792_v34, %v3791_v7  ;;  %v3027_v2 = vld [vmem:[#allocation2 + $0x34] sm:$0xf]  ;;  %v3028_v55 = vld [vmem:[#allocation2 + $0x38] sm:$0xf] }
 0x197   : > { %v4641_v34 = vld [vmem:[#allocation2 + $0x3c] sm:$0x1]  ;;  %v3118_v62 = vshrl.u32 %v3027_v2, 16  ;;  %v3121_v20 = vshll.u32 %v3027_v2, 16  ;;  %v3131_v43 = vshrl.u32 %v3028_v55, 16  ;;  %v5086_v6 = vunpack.c.l.b16 %v4707_v33 }
 0x198   : > { %2051 = vmatmul.bf16.gmra.mxu2 %v1903_v57  ;;  %v3773_v57 = vsel %vm7086_vm2, %v3765_v10, %v3772_v17  ;;  %v3106_v35 = vsel %vm7094_vm5, %v3101_v36, %v7617_v24  ;;  %v4711_v10 = vrot.slane %v4709_v61, 4  ;;  %v3786_v21 = vsel %vm7086_vm2, %v6018_v28, %v3785_v41  ;;  %v7661_v28 = vld [vmem:[#allocation2 + $0x44] sm:$0xf] }
 0x199   : > { %v7631_v25 = vpop.f32.mrf.mxu0  ;;  %v3795_v1 = vsel %vm7086_vm2, %v3787_v63, %v3794_v53  ;;  %v3127_v17 = vshll.u32 %v3028_v55, 16  ;;  %v4122_v47 = vunpack.c.l.b16 %v3773_v57  ;;  %v5085_v24 = vunpack.c.l.b16 %v4697_v52 }
 0x19a   : > { %2701 = vmatmul.bf16.gmra.mxu3 %v2553_v30  ;;  %v4718_v30 = vshll.u32 %v4640_v9, 16  ;;  %v7657_v7 = vunpack.c.l.b16 %v3106_v35  ;;  %v7659_v36 = vunpack.c.l.b16 %v3116_v3  ;;  %v4123_v19 = vunpack.c.l.b16 %v3786_v21  ;;  %v6281_v35 = vld [vmem:[#allocation2 + $0x24] sm:$0xff] }
 0x19b   : > { %v2012_v49 = vpop.f32.mrf.mxu2  ;;  %v1361_v18 = vpop.f32.mrf.mxu1  ;;  %v4124_v61 = vunpack.c.l.b16 %v3795_v1  ;;  %v4715_v41 = vor.u32 %v4714_v60, %v4711_v10  ;;  %v4728_v63 = vshll.u32 %v4641_v34, 16  ;;  %v3120_v57 = vrot.slane %v3118_v62, 4  ;;  %v4642_v3 = vld [vmem:[#allocation2 + $0x44] sm:$0xf]  ;;  %v3712_v34 = vld [vmem:[#allocation2 + $0x48] sm:$0xf] }
 0x19c   : > { %2983 = vmatmul.bf16.gmra.mxu0 %v6256_v37  ;;  %v2071_v22 = vadd.f32 %v2012_v49, %v1360_v26  ;;  %v7653_v26 = vrot.slane %v4718_v30, 5  ;;  %v4724_v37 = vrot.slane %v4722_v5, 4  ;;  %v1362_v9 = vadd.f32 %v1361_v18, %v7267_v59  ;;  %v3029_v49 = vld [vmem:[#allocation2 + $0x3c] sm:$0x1]  ;;  %v3710_v18 = vld [vmem:[#allocation2 + $0x40] sm:$0x8] }
 0x19d   : > { %v2662_v50 = vpop.f32.mrf.mxu3  ;;  %v7664_v52 = vrot.slane %v3127_v17, 5  ;;  %v3133_v30 = vrot.slane %v3131_v43, 4  ;;  %v4153_v2 = vpack.c.b16 %v4122_v47, %v4121_v12  ;;  %v5117_v59 = vpack.c.b16 %v5086_v6, %v5085_v24  ;;  %v4643_v12 = vld [vmem:[#allocation2 + $0x48] sm:$0xf] }
 0x19e   : > { %v7647_v51 = vadd.f32 %v2662_v50, %v2071_v22  ;;  %v3123_v22 = vrot.slane %v3121_v20, 5  ;;  %v4725_v55 = vor.u32 %v4724_v37, %v7653_v26  ;;  %v3802_v50 = vshrl.u32 %v7661_v28, 16 }
 0x19f   : > { %v3503_v21 = vpack.c.b16 %v7659_v36, %v7657_v7  ;;  %v7672_v1 = vrot.slane %v4728_v63, 5  ;;  %v3137_v60 = vshll.u32 %v3029_v49, 16  ;;  %v7674_v62 = vpack.c.b16 %v4124_v61, %v4123_v19 }
 0x1a0   : > { %v4716_v20 = vrot.slane %v4715_v41, 4  ;;  %v3124_v17 = vor.u32 %v3123_v22, %v3120_v57  ;;  %v3134_v43 = vor.u32 %v3133_v30, %v7664_v52  ;;  %v4726_v47 = vrot.slane %v4725_v55, 4 }
 0x1a1   : > { %v7655_v48 = vpop.f32.mrf.mxu0  ;;  %v3797_v24 = vshrl.u32 %v3710_v18, 16  ;;  %v7677_v37 = vrot.slane %v3802_v50, 7  ;;  %v4736_v63 = vshll.u32 %v4642_v3, 16  ;;  %v4746_v49 = vshrl.u32 %v4643_v12, 16 }
 0x1a2   : > { %v3139_v19 = vrot.slane %v3137_v60, 5  ;;  %v7684_v41 = vadd.f32 %v7581_v31, %v7607_v45  ;;  %v3125_v30 = vrot.slane %v3124_v17, 4  ;;  %v3805_v55 = vshll.u32 %v7661_v28, 16 }
 0x1a3   : > { %v2014_v53 = vpop.f32.mrf.mxu2  ;;  %v1364_v23 = vpop.f32.mrf.mxu1  ;;  %v4738_v50 = vrot.slane %v4736_v63, 5  ;;  %v3814_v60 = vshll.u32 %v3712_v34, 16 }
 0x1a4   : > { %v2072_v5 = vadd.f32 %v2014_v53, %v1362_v9  ;;  %v3811_v9 = vshrl.u32 %v3712_v34, 16  ;;  %v4742_v53 = vshll.u32 %v4643_v12, 16  ;;  %v4644_v12 = vld [vmem:[#allocation2 + $0x4c] sm:$0x1]  ;;  %v3130_v34 = vsel %vm7094_vm5, %v3125_v30, %v7664_v52 }
 0x1a5   : > { %v2664_v33 = vpop.f32.mrf.mxu3 }
 0x1a6   : > { %v7668_v10 = vadd.f32 %v2664_v33, %v2072_v5  ;;  %3590 = vmatmul.bf16.vlgmr.msra.gmra.mxu1 %v3502_v40  ;;  %v4733_v40 = vshrl.u32 %v4642_v3, 16  ;;  %v1365_v5 = vadd.f32 %v1364_v23, %v7161_v54  ;;  %v7687_v18 = vrot.slane %v4742_v53, 5  ;;  %v3030_v54 = vld [vmem:[#allocation2 + $0x44] sm:$0xf]  ;;  %v3031_v23 = vld [vmem:[#allocation2 + $0x48] sm:$0xf] }
 0x1a7   : > { %v4748_v3 = vrot.slane %v4746_v49, 4  ;;  %v3813_v45 = vrot.slane %v3811_v9, 7  ;;  %v3145_v28 = vshll.u32 %v3030_v54, 16  ;;  %v3155_v63 = vshrl.u32 %v3031_v23, 16 }
 0x1a8   : > { %4241 = vmatmul.bf16.vlgmr.msra.gmra.mxu2 %v4153_v2  ;;  %v4735_v61 = vrot.slane %v4733_v40, 4  ;;  %v3135_v2 = vrot.slane %v3134_v43, 4  ;;  %v3142_v43 = vshrl.u32 %v3030_v54, 16  ;;  %v4721_v53 = vsel %vm7094_vm5, %v4716_v20, %v7653_v26 }
 0x1a9   : > { %v7679_v6 = vpop.f32.mrf.mxu0  ;;  %v3807_v9 = vor.u32 %v3805_v55, %v7677_v37  ;;  %v3809_v26 = vrot.slane %v7677_v37, 4  ;;  %v3816_v20 = vor.u32 %v3814_v60, %v3813_v45  ;;  %v3157_v30 = vrot.slane %v3155_v63, 4 }
 0x1aa   : > { %4523 = vmatmul.bf16.vlgmr.msra.gmra.mxu3 %v6281_v35  ;;  %v7691_v35 = vadd.f32 %v7614_v11, %v7624_v15  ;;  %v4739_v17 = vor.u32 %v4738_v50, %v4735_v61  ;;  %v4731_v11 = vsel %vm7094_vm5, %v4726_v47, %v7672_v1  ;;  %v6019_v15 = vrot.slane %v3797_v24, 11  ;;  %v7711_v47 = vld [vmem:[#allocation2 + $0x54] sm:$0xf] }
 0x1ab   : > { %v2017_v57 = vpop.f32.mrf.mxu2  ;;  %v1366_v22 = vpop.f32.mrf.mxu1  ;;  %v3140_v49 = vsel %vm7094_vm5, %v3135_v2, %v3139_v19  ;;  %v4752_v61 = vshll.u32 %v4644_v12, 16  ;;  %v3144_v50 = vrot.slane %v3142_v43, 4  ;;  %v3147_v1 = vrot.slane %v3145_v28, 5  ;;  %v3713_v28 = vld [vmem:[#allocation2 + $0x50] sm:$0x8] }
 0x1ac   : > { %5205 = vmatmul.bf16.vlgmr.msra.gmra.mxu0 %v5117_v59  ;;  %v2073_v33 = vadd.f32 %v2017_v57, %v1365_v5  ;;  %v3151_v59 = vshll.u32 %v3031_v23, 16  ;;  %v4749_v5 = vor.u32 %v4748_v3, %v7687_v18  ;;  %v1367_v24 = vadd.f32 %v1366_v22, %v7184_v42 }
 0x1ad   : > { %v2667_v31 = vpop.f32.mrf.mxu3  ;;  %v4740_v55 = vrot.slane %v4739_v17, 4  ;;  %v5087_v3 = vunpack.c.l.b16 %v4721_v53  ;;  %v5088_v54 = vunpack.c.l.b16 %v4731_v11  ;;  %v7716_v23 = vunpack.c.l.b16 %v3130_v34  ;;  %v6282_v53 = vld [vmem:[#allocation2 + $0x34] sm:$0xff] }
 0x1ae   : > { %v7693_v40 = vadd.f32 %v2667_v31, %v2073_v33  ;;  %v3032_v33 = vld [vmem:[#allocation2 + $0x4c] sm:$0x1]  ;;  %v7714_v52 = vrot.slane %v3151_v59, 5  ;;  %v7718_v31 = vunpack.c.l.b16 %v3140_v49  ;;  %v3808_v45 = vsel %vm7086_vm2, %v6019_v15, %v3807_v9 }
 0x1af   : > { %v4750_v60 = vrot.slane %v4749_v5, 4  ;;  %v4754_v12 = vrot.slane %v4752_v61, 5  ;;  %v7724_v22 = vsel %vm7086_vm2, %v3809_v26, %v3816_v20  ;;  %v3148_v17 = vor.u32 %v3147_v1, %v3144_v50  ;;  %v3715_v5 = vld [vmem:[#allocation2 + $0x58] sm:$0xf] }
 0x1b0   : > { %v3161_v43 = vshll.u32 %v3032_v33, 16  ;;  %v3824_v59 = vshrl.u32 %v7711_v47, 16  ;;  %v4745_v11 = vsel %vm7094_vm5, %v4740_v55, %v7687_v18  ;;  %v3158_v15 = vor.u32 %v3157_v30, %v7714_v52  ;;  %v4645_v18 = vld [vmem:[#allocation2 + $0x54] sm:$0xf]  ;;  %v4646_v26 = vld [vmem:[#allocation2 + $0x58] sm:$0xf] }
 0x1b1   : > { %v7708_v57 = vpop.f32.mrf.mxu0  ;;  %v5118_v9 = vpack.c.b16 %v5088_v54, %v5087_v3  ;;  %v3504_v34 = vpack.c.b16 %v7718_v31, %v7716_v23  ;;  %v7738_v49 = vunpack.c.l.b16 %v3808_v45  ;;  %v4126_v61 = vunpack.c.l.b16 %v7724_v22 }
 0x1b2   : > { %v4755_v7 = vsel %vm7094_vm5, %v4750_v60, %v4754_v12  ;;  %v3819_v36 = vshrl.u32 %v3713_v28, 16  ;;  %v7747_v50 = vunpack.c.l.b16 %v4745_v11  ;;  %v3149_v1 = vrot.slane %v3148_v17, 4  ;;  %v3033_v17 = vld [vmem:[#allocation2 + $0x54] sm:$0xf] }
 0x1b3   : > { %v2019_v19 = vpop.f32.mrf.mxu2  ;;  %v1369_v2 = vpop.f32.mrf.mxu1  ;;  %v7749_v55 = vrot.slane %v3824_v59, 7  ;;  %v3159_v33 = vrot.slane %v3158_v15, 4  ;;  %v3833_v30 = vshrl.u32 %v3715_v5, 16  ;;  %v4757_v54 = vshrl.u32 %v4645_v18, 16 }
 0x1b4   : > { %v2074_v37 = vadd.f32 %v2019_v19, %v1367_v24  ;;  %v3163_v24 = vrot.slane %v3161_v43, 5  ;;  %v7754_v19 = vadd.f32 %v7631_v25, %v7647_v51  ;;  %v4766_v45 = vshll.u32 %v4646_v26, 16  ;;  %v3034_v43 = vld [vmem:[#allocation2 + $0x58] sm:$0xf] }
 0x1b5   : > { %v2669_v42 = vpop.f32.mrf.mxu3  ;;  %v4770_v60 = vshrl.u32 %v4646_v26, 16  ;;  %v6020_v22 = vrot.slane %v3819_v36, 11  ;;  %v3154_v25 = vsel %vm7094_vm5, %v3149_v1, %v7714_v52  ;;  %v3166_v28 = vshrl.u32 %v3033_v17, 16 }
 0x1b6   : > { %v7727_v63 = vadd.f32 %v2669_v42, %v2074_v37  ;;  %3595 = vmatmul.bf16.gmra.mxu1 %v3503_v21  ;;  %v3827_v21 = vshll.u32 %v7711_v47, 16  ;;  %v4760_v37 = vshll.u32 %v4645_v18, 16  ;;  %v7756_v42 = vunpack.c.l.b16 %v4755_v7  ;;  %v4647_v7 = vld [vmem:[#allocation2 + $0x5c] sm:$0x1] }
 0x1b7   : > { %v3169_v59 = vshll.u32 %v3033_v17, 16  ;;  %v3164_v11 = vsel %vm7094_vm5, %v3159_v33, %v3163_v24  ;;  %v3835_v15 = vrot.slane %v3833_v30, 7  ;;  %v7770_v36 = vrot.slane %v4766_v45, 5  ;;  %v7784_v45 = vld [vmem:[#allocation2 + $0x64] sm:$0xf] }
 0x1b8   : > { %4246 = vmatmul.bf16.gmra.mxu2 %v7674_v62  ;;  %v1370_v62 = vadd.f32 %v1369_v2, %v7202_v27  ;;  %v7760_v27 = vadd.f32 %v7655_v48, %v7668_v10  ;;  %v3829_v51 = vor.u32 %v3827_v21, %v7749_v55  ;;  %v4759_v48 = vrot.slane %v4757_v54, 4 }
 0x1b9   : > { %v7745_v20 = vpop.f32.mrf.mxu0  ;;  %v4762_v10 = vrot.slane %v4760_v37, 5  ;;  %v4772_v18 = vrot.slane %v4770_v60, 4  ;;  %v3831_v52 = vrot.slane %v7749_v55, 4  ;;  %v3175_v26 = vshll.u32 %v3034_v43, 16 }
 0x1ba   : > { %4528 = vmatmul.bf16.gmra.mxu3 %v6282_v53  ;;  %v3179_v21 = vshrl.u32 %v3034_v43, 16  ;;  %v7775_v1 = vadd.f32 %v7679_v6, %v7693_v40  ;;  %v3168_v24 = vrot.slane %v3166_v28, 4  ;;  %v3171_v33 = vrot.slane %v3169_v59, 5  ;;  %v4648_v43 = vld [vmem:[#allocation2 + $0x64] sm:$0xf] }
 0x1bb   : > { %v2022_v47 = vpop.f32.mrf.mxu2  ;;  %v1371_v3 = vpop.f32.mrf.mxu1  ;;  %v7782_v54 = vunpack.c.l.b16 %v3164_v11  ;;  %v4776_v55 = vshll.u32 %v4647_v7, 16  ;;  %v4763_v6 = vor.u32 %v4762_v10, %v4759_v48  ;;  %v4773_v40 = vor.u32 %v4772_v18, %v7770_v36  ;;  %v3716_v11 = vld [vmem:[#allocation2 + $0x60] sm:$0x8] }
 0x1bc   : > { %5210 = vmatmul.bf16.gmra.mxu0 %v5118_v9  ;;  %v2075_v12 = vadd.f32 %v2022_v47, %v1370_v62  ;;  %v3836_v9 = vshll.u32 %v3715_v5, 16  ;;  %v7777_v47 = vunpack.c.l.b16 %v3154_v25  ;;  %v3830_v5 = vsel %vm7086_vm2, %v6020_v22, %v3829_v51  ;;  %v3035_v25 = vld [vmem:[#allocation2 + $0x5c] sm:$0x1] }
 0x1bd   : > { %v2672_v2 = vpop.f32.mrf.mxu3  ;;  %v1372_v30 = vadd.f32 %v1371_v3, %v7217_v8  ;;  %v7788_v22 = vrot.slane %v3175_v26, 5  ;;  %v3181_v51 = vrot.slane %v3179_v21, 4  ;;  %v5119_v3 = vpack.c.b16 %v7756_v42, %v7747_v50  ;;  %v4649_v42 = vld [vmem:[#allocation2 + $0x68] sm:$0xf] }
 0x1be   : > { %v7766_v53 = vadd.f32 %v2672_v2, %v2075_v12  ;;  %v3838_v37 = vor.u32 %v3836_v9, %v3835_v15  ;;  %v4155_v2 = vpack.c.b16 %v4126_v61, %v7738_v49  ;;  %v7792_v28 = vunpack.c.l.b16 %v3830_v5  ;;  %v3718_v15 = vld [vmem:[#allocation2 + $0x68] sm:$0xf] }
 0x1bf   : > { %v3172_v59 = vor.u32 %v3171_v33, %v3168_v24  ;;  %v3846_v9 = vshrl.u32 %v7784_v45, 16  ;;  %v6283_v49 = vld [vmem:[#allocation2 + $0x44] sm:$0xff]  ;;  %v3505_v61 = vpack.c.b16 %v7782_v54, %v7777_v47  ;;  %v7802_v50 = vrot.slane %v4776_v55, 5 }
 0x1c0   : > { %v3839_v48 = vsel %vm7086_vm2, %v3831_v52, %v3838_v37  ;;  %v4764_v10 = vrot.slane %v4763_v6, 4  ;;  %v4774_v18 = vrot.slane %v4773_v40, 4  ;;  %v3185_v26 = vshll.u32 %v3035_v25, 16 }
 0x1c1   : > { %v2956_v62 = vpop.f32.mrf.mxu0  ;;  %v4781_v21 = vshrl.u32 %v4648_v43, 16  ;;  %v3182_v5 = vor.u32 %v3181_v51, %v7788_v22  ;;  %v3841_v24 = vshrl.u32 %v3716_v11, 16  ;;  %v3855_v23 = vshrl.u32 %v3718_v15, 16 }
 0x1c2   : > { %v4784_v31 = vshll.u32 %v4648_v43, 16  ;;  %v3173_v33 = vrot.slane %v3172_v59, 4  ;;  %v7808_v6 = vadd.f32 %v7708_v57, %v7727_v63  ;;  %v3187_v25 = vrot.slane %v3185_v26, 5 }
 0x1c3   : > { %v2024_v60 = vpop.f32.mrf.mxu2  ;;  %v1374_v12 = vpop.f32.mrf.mxu1  ;;  %v4783_v37 = vrot.slane %v4781_v21, 4  ;;  %v3849_v51 = vshll.u32 %v7784_v45, 16  ;;  %v7813_v43 = vadd.f32 %v7745_v20, %v7766_v53  ;;  %v3857_v59 = vrot.slane %v3855_v23, 7 }
 0x1c4   : > { %v2076_v17 = vadd.f32 %v2024_v60, %v1372_v30  ;;  %v3848_v30 = vrot.slane %v3846_v9, 7  ;;  %v4790_v60 = vshll.u32 %v4649_v42, 16  ;;  %v1375_v52 = vadd.f32 %v1374_v12, %v7234_v0  ;;  %v3036_v9 = vld [vmem:[#allocation2 + $0x64] sm:$0xf] }
 0x1c5   : > { %v2674_v8 = vpop.f32.mrf.mxu3  ;;  %v4786_v55 = vrot.slane %v4784_v31, 5  ;;  %v3183_v12 = vrot.slane %v3182_v5, 4  ;;  %v3858_v11 = vshll.u32 %v3718_v15, 16  ;;  %v4128_v57 = vunpack.c.l.b16 %v3839_v48  ;;  %v3037_v15 = vld [vmem:[#allocation2 + $0x68] sm:$0xf] }
 0x1c6   : > { %v2726_v7 = vadd.f32 %v2674_v8, %v2076_v17  ;;  %3600 = vmatmul.bf16.gmra.mxu1 %v3504_v34  ;;  %v4794_v17 = vshrl.u32 %v4649_v42, 16  ;;  %v4769_v63 = vsel %vm7094_vm5, %v4764_v10, %v7770_v36  ;;  %v4792_v42 = vrot.slane %v4790_v60, 5 }
 0x1c7   : > { %v4779_v20 = vsel %vm7094_vm5, %v4774_v18, %v7802_v50  ;;  %v3178_v53 = vsel %vm7094_vm5, %v3173_v33, %v7788_v22  ;;  %v3851_v48 = vor.u32 %v3849_v51, %v3848_v30  ;;  %v3190_v21 = vshrl.u32 %v3036_v9, 16 }
 0x1c8   : > { %4251 = vmatmul.bf16.gmra.mxu2 %v4155_v2  ;;  %v7815_v8 = vadd.f32 %v2956_v62, %v2726_v7  ;;  %v4796_v45 = vrot.slane %v4794_v17, 4  ;;  %v4650_v62 = vld [vmem:[#allocation2 + $0x6c] sm:$0x1]  ;;  %v6021_v7 = vrot.slane %v3841_v24, 11  ;;  %v3193_v5 = vshll.u32 %v3036_v9, 16 }
 0x1c9   : > { %v2959_v34 = vpop.f32.mrf.mxu0  ;;  %v3188_v36 = vsel %vm7094_vm5, %v3183_v12, %v3187_v25  ;;  %v3853_v10 = vrot.slane %v3848_v30, 4  ;;  %v3860_v23 = vor.u32 %v3858_v11, %v3857_v59  ;;  %v4800_v18 = vshll.u32 %v4650_v62, 16 }
 0x1ca   : > { %4533 = vmatmul.bf16.gmra.mxu3 %v6283_v49  ;;  %v4797_v50 = vor.u32 %v4796_v45, %v4792_v42  ;;  %v3199_v17 = vshll.u32 %v3037_v15, 16  ;;  %v4156_v33 = vpack.c.b16 %v4128_v57, %v7792_v28  ;;  %v5091_v24 = vunpack.c.l.b16 %v4769_v63  ;;  %v3721_v28 = vld [vmem:[#allocation2 + $0x78] sm:$0xf] }
 0x1cb   : > { %v2027_v40 = vpop.f32.mrf.mxu2  ;;  %v1376_v2 = vpop.f32.mrf.mxu1  ;;  %v5092_v51 = vunpack.c.l.b16 %v4779_v20  ;;  %v3192_v30 = vrot.slane %v3190_v21, 4  ;;  %v3195_v25 = vrot.slane %v3193_v5, 5  ;;  %v7834_v59 = vunpack.c.l.b16 %v3188_v36 }
 0x1cc   : > { %5215 = vmatmul.bf16.gmra.mxu0 %v5119_v3  ;;  %v2077_v0 = vadd.f32 %v2027_v40, %v1375_v52  ;;  %v4787_v3 = vor.u32 %v4786_v55, %v4783_v37  ;;  %v3203_v52 = vshrl.u32 %v3037_v15, 16  ;;  %v1377_v22 = vadd.f32 %v1376_v2, %v7251_v4  ;;  %v3719_v15 = vld [vmem:[#allocation2 + $0x70] sm:$0x8] }
 0x1cd   : > { %v2677_v49 = vpop.f32.mrf.mxu3  ;;  %v3852_v11 = vsel %vm7086_vm2, %v6021_v7, %v3851_v48  ;;  %v7840_v4 = vsel %vm7086_vm2, %v3853_v10, %v3860_v23  ;;  %v4798_v9 = vrot.slane %v4797_v50, 4  ;;  %v7842_v57 = vrot.slane %v3199_v17, 5  ;;  %v4651_v23 = vld [vmem:[#allocation2 + $0x74] sm:$0xf] }
 0x1ce   : > { %v2727_v26 = vadd.f32 %v2677_v49, %v2077_v0  ;;  %v4788_v37 = vrot.slane %v4787_v3, 4  ;;  %v7832_v0 = vunpack.c.l.b16 %v3178_v53  ;;  %v4802_v49 = vrot.slane %v4800_v18, 5  ;;  %v3038_v53 = vld [vmem:[#allocation2 + $0x6c] sm:$0x1] }
 0x1cf   : > { %v3205_v63 = vrot.slane %v3203_v52, 4  ;;  %v3196_v3 = vor.u32 %v3195_v25, %v3192_v30  ;;  %v3877_v7 = vshrl.u32 %v3721_v28, 16  ;;  %v5120_v48 = vpack.c.b16 %v5092_v51, %v5091_v24  ;;  %v4652_v52 = vld [vmem:[#allocation2 + $0x78] sm:$0xf] }
 0x1d0   : > { %v7828_v31 = vadd.f32 %v2959_v34, %v2727_v26  ;;  %v3720_v34 = vld [vmem:[#allocation2 + $0x74] sm:$0xf]  ;;  %v4793_v20 = vsel %vm7094_vm5, %v4788_v37, %v4792_v42  ;;  %v4129_v5 = vunpack.c.l.b16 %v3852_v11  ;;  %v4130_v36 = vunpack.c.l.b16 %v7840_v4 }
 0x1d1   : > { %v2961_v60 = vpop.f32.mrf.mxu0  ;;  %v6284_v26 = vld [vmem:[#allocation2 + $0x54] sm:$0xff]  ;;  %v3868_v62 = vshrl.u32 %v3720_v34, 16  ;;  %v4803_v47 = vsel %vm7094_vm5, %v4798_v9, %v4802_v49  ;;  %v7854_v54 = vunpack.c.l.b16 %v4793_v20  ;;  %v3209_v42 = vshll.u32 %v3038_v53, 16 }
 0x1d2   : > { %v3863_v18 = vshrl.u32 %v3719_v15, 16  ;;  %v3197_v37 = vrot.slane %v3196_v3, 4  ;;  %v3879_v51 = vrot.slane %v3877_v7, 7  ;;  %v3880_v30 = vshll.u32 %v3721_v28, 16  ;;  %v4653_v28 = vld [vmem:[#allocation2 + $0x7c] sm:$0x1] }
 0x1d3   : > { %v2029_v55 = vpop.f32.mrf.mxu2  ;;  %v1379_v40 = vpop.f32.mrf.mxu1  ;;  %v3870_v17 = vrot.slane %v3868_v62, 7  ;;  %v4805_v11 = vshrl.u32 %v4651_v23, 16  ;;  %v4808_v4 = vshll.u32 %v4651_v23, 16  ;;  %v4814_v9 = vshll.u32 %v4652_v52, 16 }
 0x1d4   : > { %v2078_v12 = vadd.f32 %v2029_v55, %v1377_v22  ;;  %v1380_v50 = vadd.f32 %v1379_v40, %v7265_v58  ;;  %v3871_v55 = vshll.u32 %v3720_v34, 16  ;;  %v3040_v58 = vld [vmem:[#allocation2 + $0x78] sm:$0xf]  ;;  %v4818_v49 = vshrl.u32 %v4652_v52, 16 }
 0x1d5   : > { %v2679_v2 = vpop.f32.mrf.mxu3  ;;  %v3211_v20 = vrot.slane %v3209_v42, 5  ;;  %v6022_v53 = vrot.slane %v3863_v18, 11  ;;  %v3875_v62 = vrot.slane %v3870_v17, 4  ;;  %v3223_v3 = vshll.u32 %v3040_v58, 16 }
 0x1d6   : > { %v2728_v45 = vadd.f32 %v2679_v2, %v2078_v12  ;;  %3605 = vmatmul.bf16.gmra.mxu1 %v3505_v61  ;;  %v3206_v61 = vor.u32 %v3205_v63, %v7842_v57  ;;  %v7860_v12 = vunpack.c.l.b16 %v4803_v47  ;;  %v3039_v2 = vld [vmem:[#allocation2 + $0x74] sm:$0xf]  ;;  %v3873_v34 = vor.u32 %v3871_v55, %v3870_v17  ;;  %v7870_v55 = vld [vmem:[#allocation2 + $0x84] sm:$0xf] }
 0x1d7   : > { %v3214_v63 = vshrl.u32 %v3039_v2, 16  ;;  %v3227_v15 = vshrl.u32 %v3040_v58, 16  ;;  %v3882_v7 = vor.u32 %v3880_v30, %v3879_v51  ;;  %v4810_v47 = vrot.slane %v4808_v4, 5 }
 0x1d8   : > { %4256 = vmatmul.bf16.gmra.mxu2 %v4156_v33  ;;  %v7858_v22 = vadd.f32 %v2961_v60, %v2728_v45  ;;  %v3217_v60 = vshll.u32 %v3039_v2, 16  ;;  %v4820_v52 = vrot.slane %v4818_v49, 4  ;;  %v4157_v42 = vpack.c.b16 %v4130_v36, %v4129_v5 }
 0x1d9   : > { %v2964_v10 = vpop.f32.mrf.mxu0  ;;  %v3216_v21 = vrot.slane %v3214_v63, 4  ;;  %v3202_v18 = vsel %vm7094_vm5, %v3197_v37, %v7842_v57  ;;  %v4824_v17 = vshll.u32 %v4653_v28, 16  ;;  %v7876_v4 = vrot.slane %v3223_v3, 5  ;;  %v3041_v37 = vld [vmem:[#allocation2 + $0x7c] sm:$0x1] }
 0x1da   : > { %4538 = vmatmul.bf16.gmra.mxu3 %v6284_v26  ;;  %v3207_v26 = vrot.slane %v3206_v61, 4  ;;  %v3219_v2 = vrot.slane %v3217_v60, 5  ;;  %v3229_v58 = vrot.slane %v3227_v15, 4  ;;  %v5121_v5 = vpack.c.b16 %v7860_v12, %v7854_v54  ;;  %v6285_v54 = vld [vmem:[#allocation2 + $0x64] sm:$0xff]  ;;  %v3722_v28 = vld [vmem:[#allocation2 + $0x80] sm:$0x8] }
 0x1db   : > { %v2032_v33 = vpop.f32.mrf.mxu2  ;;  %v1381_v24 = vpop.f32.mrf.mxu1  ;;  %v3883_v57 = vsel %vm7086_vm2, %v3875_v62, %v3882_v7  ;;  %v7882_v49 = vunpack.c.l.b16 %v3202_v18  ;;  %v4826_v62 = vrot.slane %v4824_v17, 5  ;;  %v3233_v7 = vshll.u32 %v3041_v37, 16 }
 0x1dc   : > { %5220 = vmatmul.bf16.gmra.mxu0 %v5120_v48  ;;  %v2079_v25 = vadd.f32 %v2032_v33, %v1380_v50  ;;  %v4807_v48 = vrot.slane %v4805_v11, 4  ;;  %v7864_v33 = vrot.slane %v4814_v9, 5  ;;  %v3874_v11 = vsel %vm7086_vm2, %v6022_v53, %v3873_v34 }
 0x1dd   : > { %v2682_v40 = vpop.f32.mrf.mxu3  ;;  %v3220_v60 = vor.u32 %v3219_v2, %v3216_v21  ;;  %v8432_v53 = vpack.c.b16 %v7834_v59, %v7832_v0  ;;  %v4131_v34 = vunpack.c.l.b16 %v3874_v11  ;;  %v4132_v3 = vunpack.c.l.b16 %v3883_v57 }
 0x1de   : > { %v2729_v45 = vadd.f32 %v2682_v40, %v2079_v25  ;;  %v8431_v25 = vld [vmem:[#allocation25_spill] sm:$0xff]  ;;  %v4811_v36 = vor.u32 %v4810_v47, %v4807_v48  ;;  %v4654_v40 = vld [vmem:[#allocation2 + $0x84] sm:$0xf]  ;;  %v4821_v63 = vor.u32 %v4820_v52, %v7864_v33  ;;  %v3230_v15 = vor.u32 %v3229_v58, %v7876_v4 }
 0x1df   : > { %v1382_v61 = vadd.f32 %v1381_v24, %v8431_v25  ;;  %v3724_v48 = vld [vmem:[#allocation2 + $0x88] sm:$0xf]  ;;  %v4829_v21 = vshrl.u32 %v4654_v40, 16  ;;  %v4832_v52 = vshll.u32 %v4654_v40, 16  ;;  %v3221_v59 = vrot.slane %v3220_v60, 4 }
 0x1e0   : > { %v7862_v23 = vadd.f32 %v2964_v10, %v2729_v45  ;;  %v3212_v10 = vsel %vm7094_vm5, %v3207_v26, %v3211_v20  ;;  %v3890_v45 = vshrl.u32 %v7870_v55, 16  ;;  %v4655_v26 = vld [vmem:[#allocation2 + $0x88] sm:$0xf]  ;;  %v4812_v47 = vrot.slane %v4811_v36, 4 }
 0x1e1   : > { %v2966_v50 = vpop.f32.mrf.mxu0  ;;  %v7889_v12 = vunpack.c.l.b16 %v3212_v10  ;;  %v4838_v2 = vshll.u32 %v4655_v26, 16  ;;  %v4842_v25 = vshrl.u32 %v4655_v26, 16  ;;  %v4822_v0 = vrot.slane %v4821_v63, 4  ;;  %v8433_v10 = vld [vmem:[#allocation18_spill] sm:$0xff] }
 0x1e2   : > { %8430 = vst [vmem:[#allocation31_spill] sm:$0xff] %v7862_v23  ;;  %v3885_v18 = vshrl.u32 %v3722_v28, 16  ;;  %v3893_v11 = vshll.u32 %v7870_v55, 16  ;;  %v3899_v58 = vshrl.u32 %v3724_v48, 16  ;;  %v3231_v36 = vrot.slane %v3230_v15, 4 }
 0x1e3   : > { %v2034_v51 = vpop.f32.mrf.mxu2  ;;  %v1384_v30 = vpop.f32.mrf.mxu1  ;;  %v3235_v37 = vrot.slane %v3233_v7, 5  ;;  %v4831_v40 = vrot.slane %v4829_v21, 4  ;;  %v3507_v60 = vpack.c.b16 %v7889_v12, %v7882_v49  ;;  %v7900_v26 = vrot.slane %v4838_v2, 5 }
 0x1e4   : > { %v2080_v24 = vadd.f32 %v2034_v51, %v1382_v61  ;;  %v7892_v51 = vrot.slane %v3890_v45, 7  ;;  %v1385_v17 = vadd.f32 %v1384_v30, %v8433_v10  ;;  %v4656_v45 = vld [vmem:[#allocation2 + $0x8c] sm:$0x1]  ;;  %v4844_v30 = vrot.slane %v4842_v25, 4 }
 0x1e5   : > { %v2684_v9 = vpop.f32.mrf.mxu3  ;;  %v4827_v55 = vsel %vm7094_vm5, %v4822_v0, %v4826_v62  ;;  %v3901_v12 = vrot.slane %v3899_v58, 7  ;;  %v3902_v15 = vshll.u32 %v3724_v48, 16  ;;  %v4158_v7 = vpack.c.b16 %v4132_v3, %v4131_v34  ;;  %v3043_v62 = vld [vmem:[#allocation2 + $0x88] sm:$0xf]  ;;  %v8436_v34 = vld [vmem:[#allocation19_spill] sm:$0xff] }
 0x1e6   : > { %v2730_v20 = vadd.f32 %v2684_v9, %v2080_v24  ;;  %3610 = vmatmul.bf16.gmra.mxu1 %v8432_v53  ;;  %v4834_v9 = vrot.slane %v4832_v52, 5  ;;  %v3895_v49 = vor.u32 %v3893_v11, %v7892_v51  ;;  %v3236_v21 = vsel %vm7094_vm5, %v3231_v36, %v3235_v37 }
 0x1e7   : > { %v3897_v48 = vrot.slane %v7892_v51, 4  ;;  %v3904_v58 = vor.u32 %v3902_v15, %v3901_v12  ;;  %v7924_v51 = vld [vmem:[#allocation2 + $0x94] sm:$0xf] }
 0x1e8   : > { %4261 = vmatmul.bf16.gmra.mxu2 %v4157_v42  ;;  %v7896_v24 = vadd.f32 %v2966_v50, %v2730_v20  ;;  %v4817_v50 = vsel %vm7094_vm5, %v4812_v47, %v7864_v33  ;;  %v6023_v20 = vrot.slane %v3885_v18, 11  ;;  %v4835_v52 = vor.u32 %v4834_v9, %v4831_v40 }
 0x1e9   : > { %v2969_v61 = vpop.f32.mrf.mxu0  ;;  %v4848_v33 = vshll.u32 %v4656_v45, 16  ;;  %v4845_v47 = vor.u32 %v4844_v30, %v7900_v26  ;;  %v5096_v18 = vunpack.c.l.b16 %v4827_v55  ;;  %v3247_v40 = vshll.u32 %v3043_v62, 16  ;;  %v6286_v55 = vld [vmem:[#allocation2 + $0x74] sm:$0xff] }
 0x1ea   : > { %4543 = vmatmul.bf16.gmra.mxu3 %v6285_v54  ;;  %8434 = vst [vmem:[#allocation25_spill] sm:$0xff] %v7896_v24  ;;  %v3042_v54 = vld [vmem:[#allocation2 + $0x84] sm:$0xf]  ;;  %v3896_v11 = vsel %vm7086_vm2, %v6023_v20, %v3895_v49  ;;  %v4836_v37 = vrot.slane %v4835_v52, 4  ;;  %v3251_v9 = vshrl.u32 %v3043_v62, 16  ;;  %v7932_v12 = vsel %vm7086_vm2, %v3897_v48, %v3904_v58 }
 0x1eb   : > { %v2037_v57 = vpop.f32.mrf.mxu2  ;;  %v1386_v42 = vpop.f32.mrf.mxu1  ;;  %v3238_v2 = vshrl.u32 %v3042_v54, 16  ;;  %v3241_v25 = vshll.u32 %v3042_v54, 16  ;;  %v4846_v45 = vrot.slane %v4845_v47, 4  ;;  %v7926_v54 = vunpack.c.l.b16 %v3896_v11  ;;  %v4657_v20 = vld [vmem:[#allocation2 + $0x94] sm:$0xf]  ;;  %v8437_v11 = vld [vmem:[#allocation20_spill] sm:$0xff] }
 0x1ec   : > { %5225 = vmatmul.bf16.gmra.mxu0 %v5121_v5  ;;  %v2081_v63 = vadd.f32 %v2037_v57, %v1385_v17  ;;  %v3226_v5 = vsel %vm7094_vm5, %v3221_v59, %v7876_v4  ;;  %v5095_v59 = vunpack.c.l.b16 %v4817_v50  ;;  %v1387_v3 = vadd.f32 %v1386_v42, %v8436_v34  ;;  %v3727_v52 = vld [vmem:[#allocation2 + $0x98] sm:$0xf]  ;;  %v3044_v47 = vld [vmem:[#allocation2 + $0x8c] sm:$0x1] }
 0x1ed   : > { %v2687_v53 = vpop.f32.mrf.mxu3  ;;  %v7916_v10 = vunpack.c.l.b16 %v3226_v5  ;;  %v7920_v17 = vunpack.c.l.b16 %v3236_v21  ;;  %v3240_v30 = vrot.slane %v3238_v2, 4  ;;  %v7934_v15 = vrot.slane %v3247_v40, 5 }
 0x1ee   : > { %v2731_v28 = vadd.f32 %v2687_v53, %v2081_v63  ;;  %v3243_v53 = vrot.slane %v3241_v25, 5  ;;  %v5122_v5 = vpack.c.b16 %v5096_v18, %v5095_v59  ;;  %v3253_v21 = vrot.slane %v3251_v9, 4  ;;  %v3725_v59 = vld [vmem:[#allocation2 + $0x90] sm:$0x8] }
 0x1ef   : > { %v3912_v2 = vshrl.u32 %v7924_v51, 16  ;;  %v4853_v18 = vshrl.u32 %v4657_v20, 16  ;;  %v4856_v48 = vshll.u32 %v4657_v20, 16 }
 0x1f0   : > { %v7914_v0 = vadd.f32 %v2969_v61, %v2731_v28  ;;  %v4850_v61 = vrot.slane %v4848_v33, 5  ;;  %v4658_v28 = vld [vmem:[#allocation2 + $0x98] sm:$0xf]  ;;  %v3244_v62 = vor.u32 %v3243_v53, %v3240_v30 }
 0x1f1   : > { %v2971_v4 = vpop.f32.mrf.mxu0  ;;  %v4862_v34 = vshll.u32 %v4658_v28, 16 }
 0x1f2   : > { %8435 = vst [vmem:[#allocation18_spill] sm:$0xff] %v7914_v0  ;;  %v4851_v33 = vsel %vm7094_vm5, %v4846_v45, %v4850_v61  ;;  %v3257_v45 = vshll.u32 %v3044_v47, 16  ;;  %v3245_v53 = vrot.slane %v3244_v62, 4 }
 0x1f3   : > { %v2039_v57 = vpop.f32.mrf.mxu2  ;;  %v1389_v36 = vpop.f32.mrf.mxu1  ;;  %v7948_v9 = vunpack.c.l.b16 %v4851_v33  ;;  %v3915_v33 = vshll.u32 %v7924_v51, 16 }
 0x1f4   : > { %v2082_v63 = vadd.f32 %v2039_v57, %v1387_v3  ;;  %v4866_v3 = vshrl.u32 %v4658_v28, 16  ;;  %v1390_v58 = vadd.f32 %v1389_v36, %v8437_v11  ;;  %v3921_v57 = vshrl.u32 %v3727_v52, 16  ;;  %v3046_v11 = vld [vmem:[#allocation2 + $0x98] sm:$0xf] }
 0x1f5   : > { %v2689_v50 = vpop.f32.mrf.mxu3  ;;  %v3914_v36 = vrot.slane %v3912_v2, 7  ;;  %v4855_v28 = vrot.slane %v4853_v18, 4  ;;  %v3250_v2 = vsel %vm7094_vm5, %v3245_v53, %v7934_v15  ;;  %v3275_v18 = vshrl.u32 %v3046_v11, 16 }
 0x1f6   : > { %v2732_v42 = vadd.f32 %v2689_v50, %v2082_v63  ;;  %3615 = vmatmul.bf16.gmra.mxu1 %v3507_v60  ;;  %v4841_v60 = vsel %vm7094_vm5, %v4836_v37, %v7900_v26  ;;  %v3254_v63 = vor.u32 %v3253_v21, %v7934_v15  ;;  %v3907_v50 = vshrl.u32 %v3725_v59, 16  ;;  %v4659_v21 = vld [vmem:[#allocation2 + $0x9c] sm:$0x1] }
 0x1f7   : > { %v7946_v40 = vunpack.c.l.b16 %v4841_v60  ;;  %v3923_v49 = vrot.slane %v3921_v57, 7  ;;  %v3271_v59 = vshll.u32 %v3046_v11, 16  ;;  %v8440_v57 = vld [vmem:[#allocation21_spill] sm:$0xff] }
 0x1f8   : > { %4266 = vmatmul.bf16.gmra.mxu2 %v4158_v7  ;;  %v4134_v7 = vunpack.c.l.b16 %v7932_v12  ;;  %v7944_v26 = vadd.f32 %v2971_v4, %v2732_v42  ;;  %v4858_v12 = vrot.slane %v4856_v48, 5  ;;  %v7951_v4 = vrot.slane %v4862_v34, 5 }
 0x1f9   : > { %v2974_v25 = vpop.f32.mrf.mxu0  ;;  %v4868_v42 = vrot.slane %v4866_v3, 4  ;;  %v3255_v47 = vrot.slane %v3254_v63, 4  ;;  %v7959_v3 = vrot.slane %v3907_v50, 11  ;;  %v7966_v50 = vld [vmem:[#allocation2 + $0xa4] sm:$0xf] }
 0x1fa   : > { %4548 = vmatmul.bf16.gmra.mxu3 %v6286_v55  ;;  %8438 = vst [vmem:[#allocation19_spill] sm:$0xff] %v7944_v26  ;;  %v3045_v55 = vld [vmem:[#allocation2 + $0x94] sm:$0xf]  ;;  %v3924_v26 = vshll.u32 %v3727_v52, 16  ;;  %v4872_v52 = vshll.u32 %v4659_v21, 16  ;;  %v4159_v15 = vpack.c.b16 %v4134_v7, %v7926_v54 }
 0x1fb   : > { %v2042_v37 = vpop.f32.mrf.mxu2  ;;  %v1391_v61 = vpop.f32.mrf.mxu1  ;;  %v3265_v62 = vshll.u32 %v3045_v55, 16  ;;  %v4869_v51 = vor.u32 %v4868_v42, %v7951_v4  ;;  %v3047_v42 = vld [vmem:[#allocation2 + $0x9c] sm:$0x1]  ;;  %v4661_v21 = vld [vmem:[#allocation2 + $0xa8] sm:$0xf] }
 0x1fc   : > { %5230 = vmatmul.bf16.gmra.mxu0 %v5122_v5  ;;  %v2083_v30 = vadd.f32 %v2042_v37, %v1390_v58  ;;  %v3259_v5 = vrot.slane %v3257_v45, 5  ;;  %v3262_v58 = vshrl.u32 %v3045_v55, 16  ;;  %v4859_v37 = vor.u32 %v4858_v12, %v4855_v28 }
 0x1fd   : > { %v2692_v20 = vpop.f32.mrf.mxu3  ;;  %v1392_v63 = vadd.f32 %v1391_v61, %v8440_v57  ;;  %v3917_v45 = vor.u32 %v3915_v33, %v3914_v36  ;;  %v3926_v55 = vor.u32 %v3924_v26, %v3923_v49  ;;  %v3267_v11 = vrot.slane %v3265_v62, 5  ;;  %v4660_v49 = vld [vmem:[#allocation2 + $0xa4] sm:$0xf] }
 0x1fe   : > { %v2733_v60 = vadd.f32 %v2692_v20, %v2083_v30  ;;  %v3919_v30 = vrot.slane %v3914_v36, 4  ;;  %v3264_v53 = vrot.slane %v3262_v58, 4  ;;  %v5123_v12 = vpack.c.b16 %v7948_v9, %v7946_v40  ;;  %v6287_v58 = vld [vmem:[#allocation2 + $0x84] sm:$0xff] }
 0x1ff   : > { %v7970_v61 = vrot.slane %v3271_v59, 5  ;;  %v3277_v36 = vrot.slane %v3275_v18, 4  ;;  %v4860_v54 = vrot.slane %v4859_v37, 4  ;;  %v4870_v7 = vrot.slane %v4869_v51, 4  ;;  %v3730_v59 = vld [vmem:[#allocation2 + $0xa8] sm:$0xf] }
 0x200   : > { %v7957_v48 = vadd.f32 %v2974_v25, %v2733_v60  ;;  %v3260_v25 = vsel %vm7094_vm5, %v3255_v47, %v3259_v5  ;;  %v7972_v60 = vunpack.c.l.b16 %v3250_v2  ;;  %v4874_v33 = vrot.slane %v4872_v52, 5  ;;  %v3728_v2 = vld [vmem:[#allocation2 + $0xa0] sm:$0x8] }
 0x201   : > { %v2976_v34 = vpop.f32.mrf.mxu0  ;;  %v8441_v5 = vpack.c.b16 %v7920_v17, %v7916_v10  ;;  %v7977_v62 = vunpack.c.l.b16 %v3260_v25  ;;  %v3918_v40 = vsel %vm7086_vm2, %v7959_v3, %v3917_v45  ;;  %v7984_v9 = vsel %vm7086_vm2, %v3919_v30, %v3926_v55  ;;  %v8442_v25 = vld [vmem:[#allocation22_spill] sm:$0xff] }
 0x202   : > { %8439 = vst [vmem:[#allocation20_spill] sm:$0xff] %v7957_v48  ;;  %v3268_v18 = vor.u32 %v3267_v11, %v3264_v53  ;;  %v3281_v37 = vshll.u32 %v3047_v42, 16  ;;  %v3934_v51 = vshrl.u32 %v7966_v50, 16  ;;  %v4877_v52 = vshrl.u32 %v4660_v49, 16 }
 0x203   : > { %v2044_v20 = vpop.f32.mrf.mxu2  ;;  %v1394_v0 = vpop.f32.mrf.mxu1  ;;  %v3278_v10 = vor.u32 %v3277_v36, %v7970_v61  ;;  %v4880_v17 = vshll.u32 %v4660_v49, 16  ;;  %v4886_v57 = vshll.u32 %v4661_v21, 16  ;;  %v4865_v3 = vsel %vm7094_vm5, %v4860_v54, %v7951_v4 }
 0x204   : > { %v2084_v28 = vadd.f32 %v2044_v20, %v1392_v63  ;;  %v4890_v63 = vshrl.u32 %v4661_v21, 16  ;;  %v4875_v45 = vsel %vm7094_vm5, %v4870_v7, %v4874_v33  ;;  %v3929_v30 = vshrl.u32 %v3728_v2, 16 }
 0x205   : > { %v2694_v26 = vpop.f32.mrf.mxu3  ;;  %v3943_v55 = vshrl.u32 %v3730_v59, 16  ;;  %v1395_v53 = vadd.f32 %v1394_v0, %v8442_v25  ;;  %v4879_v11 = vrot.slane %v4877_v52, 4  ;;  %v3269_v49 = vrot.slane %v3268_v18, 4  ;;  %v4662_v52 = vld [vmem:[#allocation2 + $0xac] sm:$0x1] }
 0x206   : > { %v2734_v47 = vadd.f32 %v2694_v26, %v2084_v28  ;;  %3620 = vmatmul.bf16.gmra.mxu1 %v8441_v5  ;;  %v3283_v26 = vrot.slane %v3281_v37, 5  ;;  %v3936_v21 = vrot.slane %v3934_v51, 7  ;;  %v3937_v5 = vshll.u32 %v7966_v50, 16 }
 0x207   : > { %v3279_v54 = vrot.slane %v3278_v10, 4  ;;  %v7997_v7 = vrot.slane %v4886_v57, 5  ;;  %v4892_v33 = vrot.slane %v4890_v63, 4  ;;  %v3509_v0 = vpack.c.b16 %v7977_v62, %v7972_v60  ;;  %v3049_v60 = vld [vmem:[#allocation2 + $0xa8] sm:$0xf] }
 0x208   : > { %4271 = vmatmul.bf16.gmra.mxu2 %v4159_v15  ;;  %v4882_v15 = vrot.slane %v4880_v17, 5  ;;  %v7994_v28 = vadd.f32 %v2976_v34, %v2734_v47  ;;  %v3945_v34 = vrot.slane %v3943_v55, 7  ;;  %v3946_v47 = vshll.u32 %v3730_v59, 16 }
 0x209   : > { %v2979_v20 = vpop.f32.mrf.mxu0  ;;  %v4136_v18 = vunpack.c.l.b16 %v7984_v9  ;;  %v8002_v37 = vunpack.c.l.b16 %v4865_v3  ;;  %v8004_v51 = vunpack.c.l.b16 %v4875_v45  ;;  %v3274_v10 = vsel %vm7094_vm5, %v3269_v49, %v7970_v61 }
 0x20a   : > { %4553 = vmatmul.bf16.gmra.mxu3 %v6287_v58  ;;  %8443 = vst [vmem:[#allocation21_spill] sm:$0xff] %v7994_v28  ;;  %v4135_v58 = vunpack.c.l.b16 %v3918_v40  ;;  %v4883_v50 = vor.u32 %v4882_v15, %v4879_v11  ;;  %v6025_v57 = vrot.slane %v3929_v30, 11  ;;  %v3939_v63 = vor.u32 %v3937_v5, %v3936_v21  ;;  %v8445_v11 = vld [vmem:[#allocation23_spill] sm:$0xff] }
 0x20b   : > { %v2047_v42 = vpop.f32.mrf.mxu2  ;;  %v1396_v36 = vpop.f32.mrf.mxu1  ;;  %v3284_v62 = vsel %vm7094_vm5, %v3279_v54, %v3283_v26  ;;  %v4893_v40 = vor.u32 %v4892_v33, %v7997_v7  ;;  %v4896_v59 = vshll.u32 %v4662_v52, 16  ;;  %v3941_v55 = vrot.slane %v3936_v21, 4 }
 0x20c   : > { %5235 = vmatmul.bf16.gmra.mxu0 %v5123_v12  ;;  %v2085_v4 = vadd.f32 %v2047_v42, %v1395_v53  ;;  %v3048_v12 = vld [vmem:[#allocation2 + $0xa4] sm:$0xf]  ;;  %v3948_v25 = vor.u32 %v3946_v47, %v3945_v34  ;;  %v1397_v15 = vadd.f32 %v1396_v36, %v8445_v11  ;;  %v4884_v42 = vrot.slane %v4883_v50, 4  ;;  %v8021_v34 = vld [vmem:[#allocation2 + $0xb4] sm:$0xf] }
 0x20d   : > { %v2697_v2 = vpop.f32.mrf.mxu3  ;;  %v3286_v45 = vshrl.u32 %v3048_v12, 16  ;;  %v3289_v53 = vshll.u32 %v3048_v12, 16  ;;  %v3295_v61 = vshll.u32 %v3049_v60, 16  ;;  %v3299_v30 = vshrl.u32 %v3049_v60, 16  ;;  %v8023_v47 = vld [vmem:[#allocation2 + $0xb8] sm:$0xf] }
 0x20e   : > { %v2735_v17 = vadd.f32 %v2697_v2, %v2085_v4  ;;  %v4160_v4 = vpack.c.b16 %v4136_v18, %v4135_v58  ;;  %v8015_v2 = vunpack.c.l.b16 %v3274_v10  ;;  %v8017_v26 = vunpack.c.l.b16 %v3284_v62  ;;  %v4663_v50 = vld [vmem:[#allocation2 + $0xb4] sm:$0xf]  ;;  %v4664_v62 = vld [vmem:[#allocation2 + $0xb8] sm:$0xf] }
 0x20f   : > { %v4894_v21 = vrot.slane %v4893_v40, 4  ;;  %v4898_v33 = vrot.slane %v4896_v59, 5  ;;  %v5124_v52 = vpack.c.b16 %v8004_v51, %v8002_v37  ;;  %v8029_v58 = vsel %vm7086_vm2, %v3941_v55, %v3948_v25  ;;  %v6288_v10 = vld [vmem:[#allocation2 + $0x94] sm:$0xff]  ;;  %v3050_v40 = vld [vmem:[#allocation2 + $0xac] sm:$0x1] }
 0x210   : > { %v8012_v9 = vadd.f32 %v2979_v20, %v2735_v17  ;;  %v3940_v20 = vsel %vm7086_vm2, %v6025_v57, %v3939_v63  ;;  %v3288_v17 = vrot.slane %v3286_v45, 4  ;;  %v3291_v18 = vrot.slane %v3289_v53, 5  ;;  %v3731_v25 = vld [vmem:[#allocation2 + $0xb0] sm:$0x8] }
 0x211   : > { %v2981_v3 = vpop.f32.mrf.mxu0  ;;  %v4889_v57 = vsel %vm7094_vm5, %v4884_v42, %v7997_v7  ;;  %v8034_v63 = vrot.slane %v3295_v61, 5  ;;  %v3301_v60 = vrot.slane %v3299_v30, 4  ;;  %v8038_v51 = vunpack.c.l.b16 %v3940_v20 }
 0x212   : > { %8444 = vst [vmem:[#allocation22_spill] sm:$0xff] %v8012_v9  ;;  %v3956_v59 = vshrl.u32 %v8021_v34, 16  ;;  %v3965_v55 = vshrl.u32 %v8023_v47, 16  ;;  %v4899_v7 = vsel %vm7094_vm5, %v4894_v21, %v4898_v33  ;;  %v4901_v45 = vshrl.u32 %v4663_v50, 16  ;;  %v4665_v9 = vld [vmem:[#allocation2 + $0xbc] sm:$0x1] }
 0x213   : > { %v2049_v49 = vpop.f32.mrf.mxu2  ;;  %v1399_v5 = vpop.f32.mrf.mxu1  ;;  %v4904_v53 = vshll.u32 %v4663_v50, 16  ;;  %v3292_v42 = vor.u32 %v3291_v18, %v3288_v17  ;;  %v4910_v61 = vshll.u32 %v4664_v62, 16  ;;  %v4914_v30 = vshrl.u32 %v4664_v62, 16  ;;  %v3051_v62 = vld [vmem:[#allocation2 + $0xb4] sm:$0xf] }
 0x214   : > { %v2086_v54 = vadd.f32 %v2049_v49, %v1397_v15  ;;  %v8045_v15 = vunpack.c.l.b16 %v4889_v57  ;;  %v8446_v49 = vld [vmem:[#allocation24_spill] sm:$0xff]  ;;  %v3302_v20 = vor.u32 %v3301_v60, %v8034_v63  ;;  %v3951_v21 = vshrl.u32 %v3731_v25, 16  ;;  %v3052_v60 = vld [vmem:[#allocation2 + $0xb8] sm:$0xf] }
 0x215   : > { %v2699_v36 = vpop.f32.mrf.mxu3  ;;  %v8051_v33 = vrot.slane %v3956_v59, 7  ;;  %v3959_v50 = vshll.u32 %v8021_v34, 16  ;;  %v3967_v57 = vrot.slane %v3965_v55, 7  ;;  %v8054_v18 = vunpack.c.l.b16 %v4899_v7 }
 0x216   : > { %v2736_v12 = vadd.f32 %v2699_v36, %v2086_v54  ;;  %3625 = vmatmul.bf16.gmra.mxu1 %v3509_v0  ;;  %v4138_v0 = vunpack.c.l.b16 %v8029_v58  ;;  %v1400_v54 = vadd.f32 %v1399_v5, %v8446_v49  ;;  %v4903_v5 = vrot.slane %v4901_v45, 4 }
 0x217   : > { %v3310_v49 = vshrl.u32 %v3051_v62, 16  ;;  %v3313_v25 = vshll.u32 %v3051_v62, 16  ;;  %v3319_v34 = vshll.u32 %v3052_v60, 16  ;;  %v3323_v55 = vshrl.u32 %v3052_v60, 16 }
 0x218   : > { %4276 = vmatmul.bf16.gmra.mxu2 %v4160_v4  ;;  %v3305_v4 = vshll.u32 %v3050_v40, 16  ;;  %v8049_v36 = vadd.f32 %v2981_v3, %v2736_v12  ;;  %v8056_v3 = vrot.slane %v4910_v61, 5  ;;  %v4916_v12 = vrot.slane %v4914_v30, 4 }
 0x219   : > { %v2984_v11 = vpop.f32.mrf.mxu0  ;;  %v8059_v28 = vrot.slane %v3292_v42, 4  ;;  %v4920_v45 = vshll.u32 %v4665_v9, 16  ;;  %v8068_v61 = vor.u32 %v3959_v50, %v8051_v33  ;;  %v3963_v30 = vrot.slane %v8051_v33, 4 }
 0x21a   : > { %4558 = vmatmul.bf16.gmra.mxu3 %v6288_v10  ;;  %8447 = vst [vmem:[#allocation23_spill] sm:$0xff] %v8049_v36  ;;  %v4906_v10 = vrot.slane %v4904_v53, 5  ;;  %v3968_v36 = vshll.u32 %v8023_v47, 16  ;;  %v8063_v7 = vrot.slane %v3305_v4, 5  ;;  %v8065_v53 = vrot.slane %v3951_v21, 11  ;;  %v8448_v4 = vld [vmem:[#allocation26_spill] sm:$0xff] }
 0x21b   : > { %v2052_v58 = vpop.f32.mrf.mxu2  ;;  %v1401_v37 = vpop.f32.mrf.mxu1  ;;  %v4917_v42 = vor.u32 %v4916_v12, %v8056_v3  ;;  %v3315_v62 = vrot.slane %v3313_v25, 5  ;;  %v3053_v21 = vld [vmem:[#allocation2 + $0xbc] sm:$0x1]  ;;  %v3325_v50 = vrot.slane %v3323_v55, 4  ;;  %v4161_v33 = vpack.c.b16 %v4138_v0, %v8038_v51  ;;  %v4666_v51 = vld [vmem:[#allocation2 + $0xc4] sm:$0xf] }
 0x21c   : > { %5240 = vmatmul.bf16.gmra.mxu0 %v5124_v52  ;;  %v2087_v17 = vadd.f32 %v2052_v58, %v1400_v54  ;;  %v8061_v52 = vrot.slane %v3302_v20, 4  ;;  %v8071_v54 = vld [vmem:[#allocation2 + $0xc4] sm:$0xf]  ;;  %v3312_v20 = vrot.slane %v3310_v49, 4  ;;  %v1402_v60 = vadd.f32 %v1401_v37, %v8448_v4 }
 0x21d   : > { %v2702_v40 = vpop.f32.mrf.mxu3  ;;  %v3970_v9 = vor.u32 %v3968_v36, %v3967_v57  ;;  %v4922_v23 = vrot.slane %v4920_v45, 5  ;;  %v3298_v37 = vsel %vm7094_vm5, %v8059_v28, %v8034_v63  ;;  %v3734_v57 = vld [vmem:[#allocation2 + $0xc0] sm:$0x8]  ;;  %v4918_v49 = vrot.slane %v4917_v42, 4  ;;  %v6289_v28 = vld [vmem:[#allocation2 + $0xa4] sm:$0xff] }
 0x21e   : > { %v2737_v59 = vadd.f32 %v2702_v40, %v2087_v17  ;;  %v4907_v17 = vor.u32 %v4906_v10, %v4903_v5  ;;  %v8077_v40 = vrot.slane %v3319_v34, 5  ;;  %v5125_v5 = vpack.c.b16 %v8054_v18, %v8045_v15  ;;  %v3736_v10 = vld [vmem:[#allocation2 + $0xc8] sm:$0xf] }
 0x21f   : > { %v3308_v36 = vsel %vm7094_vm5, %v8061_v52, %v8063_v7  ;;  %v3329_v25 = vshll.u32 %v3053_v21, 16  ;;  %v4667_v34 = vld [vmem:[#allocation2 + $0xc8] sm:$0xf]  ;;  %v8449_v18 = vpack.c.b16 %v8017_v26, %v8015_v2  ;;  %v3962_v63 = vsel %vm7086_vm2, %v8065_v53, %v8068_v61 }
 0x220   : > { %v8073_v58 = vadd.f32 %v2984_v11, %v2737_v59  ;;  %v3978_v11 = vshrl.u32 %v8071_v54, 16  ;;  %v4908_v12 = vrot.slane %v4907_v17, 4  ;;  %v3971_v55 = vsel %vm7086_vm2, %v3963_v30, %v3970_v9  ;;  %v8450_v9 = vld [vmem:[#allocation27_spill] sm:$0xff] }
 0x221   : > { %v2986_v47 = vpop.f32.mrf.mxu0  ;;  %v3326_v52 = vor.u32 %v3325_v50, %v8077_v40  ;;  %v3973_v7 = vshrl.u32 %v3734_v57, 16  ;;  %v3987_v17 = vshrl.u32 %v3736_v10, 16  ;;  %v4925_v42 = vshrl.u32 %v4666_v51, 16 }
 0x222   : > { %v3980_v45 = vrot.slane %v3978_v11, 7  ;;  %v4928_v2 = vshll.u32 %v4666_v51, 16  ;;  %v4934_v26 = vshll.u32 %v4667_v34, 16  ;;  %v4913_v53 = vsel %vm7094_vm5, %v4908_v12, %v8056_v3 }
 0x223   : > { %v2054_v48 = vpop.f32.mrf.mxu2  ;;  %v3591_v24 = vpop.f32.mrf.mxu1  ;;  %v4923_v61 = vsel %vm7094_vm5, %v4918_v49, %v4922_v23  ;;  %v4927_v50 = vrot.slane %v4925_v42, 4  ;;  %v3327_v57 = vrot.slane %v3326_v52, 4  ;;  %v6027_v51 = vrot.slane %v3973_v7, 11 }
 0x224   : > { %v2088_v59 = vadd.f32 %v2054_v48, %v1402_v60  ;;  %v3316_v48 = vor.u32 %v3315_v62, %v3312_v20  ;;  %v3981_v20 = vshll.u32 %v8071_v54, 16  ;;  %v4938_v62 = vshrl.u32 %v4667_v34, 16 }
 0x225   : > { %v2704_v0 = vpop.f32.mrf.mxu3  ;;  %v3331_v60 = vrot.slane %v3329_v25, 5  ;;  %v3671_v21 = vadd.f32 %v3591_v24, %v8450_v9  ;;  %v3990_v34 = vshll.u32 %v3736_v10, 16  ;;  %v3489_v24 = vunpack.c.l.b16 %v3308_v36 }
 0x226   : > { %v2738_v15 = vadd.f32 %v2704_v0, %v2088_v59  ;;  %3630 = vmatmul.bf16.gmra.mxu1 %v8449_v18  ;;  %v3317_v30 = vrot.slane %v3316_v48, 4  ;;  %v3989_v0 = vrot.slane %v3987_v17, 7  ;;  %v3983_v12 = vor.u32 %v3981_v20, %v3980_v45 }
 0x227   : > { %v8110_v18 = vrot.slane %v4934_v26, 5  ;;  %v4940_v23 = vrot.slane %v4938_v62, 4  ;;  %v3488_v48 = vunpack.c.l.b16 %v3298_v37  ;;  %v4139_v25 = vunpack.c.l.b16 %v3962_v63  ;;  %v8451_v26 = vld [vmem:[#allocation28_spill] sm:$0xff] }
 0x228   : > { %4281 = vmatmul.bf16.gmra.mxu2 %v4161_v33  ;;  %v4930_v33 = vrot.slane %v4928_v2, 5  ;;  %v8108_v11 = vadd.f32 %v2986_v47, %v2738_v15  ;;  %v4140_v42 = vunpack.c.l.b16 %v3971_v55  ;;  %v8112_v47 = vunpack.c.l.b16 %v4913_v53 }
 0x229   : > { %v5206_v4 = vpop.f32.mrf.mxu0  ;;  %v8114_v15 = vunpack.c.l.b16 %v4923_v61  ;;  %v3332_v10 = vsel %vm7094_vm5, %v3327_v57, %v3331_v60  ;;  %v3985_v7 = vrot.slane %v3980_v45, 4  ;;  %v3992_v17 = vor.u32 %v3990_v34, %v3989_v0  ;;  %v3055_v0 = vld [vmem:[#allocation2 + $0xc8] sm:$0xf] }
 0x22a   : > { %4563 = vmatmul.bf16.gmra.mxu3 %v6289_v28  ;;  %v4668_v28 = vld [vmem:[#allocation2 + $0xcc] sm:$0x1]  ;;  %v4931_v52 = vor.u32 %v4930_v33, %v4927_v50  ;;  %v3984_v37 = vsel %vm7086_vm2, %v6027_v51, %v3983_v12  ;;  %v4941_v36 = vor.u32 %v4940_v23, %v8110_v18  ;;  %v3511_v2 = vpack.c.b16 %v3489_v24, %v3488_v48  ;;  %v3054_v51 = vld [vmem:[#allocation2 + $0xc4] sm:$0xf]  ;;  %v6290_v24 = vld [vmem:[#allocation2 + $0xb4] sm:$0xff] }
 0x22b   : > { %v4242_v54 = vpop.f32.mrf.mxu2  ;;  %v3593_v59 = vpop.f32.mrf.mxu1  ;;  %v4944_v63 = vshll.u32 %v4668_v28, 16  ;;  %v8127_v61 = vunpack.c.l.b16 %v3332_v10  ;;  %v4162_v60 = vpack.c.b16 %v4140_v42, %v4139_v25  ;;  %v5126_v9 = vpack.c.b16 %v8114_v15, %v8112_v47  ;;  %v3738_v42 = vld [vmem:[#allocation2 + $0xd4] sm:$0xf]  ;;  %v8141_v10 = vld [vmem:[#allocation2 + $0xd8] sm:$0xf] }
 0x22c   : > { %5245 = vmatmul.bf16.gmra.mxu0 %v5125_v5  ;;  %v4322_v3 = vadd.f32 %v4242_v54, %v3671_v21  ;;  %v3322_v5 = vsel %vm7094_vm5, %v3317_v30, %v8077_v40  ;;  %v3672_v62 = vadd.f32 %v3593_v59, %v8451_v26  ;;  %v8129_v40 = vrot.slane %v4931_v52, 4 }
 0x22d   : > { %v4524_v49 = vpop.f32.mrf.mxu3  ;;  %v8125_v53 = vunpack.c.l.b16 %v3322_v5  ;;  %v3993_v21 = vsel %vm7086_vm2, %v3985_v7, %v3992_v17  ;;  %v4141_v50 = vunpack.c.l.b16 %v3984_v37  ;;  %v4942_v57 = vrot.slane %v4941_v36, 4  ;;  %v3056_v37 = vld [vmem:[#allocation2 + $0xcc] sm:$0x1]  ;;  %v3737_v36 = vld [vmem:[#allocation2 + $0xd0] sm:$0x8] }
 0x22e   : > { %v4604_v20 = vadd.f32 %v4524_v49, %v4322_v3  ;;  %v4946_v59 = vrot.slane %v4944_v63, 5  ;;  %v3334_v3 = vshrl.u32 %v3054_v51, 16  ;;  %v3337_v12 = vshll.u32 %v3054_v51, 16 }
 0x22f   : > { %v3343_v23 = vshll.u32 %v3055_v0, 16  ;;  %v3347_v49 = vshrl.u32 %v3055_v0, 16  ;;  %v3512_v25 = vpack.c.b16 %v8127_v61, %v8125_v53  ;;  %v4142_v28 = vunpack.c.l.b16 %v3993_v21  ;;  %v8453_v53 = vld [vmem:[#allocation30_spill] sm:$0xff] }
 0x230   : > { %v5286_v33 = vadd.f32 %v5206_v4, %v4604_v20  ;;  %v4937_v4 = vsel %vm7094_vm5, %v8129_v40, %v8110_v18  ;;  %v3336_v47 = vrot.slane %v3334_v3, 4  ;;  %v3339_v15 = vrot.slane %v3337_v12, 5 }
 0x231   : > { %v5208_v55 = vpop.f32.mrf.mxu0  ;;  %v3345_v52 = vrot.slane %v3343_v23, 5  ;;  %v3349_v5 = vrot.slane %v3347_v49, 4  ;;  %v4947_v20 = vsel %vm7094_vm5, %v4942_v57, %v4946_v59  ;;  %v4000_v63 = vshrl.u32 %v3738_v42, 16  ;;  %v4669_v49 = vld [vmem:[#allocation2 + $0xd4] sm:$0xf] }
 0x232   : > { %v5421_v7 = vmul.f32 %v5286_v33, %v5286_v33  ;;  %v3340_v26 = vor.u32 %v3339_v15, %v3336_v47  ;;  %v3995_v40 = vshrl.u32 %v3737_v36, 16  ;;  %v4009_v59 = vshrl.u32 %v8141_v10, 16 }
 0x233   : > { %v4244_v30 = vpop.f32.mrf.mxu2  ;;  %v3596_v45 = vpop.f32.mrf.mxu1  ;;  %v3350_v18 = vor.u32 %v3349_v5, %v3345_v52  ;;  %v4003_v23 = vshll.u32 %v3738_v42, 16  ;;  %v8154_v47 = vunpack.c.l.b16 %v4947_v20  ;;  %v4949_v42 = vshrl.u32 %v4669_v49, 16 }
 0x234   : > { %v4323_v54 = vadd.f32 %v4244_v30, %v3672_v62  ;;  %v3353_v62 = vshll.u32 %v3056_v37, 16  ;;  %v3673_v51 = vadd.f32 %v3596_v45, %v7360_v29  ;;  %v3341_v0 = vrot.slane %v3340_v26, 4  ;;  %v4670_v29 = vld [vmem:[#allocation2 + $0xd8] sm:$0xf] }
 0x235   : > { %v4526_v34 = vpop.f32.mrf.mxu3  ;;  %v6028_v15 = vrot.slane %v3995_v40, 11  ;;  %v4958_v26 = vshll.u32 %v4670_v29, 16  ;;  %v4962_v20 = vshrl.u32 %v4670_v29, 16 }
 0x236   : > { %v4605_v48 = vadd.f32 %v4526_v34, %v4323_v54  ;;  %3635 = vmatmul.bf16.gmra.mxu1 %v3511_v2  ;;  %v3351_v34 = vrot.slane %v3350_v18, 4  ;;  %v3355_v57 = vrot.slane %v3353_v62, 5  ;;  %v3346_v36 = vsel %vm7094_vm5, %v3341_v0, %v3345_v52 }
 0x237   : > { %v8164_v40 = vunpack.c.l.b16 %v3346_v36  ;;  %v4951_v52 = vrot.slane %v4949_v42, 4 }
 0x238   : > { %v5287_v17 = vadd.f32 %v5208_v55, %v4605_v48  ;;  %4286 = vmatmul.bf16.gmra.mxu2 %v4162_v60  ;;  %v4163_v48 = vpack.c.b16 %v4142_v28, %v4141_v50  ;;  %v4012_v28 = vshll.u32 %v8141_v10, 16 }
 0x239   : > { %v5211_v2 = vpop.f32.mrf.mxu0 }
 0x23a   : > { %v6389_v30 = vpack.c.bf16 %v5287_v17, %v5286_v33  ;;  %v5383_v21 = vadd.f32 %v5287_v17, %v5286_v33  ;;  %v5422_v54 = vmul.f32 %v5287_v17, %v5287_v17  ;;  %4568 = vmatmul.bf16.gmra.mxu3 %v6290_v24  ;;  %v4002_v33 = vrot.slane %v4000_v63, 7  ;;  %v8452_v17 = vld [vmem:[#allocation29_spill] sm:$0xff] }
 0x23b   : > { %v4247_v55 = vpop.f32.mrf.mxu2  ;;  %v3598_v60 = vpop.f32.mrf.mxu1  ;;  %v8152_v24 = vunpack.c.l.b16 %v4937_v4  ;;  %v4952_v63 = vshll.u32 %v4669_v49, 16  ;;  %v4671_v4 = vld [vmem:[#allocation2 + $0xdc] sm:$0x1] }
 0x23c   : > { %6390 = vst [vmem:[%s8149_s16] sm:$0xff] %v6389_v30   ;;  %v5453_v3 = vadd.f32 %v5422_v54, %v5421_v7  ;;  %5250 = vmatmul.bf16.gmra.mxu0 %v5126_v9  ;;  %v4324_v12 = vadd.f32 %v4247_v55, %v3673_v51  ;;  %v3674_v37 = vadd.f32 %v3598_v60, %v8452_v17  ;;  %v4011_v7 = vrot.slane %v4009_v59, 7 }
 0x23d   : > { %v4529_v45 = vpop.f32.mrf.mxu3  ;;  %v3356_v9 = vsel %vm7094_vm5, %v3351_v34, %v3355_v57  ;;  %v4005_v50 = vor.u32 %v4003_v23, %v4002_v33  ;;  %v4954_v54 = vrot.slane %v4952_v63, 5  ;;  %v4960_v60 = vrot.slane %v4958_v26, 5 }
 0x23e   : > { %v4606_v5 = vadd.f32 %v4529_v45, %v4324_v12  ;;  %v8166_v30 = vunpack.c.l.b16 %v3356_v9  ;;  %v5127_v10 = vpack.c.b16 %v8154_v47, %v8152_v24  ;;  %v4007_v57 = vrot.slane %v4002_v33, 4 }
 0x23f   : > { %v4955_v59 = vor.u32 %v4954_v54, %v4951_v52  ;;  %v4968_v12 = vshll.u32 %v4671_v4, 16  ;;  %v4006_v29 = vsel %vm7086_vm2, %v6028_v15, %v4005_v50  ;;  %v4014_v45 = vor.u32 %v4012_v28, %v4011_v7 }
 0x240   : > { %v8161_v18 = vadd.f32 %v5211_v2, %v4606_v5  ;;  %v4964_v2 = vrot.slane %v4962_v20, 4  ;;  %v3058_v5 = vld [vmem:[#allocation2 + $0xd8] sm:$0xf]  ;;  %v3513_v36 = vpack.c.b16 %v8166_v30, %v8164_v40  ;;  %v4143_v15 = vunpack.c.l.b16 %v4006_v29  ;;  %v3059_v20 = vld [vmem:[#allocation2 + $0xdc] sm:$0x1] }
 0x241   : > { %v5213_v62 = vpop.f32.mrf.mxu0  ;;  %v4956_v9 = vrot.slane %v4955_v59, 4  ;;  %v4970_v33 = vrot.slane %v4968_v12, 5  ;;  %v3367_v47 = vshll.u32 %v3058_v5, 16  ;;  %v3371_v50 = vshrl.u32 %v3058_v5, 16  ;;  %v3741_v12 = vld [vmem:[#allocation2 + $0xe4] sm:$0xf] }
 0x242   : > { %v5384_v51 = vadd.f32 %v5383_v21, %v8161_v18  ;;  %v5423_v55 = vmul.f32 %v8161_v18, %v8161_v18  ;;  %v3057_v21 = vld [vmem:[#allocation2 + $0xd4] sm:$0xf]  ;;  %v4965_v42 = vor.u32 %v4964_v2, %v4960_v60  ;;  %v4015_v4 = vsel %vm7086_vm2, %v4007_v57, %v4014_v45 }
 0x243   : > { %v4249_v0 = vpop.f32.mrf.mxu2  ;;  %v3601_v34 = vpop.f32.mrf.mxu1  ;;  %v3358_v63 = vshrl.u32 %v3057_v21, 16  ;;  %v3361_v24 = vshll.u32 %v3057_v21, 16  ;;  %v8182_v54 = vrot.slane %v3367_v47, 5  ;;  %v4961_v2 = vsel %vm7094_vm5, %v4956_v9, %v4960_v60 }
 0x244   : > { %v5454_v23 = vadd.f32 %v5453_v3, %v5423_v55  ;;  %v4325_v49 = vadd.f32 %v4249_v0, %v3674_v37  ;;  %v6291_v3 = vld [vmem:[#allocation2 + $0xc4] sm:$0xff]  ;;  %v4966_v37 = vrot.slane %v4965_v42, 4  ;;  %v3740_v55 = vld [vmem:[#allocation2 + $0xe0] sm:$0x8]  ;;  %v3675_v61 = vadd.f32 %v3601_v34, %v8453_v53 }
 0x245   : > { %v4531_v17 = vpop.f32.mrf.mxu3  ;;  %v3360_v7 = vrot.slane %v3358_v63, 4  ;;  %v3363_v52 = vrot.slane %v3361_v24, 5  ;;  %v3373_v0 = vrot.slane %v3371_v50, 4  ;;  %v3377_v59 = vshll.u32 %v3059_v20, 16 }
 0x246   : > { %v4607_v26 = vadd.f32 %v4531_v17, %v4325_v49  ;;  %3640 = vmatmul.bf16.gmra.mxu1 %v3512_v25  ;;  %v4971_v57 = vsel %vm7094_vm5, %v4966_v37, %v4970_v33  ;;  %v4144_v21 = vunpack.c.l.b16 %v4015_v4  ;;  %v3742_v17 = vld [vmem:[#allocation2 + $0xe8] sm:$0xf]  ;;  %v4017_v60 = vshrl.u32 %v3740_v55, 16 }
 0x247   : > { %v3364_v34 = vor.u32 %v3363_v52, %v3360_v7  ;;  %v3374_v5 = vor.u32 %v3373_v0, %v8182_v54  ;;  %v8192_v63 = vunpack.c.l.b16 %v4961_v2  ;;  %v3379_v24 = vrot.slane %v3377_v59, 5  ;;  %v4673_v2 = vld [vmem:[#allocation2 + $0xe8] sm:$0xf] }
 0x248   : > { %v5289_v28 = vadd.f32 %v5213_v62, %v4607_v26  ;;  %4291 = vmatmul.bf16.gmra.mxu2 %v4163_v48  ;;  %v4025_v47 = vshll.u32 %v3741_v12, 16  ;;  %v6029_v4 = vrot.slane %v4017_v60, 11  ;;  %v4034_v20 = vshll.u32 %v3742_v17, 16 }
 0x249   : > { %v5216_v25 = vpop.f32.mrf.mxu0  ;;  %v3365_v33 = vrot.slane %v3364_v34, 4  ;;  %v3375_v7 = vrot.slane %v3374_v5, 4  ;;  %v4164_v53 = vpack.c.b16 %v4144_v21, %v4143_v15 }
 0x24a   : > { %v6394_v48 = vpack.c.bf16 %v5289_v28, %v8161_v18  ;;  %v5385_v62 = vadd.f32 %v5384_v51, %v5289_v28  ;;  %v5424_v49 = vmul.f32 %v5289_v28, %v5289_v28  ;;  %4573 = vmatmul.bf16.gmra.mxu3 %v6291_v3  ;;  %v4022_v18 = vshrl.u32 %v3741_v12, 16  ;;  %v4672_v51 = vld [vmem:[#allocation2 + $0xe4] sm:$0xf] }
 0x24b   : > { %v4252_v29 = vpop.f32.mrf.mxu2  ;;  %v3603_v45 = vpop.f32.mrf.mxu1  ;;  %v8194_v3 = vunpack.c.l.b16 %v4971_v57  ;;  %v4031_v28 = vshrl.u32 %v3742_v17, 16  ;;  %v4973_v52 = vshrl.u32 %v4672_v51, 16  ;;  %v4982_v17 = vshll.u32 %v4673_v2, 16 }
 0x24c   : > { %6481 = vst [vmem:[%s8149_s16 + $0x8] sm:$0xff] %v6394_v48   ;;  %v5455_v9 = vadd.f32 %v5454_v23, %v5424_v49  ;;  %5255 = vmatmul.bf16.gmra.mxu0 %v5127_v10  ;;  %v4326_v42 = vadd.f32 %v4252_v29, %v3675_v61  ;;  %v4024_v50 = vrot.slane %v4022_v18, 7  ;;  %v4976_v23 = vshll.u32 %v4672_v51, 16 }
 0x24d   : > { %v4534_v26 = vpop.f32.mrf.mxu3  ;;  %v3676_v55 = vadd.f32 %v3603_v45, %v7436_v14  ;;  %v4033_v49 = vrot.slane %v4031_v28, 7  ;;  %v4975_v59 = vrot.slane %v4973_v52, 4  ;;  %v3380_v14 = vsel %vm7094_vm5, %v3375_v7, %v3379_v24 }
 0x24e   : > { %v4608_v37 = vadd.f32 %v4534_v26, %v4326_v42  ;;  %v4027_v61 = vor.u32 %v4025_v47, %v4024_v50  ;;  %v4029_v48 = vrot.slane %v4024_v50, 4  ;;  %v4978_v12 = vrot.slane %v4976_v23, 5  ;;  %v3060_v26 = vld [vmem:[#allocation2 + $0xe4] sm:$0xf] }
 0x24f   : > { %v5128_v21 = vpack.c.b16 %v8194_v3, %v8192_v63  ;;  %v4036_v5 = vor.u32 %v4034_v20, %v4033_v49  ;;  %v4986_v51 = vshrl.u32 %v4673_v2, 16  ;;  %v8213_v24 = vunpack.c.l.b16 %v3380_v14  ;;  %v3062_v49 = vld [vmem:[#allocation2 + $0xec] sm:$0x1] }
 0x250   : > { %v8196_v10 = vadd.f32 %v5216_v25, %v4608_v37  ;;  %v3370_v25 = vsel %vm7094_vm5, %v3365_v33, %v8182_v54  ;;  %v4028_v34 = vsel %vm7086_vm2, %v6029_v4, %v4027_v61  ;;  %v4979_v18 = vor.u32 %v4978_v12, %v4975_v59  ;;  %v3061_v54 = vld [vmem:[#allocation2 + $0xe8] sm:$0xf] }
 0x251   : > { %v5218_v0 = vpop.f32.mrf.mxu0  ;;  %v8211_v47 = vunpack.c.l.b16 %v3370_v25  ;;  %v4037_v63 = vsel %vm7086_vm2, %v4029_v48, %v4036_v5  ;;  %v4984_v3 = vrot.slane %v4982_v17, 5  ;;  %v4988_v7 = vrot.slane %v4986_v51, 4  ;;  %v3743_v17 = vld [vmem:[#allocation2 + $0xf0] sm:$0x8]  ;;  %v3745_v51 = vld [vmem:[#allocation2 + $0xf8] sm:$0xf] }
 0x252   : > { %v5386_v57 = vadd.f32 %v5385_v62, %v8196_v10  ;;  %v5425_v29 = vmul.f32 %v8196_v10, %v8196_v10  ;;  %v4674_v62 = vld [vmem:[#allocation2 + $0xec] sm:$0x1]  ;;  %v3382_v28 = vshrl.u32 %v3060_v26, 16  ;;  %v4145_v20 = vunpack.c.l.b16 %v4028_v34 }
 0x253   : > { %v4254_v15 = vpop.f32.mrf.mxu2  ;;  %v3606_v45 = vpop.f32.mrf.mxu1  ;;  %v4992_v50 = vshll.u32 %v4674_v62, 16  ;;  %v3385_v52 = vshll.u32 %v3060_v26, 16  ;;  %v3391_v23 = vshll.u32 %v3061_v54, 16  ;;  %v4146_v61 = vunpack.c.l.b16 %v4037_v63 }
 0x254   : > { %v5456_v60 = vadd.f32 %v5455_v9, %v5425_v29  ;;  %v4327_v42 = vadd.f32 %v4254_v15, %v3676_v55  ;;  %v6292_v9 = vld [vmem:[#allocation2 + $0xd4] sm:$0xff]  ;;  %v3677_v4 = vadd.f32 %v3606_v45, %v7496_v16  ;;  %v4980_v2 = vrot.slane %v4979_v18, 4 }
 0x255   : > { %v4536_v33 = vpop.f32.mrf.mxu3  ;;  %v4989_v48 = vor.u32 %v4988_v7, %v4984_v3  ;;  %v3384_v12 = vrot.slane %v3382_v28, 4  ;;  %v3387_v29 = vrot.slane %v3385_v52, 5  ;;  %v8221_v40 = vrot.slane %v3391_v23, 5  ;;  %v4675_v28 = vld [vmem:[#allocation2 + $0xf4] sm:$0xf] }
 0x256   : > { %v4609_v37 = vadd.f32 %v4536_v33, %v4327_v42  ;;  %3645 = vmatmul.bf16.gmra.mxu1 %v3513_v36  ;;  %v3395_v30 = vshrl.u32 %v3061_v54, 16  ;;  %v3744_v36 = vld [vmem:[#allocation2 + $0xf4] sm:$0xf]  ;;  %v4994_v15 = vrot.slane %v4992_v50, 5  ;;  %v3401_v62 = vshll.u32 %v3062_v49, 16 }
 0x257   : > { %v4990_v45 = vrot.slane %v4989_v48, 4  ;;  %v3388_v34 = vor.u32 %v3387_v29, %v3384_v12  ;;  %v4044_v26 = vshrl.u32 %v3744_v36, 16  ;;  %v4165_v63 = vpack.c.b16 %v4146_v61, %v4145_v20 }
 0x258   : > { %v5291_v55 = vadd.f32 %v5218_v0, %v4609_v37  ;;  %4296 = vmatmul.bf16.gmra.mxu2 %v4164_v53  ;;  %v3397_v5 = vrot.slane %v3395_v30, 4  ;;  %v4985_v37 = vsel %vm7094_vm5, %v4980_v2, %v4984_v3  ;;  %v4053_v50 = vshrl.u32 %v3745_v51, 16 }
 0x259   : > { %v5221_v59 = vpop.f32.mrf.mxu0  ;;  %v4995_v7 = vsel %vm7094_vm5, %v4990_v45, %v4994_v15  ;;  %v4046_v23 = vrot.slane %v4044_v26, 7  ;;  %v5109_v20 = vunpack.c.l.b16 %v4985_v37  ;;  %v4056_v49 = vshll.u32 %v3745_v51, 16  ;;  %v6293_v26 = vld [vmem:[#allocation2 + $0xe4] sm:$0xff] }
 0x25a   : > { %v6399_v25 = vpack.c.bf16 %v5291_v55, %v8196_v10  ;;  %v5387_v16 = vadd.f32 %v5386_v57, %v5291_v55  ;;  %v5426_v14 = vmul.f32 %v5291_v55, %v5291_v55  ;;  %4578 = vmatmul.bf16.gmra.mxu3 %v6292_v9  ;;  %v3514_v10 = vpack.c.b16 %v8213_v24, %v8211_v47  ;;  %v4676_v47 = vld [vmem:[#allocation2 + $0xf8] sm:$0xf] }
 0x25b   : > { %v4257_v0 = vpop.f32.mrf.mxu2  ;;  %v3608_v53 = vpop.f32.mrf.mxu1  ;;  %v3398_v57 = vor.u32 %v3397_v5, %v8221_v40  ;;  %v4039_v9 = vshrl.u32 %v3743_v17, 16  ;;  %v4047_v55 = vshll.u32 %v3744_v36, 16  ;;  %v4055_v61 = vrot.slane %v4053_v50, 7 }
 0x25c   : > { %6482 = vst [vmem:[%s8149_s16 + $0x10] sm:$0xff] %v6399_v25   ;;  %v5457_v42 = vadd.f32 %v5456_v60, %v5426_v14  ;;  %5260 = vmatmul.bf16.gmra.mxu0 %v5128_v21  ;;  %v4328_v18 = vadd.f32 %v4257_v0, %v3677_v4  ;;  %v3389_v60 = vrot.slane %v3388_v34, 4  ;;  %v3403_v21 = vrot.slane %v3401_v62, 5  ;;  %v4677_v34 = vld [vmem:[#allocation2 + $0xfc] sm:$0x1] }
 0x25d   : > { %v4539_v54 = vpop.f32.mrf.mxu3  ;;  %v3399_v52 = vrot.slane %v3398_v57, 4  ;;  %v3678_v24 = vadd.f32 %v3608_v53, %v7499_v46  ;;  %v5110_v12 = vunpack.c.l.b16 %v4995_v7  ;;  %v4997_v29 = vshrl.u32 %v4675_v28, 16 }
 0x25e   : > { %v4610_v33 = vadd.f32 %v4539_v54, %v4328_v18  ;;  %v6030_v14 = vrot.slane %v4039_v9, 11  ;;  %v5000_v15 = vshll.u32 %v4675_v28, 16  ;;  %v5006_v36 = vshll.u32 %v4676_v47, 16 }
 0x25f   : > { %v3404_v46 = vsel %vm7094_vm5, %v3399_v52, %v3403_v21  ;;  %v4049_v53 = vor.u32 %v4047_v55, %v4046_v23  ;;  %v4051_v5 = vrot.slane %v4046_v23, 4  ;;  %v4058_v62 = vor.u32 %v4056_v49, %v4055_v61 }
 0x260   : > { %v5292_v4 = vadd.f32 %v5221_v59, %v4610_v33  ;;  %v3394_v59 = vsel %vm7094_vm5, %v3389_v60, %v8221_v40  ;;  %v4999_v17 = vrot.slane %v4997_v29, 4  ;;  %v5002_v18 = vrot.slane %v5000_v15, 5 }
 0x261   : > { %v5223_v48 = vpop.f32.mrf.mxu0  ;;  %v5008_v54 = vrot.slane %v5006_v36, 5  ;;  %v5010_v40 = vshrl.u32 %v4676_v47, 16  ;;  %v8238_v57 = vunpack.c.l.b16 %v3394_v59  ;;  %v8240_v33 = vunpack.c.l.b16 %v3404_v46 }
 0x262   : > { %v5388_v3 = vadd.f32 %v5387_v16, %v5292_v4  ;;  %v5427_v2 = vmul.f32 %v5292_v4, %v5292_v4  ;;  %v5016_v37 = vshll.u32 %v4677_v34, 16  ;;  %v5129_v7 = vpack.c.b16 %v5110_v12, %v5109_v20  ;;  %v3746_v34 = vld [vmem:[#allocation2 + $0x100] sm:$0x8] }
 0x263   : > { %v4259_v30 = vpop.f32.mrf.mxu2  ;;  %v3611_v25 = vpop.f32.mrf.mxu1  ;;  %v4050_v60 = vsel %vm7086_vm2, %v6030_v14, %v4049_v53  ;;  %v5012_v21 = vrot.slane %v5010_v40, 4  ;;  %v4059_v28 = vsel %vm7086_vm2, %v4051_v5, %v4058_v62  ;;  %v3515_v61 = vpack.c.b16 %v8240_v33, %v8238_v57  ;;  %v3748_v57 = vld [vmem:[#allocation2 + $0x108] sm:$0xf] }
 0x264   : > { %v5458_v0 = vadd.f32 %v5457_v42, %v5427_v2  ;;  %v4329_v45 = vadd.f32 %v4259_v30, %v3678_v24  ;;  %v5003_v42 = vor.u32 %v5002_v18, %v4999_v17  ;;  %v3679_v50 = vadd.f32 %v3611_v25, %v7541_v13  ;;  %v3063_v30 = vld [vmem:[#allocation2 + $0xf4] sm:$0xf]  ;;  %v3064_v25 = vld [vmem:[#allocation2 + $0xf8] sm:$0xf] }
 0x265   : > { %v4541_v16 = vpop.f32.mrf.mxu3  ;;  %v5018_v23 = vrot.slane %v5016_v37, 5  ;;  %v4147_v49 = vunpack.c.l.b16 %v4050_v60  ;;  %v4148_v12 = vunpack.c.l.b16 %v4059_v28  ;;  %v3406_v14 = vshrl.u32 %v3063_v30, 16 }
 0x266   : > { %v4611_v51 = vadd.f32 %v4541_v16, %v4329_v45  ;;  %3650 = vmatmul.bf16.gmra.mxu1 %v3514_v10  ;;  %v5004_v52 = vrot.slane %v5003_v42, 4  ;;  %v3409_v15 = vshll.u32 %v3063_v30, 16  ;;  %v3415_v36 = vshll.u32 %v3064_v25, 16  ;;  %v3747_v16 = vld [vmem:[#allocation2 + $0x104] sm:$0xf] }
 0x267   : > { %v3419_v53 = vshrl.u32 %v3064_v25, 16  ;;  %v3408_v62 = vrot.slane %v3406_v14, 4  ;;  %v4061_v37 = vshrl.u32 %v3746_v34, 16 }
 0x268   : > { %v5293_v9 = vadd.f32 %v5223_v48, %v4611_v51  ;;  %4301 = vmatmul.bf16.gmra.mxu2 %v4165_v63  ;;  %v5013_v48 = vor.u32 %v5012_v21, %v5008_v54  ;;  %v3411_v17 = vrot.slane %v3409_v15, 5  ;;  %v3417_v18 = vrot.slane %v3415_v36, 5  ;;  %v6294_v15 = vld [vmem:[#allocation2 + $0xf4] sm:$0xff] }
 0x269   : > { %v5226_v10 = vpop.f32.mrf.mxu0  ;;  %v3421_v40 = vrot.slane %v3419_v53, 4  ;;  %v6031_v25 = vrot.slane %v4061_v37, 11 }
 0x26a   : > { %v6404_v55 = vpack.c.bf16 %v5293_v9, %v5292_v4  ;;  %v5389_v47 = vadd.f32 %v5388_v3, %v5293_v9  ;;  %v5428_v24 = vmul.f32 %v5293_v9, %v5293_v9  ;;  %4583 = vmatmul.bf16.gmra.mxu3 %v6293_v26  ;;  %v5014_v29 = vrot.slane %v5013_v48, 4  ;;  %v3065_v3 = vld [vmem:[#allocation2 + $0xfc] sm:$0x1]  ;;  %v4678_v48 = vld [vmem:[#allocation2 + $0x104] sm:$0xf] }
 0x26b   : > { %v4262_v63 = vpop.f32.mrf.mxu2  ;;  %v3613_v20 = vpop.f32.mrf.mxu1  ;;  %v5009_v4 = vsel %vm7094_vm5, %v5004_v52, %v5008_v54  ;;  %v3412_v42 = vor.u32 %v3411_v17, %v3408_v62  ;;  %v4066_v9 = vshrl.u32 %v3747_v16, 16  ;;  %v3422_v21 = vor.u32 %v3421_v40, %v3417_v18 }
 0x26c   : > { %6483 = vst [vmem:[%s8149_s16 + $0x18] sm:$0xff] %v6404_v55   ;;  %v5459_v2 = vadd.f32 %v5458_v0, %v5428_v24  ;;  %5265 = vmatmul.bf16.gmra.mxu0 %v5129_v7  ;;  %v4330_v13 = vadd.f32 %v4262_v63, %v3679_v50  ;;  %v5019_v46 = vsel %vm7094_vm5, %v5014_v29, %v5018_v23  ;;  %v3425_v0 = vshll.u32 %v3065_v3, 16  ;;  %v4679_v3 = vld [vmem:[#allocation2 + $0x108] sm:$0xf] }
 0x26d   : > { %v4544_v59 = vpop.f32.mrf.mxu3  ;;  %v3680_v5 = vadd.f32 %v3613_v20, %v7546_v44  ;;  %v8257_v26 = vunpack.c.l.b16 %v5009_v4  ;;  %v8259_v54 = vunpack.c.l.b16 %v5019_v46  ;;  %v4069_v7 = vshll.u32 %v3747_v16, 16  ;;  %v4680_v16 = vld [vmem:[#allocation2 + $0x10c] sm:$0x1] }
 0x26e   : > { %v4612_v45 = vadd.f32 %v4544_v59, %v4330_v13  ;;  %v3427_v50 = vrot.slane %v3425_v0, 5  ;;  %v3413_v52 = vrot.slane %v3412_v42, 4  ;;  %v4068_v23 = vrot.slane %v4066_v9, 7 }
 0x26f   : > { %v4075_v55 = vshrl.u32 %v3748_v57, 16  ;;  %v4078_v24 = vshll.u32 %v3748_v57, 16  ;;  %v4166_v13 = vpack.c.b16 %v4148_v12, %v4147_v49  ;;  %v3423_v29 = vrot.slane %v3422_v21, 4 }
 0x270   : > { %v8255_v51 = vadd.f32 %v5226_v10, %v4612_v45  ;;  %v4071_v59 = vor.u32 %v4069_v7, %v4068_v23  ;;  %v4073_v45 = vrot.slane %v4068_v23, 4  ;;  %v5021_v46 = vshrl.u32 %v4678_v48, 16  ;;  %v3067_v23 = vld [vmem:[#allocation2 + $0x108] sm:$0xf] }
 0x271   : > { %v5228_v33 = vpop.f32.mrf.mxu0  ;;  %v4077_v4 = vrot.slane %v4075_v55, 7  ;;  %v3428_v36 = vsel %vm7094_vm5, %v3423_v29, %v3427_v50  ;;  %v5130_v49 = vpack.c.b16 %v8259_v54, %v8257_v26  ;;  %v5024_v53 = vshll.u32 %v4678_v48, 16 }
 0x272   : > { %v5390_v60 = vadd.f32 %v5389_v47, %v8255_v51  ;;  %v5429_v44 = vmul.f32 %v8255_v51, %v8255_v51  ;;  %v3418_v47 = vsel %vm7094_vm5, %v3413_v52, %v3417_v18  ;;  %v8273_v17 = vunpack.c.l.b16 %v3428_v36  ;;  %v3066_v52 = vld [vmem:[#allocation2 + $0x104] sm:$0xf] }
 0x273   : > { %v4264_v10 = vpop.f32.mrf.mxu2  ;;  %v3616_v28 = vpop.f32.mrf.mxu1  ;;  %v4080_v12 = vor.u32 %v4078_v24, %v4077_v4  ;;  %v8271_v34 = vunpack.c.l.b16 %v3418_v47  ;;  %v4072_v18 = vsel %vm7086_vm2, %v6031_v25, %v4071_v59  ;;  %v5034_v40 = vshrl.u32 %v4679_v3, 16 }
 0x274   : > { %v5460_v63 = vadd.f32 %v5459_v2, %v5429_v44  ;;  %v4331_v20 = vadd.f32 %v4264_v10, %v3680_v5  ;;  %v3681_v2 = vadd.f32 %v3616_v28, %v7559_v38  ;;  %v5023_v5 = vrot.slane %v5021_v46, 4  ;;  %v3750_v46 = vld [vmem:[#allocation2 + $0x114] sm:$0xf] }
 0x275   : > { %v4546_v30 = vpop.f32.mrf.mxu3  ;;  %v5026_v38 = vrot.slane %v5024_v53, 5  ;;  %v5036_v44 = vrot.slane %v5034_v40, 4  ;;  %v5040_v21 = vshll.u32 %v4680_v16, 16  ;;  %v4149_v28 = vunpack.c.l.b16 %v4072_v18 }
 0x276   : > { %v4613_v14 = vadd.f32 %v4546_v30, %v4331_v20  ;;  %3655 = vmatmul.bf16.gmra.mxu1 %v3515_v61  ;;  %v5030_v61 = vshll.u32 %v4679_v3, 16  ;;  %v3430_v29 = vshrl.u32 %v3066_v52, 16  ;;  %v3433_v30 = vshll.u32 %v3066_v52, 16 }
 0x277   : > { %v5027_v9 = vor.u32 %v5026_v38, %v5023_v5  ;;  %v5042_v48 = vrot.slane %v5040_v21, 5  ;;  %v3439_v47 = vshll.u32 %v3067_v23, 16  ;;  %v3443_v4 = vshrl.u32 %v3067_v23, 16 }
 0x278   : > { %v5295_v0 = vadd.f32 %v5228_v33, %v4613_v14  ;;  %4306 = vmatmul.bf16.gmra.mxu2 %v4166_v13  ;;  %v4081_v33 = vsel %vm7086_vm2, %v4073_v45, %v4080_v12  ;;  %v5032_v7 = vrot.slane %v5030_v61, 5  ;;  %v3068_v13 = vld [vmem:[#allocation2 + $0x10c] sm:$0x1]  ;;  %v3435_v36 = vrot.slane %v3433_v30, 5  ;;  %v3749_v45 = vld [vmem:[#allocation2 + $0x110] sm:$0x8] }
 0x279   : > { %v5231_v62 = vpop.f32.mrf.mxu0  ;;  %v5028_v55 = vrot.slane %v5027_v9, 4  ;;  %v3441_v12 = vrot.slane %v3439_v47, 5  ;;  %v3449_v53 = vshll.u32 %v3068_v13, 16  ;;  %v3751_v61 = vld [vmem:[#allocation2 + $0x118] sm:$0xf]  ;;  %v4083_v38 = vshrl.u32 %v3749_v45, 16 }
 0x27a   : > { %v6409_v26 = vpack.c.bf16 %v5295_v0, %v8255_v51  ;;  %v5391_v54 = vadd.f32 %v5390_v60, %v5295_v0  ;;  %v5430_v57 = vmul.f32 %v5295_v0, %v5295_v0  ;;  %4588 = vmatmul.bf16.gmra.mxu3 %v6294_v15  ;;  %v4150_v60 = vunpack.c.l.b16 %v4081_v33  ;;  %v4683_v45 = vld [vmem:[#allocation2 + $0x11c] sm:$0x1] }
 0x27b   : > { %v4267_v42 = vpop.f32.mrf.mxu2  ;;  %v3618_v37 = vpop.f32.mrf.mxu1  ;;  %v5037_v24 = vor.u32 %v5036_v44, %v5032_v7  ;;  %v5033_v14 = vsel %vm7094_vm5, %v5028_v55, %v5032_v7  ;;  %v3432_v15 = vrot.slane %v3430_v29, 4  ;;  %v4088_v40 = vshrl.u32 %v3750_v46, 16 }
 0x27c   : > { %6484 = vst [vmem:[%s8149_s16 + $0x20] sm:$0xff] %v6409_v26   ;;  %v5461_v50 = vadd.f32 %v5460_v63, %v5430_v57  ;;  %5270 = vmatmul.bf16.gmra.mxu0 %v5130_v49  ;;  %v4332_v10 = vadd.f32 %v4267_v42, %v3681_v2  ;;  %v3682_v25 = vadd.f32 %v3618_v37, %v7612_v32  ;;  %v3445_v32 = vrot.slane %v3443_v4, 4  ;;  %v4681_v57 = vld [vmem:[#allocation2 + $0x114] sm:$0xf] }
 0x27d   : > { %v4549_v51 = vpop.f32.mrf.mxu3  ;;  %v3516_v63 = vpack.c.b16 %v8273_v17, %v8271_v34  ;;  %v5038_v59 = vrot.slane %v5037_v24, 4  ;;  %v4167_v16 = vpack.c.b16 %v4150_v60, %v4149_v28  ;;  %v3436_v5 = vor.u32 %v3435_v36, %v3432_v15  ;;  %v6295_v28 = vld [vmem:[#allocation2 + $0x104] sm:$0xff] }
 0x27e   : > { %v4614_v20 = vadd.f32 %v4549_v51, %v4332_v10  ;;  %v3446_v18 = vor.u32 %v3445_v32, %v3441_v12  ;;  %v4091_v26 = vshll.u32 %v3750_v46, 16  ;;  %v5113_v37 = vunpack.c.l.b16 %v5033_v14  ;;  %v4682_v51 = vld [vmem:[#allocation2 + $0x118] sm:$0xf] }
 0x27f   : > { %v5043_v49 = vsel %vm7094_vm5, %v5038_v59, %v5042_v48  ;;  %v3437_v44 = vrot.slane %v3436_v5, 4  ;;  %v4090_v21 = vrot.slane %v4088_v40, 7  ;;  %v4097_v23 = vshrl.u32 %v3751_v61, 16 }
 0x280   : > { %v8284_v3 = vadd.f32 %v5231_v62, %v4614_v20  ;;  %v5114_v9 = vunpack.c.l.b16 %v5043_v49  ;;  %v3447_v52 = vrot.slane %v3446_v18, 4  ;;  %v5045_v60 = vshrl.u32 %v4681_v57, 16 }
 0x281   : > { %v5233_v2 = vpop.f32.mrf.mxu0  ;;  %v6032_v24 = vrot.slane %v4083_v38, 11  ;;  %v4093_v48 = vor.u32 %v4091_v26, %v4090_v21  ;;  %v4100_v20 = vshll.u32 %v3751_v61, 16  ;;  %v3442_v29 = vsel %vm7094_vm5, %v3437_v44, %v3441_v12 }
 0x282   : > { %v5392_v0 = vadd.f32 %v5391_v54, %v8284_v3  ;;  %v5431_v34 = vmul.f32 %v8284_v3, %v8284_v3  ;;  %v3451_v54 = vrot.slane %v3449_v53, 5  ;;  %v5131_v13 = vpack.c.b16 %v5114_v9, %v5113_v37 }
 0x283   : > { %v4269_v62 = vpop.f32.mrf.mxu2  ;;  %v3621_v17 = vpop.f32.mrf.mxu1  ;;  %v4099_v30 = vrot.slane %v4097_v23, 7  ;;  %v5048_v59 = vshll.u32 %v4681_v57, 16  ;;  %v5054_v4 = vshll.u32 %v4682_v51, 16  ;;  %v3500_v49 = vunpack.c.l.b16 %v3442_v29  ;;  %v6296_v29 = vld [vmem:[#allocation2 + $0x114] sm:$0xff] }
 0x284   : > { %v5462_v33 = vadd.f32 %v5461_v50, %v5431_v34  ;;  %v4333_v42 = vadd.f32 %v4269_v62, %v3682_v25  ;;  %v3683_v55 = vadd.f32 %v3621_v17, %v7684_v41  ;;  %v4095_v25 = vrot.slane %v4090_v21, 4 }
 0x285   : > { %v4551_v7 = vpop.f32.mrf.mxu3  ;;  %v3452_v36 = vsel %vm7094_vm5, %v3447_v52, %v3451_v54  ;;  %v4094_v12 = vsel %vm7086_vm2, %v6032_v24, %v4093_v48  ;;  %v4102_v32 = vor.u32 %v4100_v20, %v4099_v30  ;;  %v5050_v53 = vrot.slane %v5048_v59, 5 }
 0x286   : > { %v4615_v10 = vadd.f32 %v4551_v7, %v4333_v42  ;;  %3660 = vmatmul.bf16.gmra.mxu1 %v3516_v63  ;;  %v5047_v63 = vrot.slane %v5045_v60, 4  ;;  %v3501_v61 = vunpack.c.l.b16 %v3452_v36  ;;  %v5064_v18 = vshll.u32 %v4683_v45, 16 }
 0x287   : > { %v4103_v62 = vsel %vm7086_vm2, %v4095_v25, %v4102_v32  ;;  %v4151_v26 = vunpack.c.l.b16 %v4094_v12 }
 0x288   : > { %v5297_v50 = vadd.f32 %v5233_v2, %v4615_v10  ;;  %4311 = vmatmul.bf16.gmra.mxu2 %v4167_v16  ;;  %v5051_v17 = vor.u32 %v5050_v53, %v5047_v63  ;;  %v4152_v57 = vunpack.c.l.b16 %v4103_v62  ;;  %v5066_v7 = vrot.slane %v5064_v18, 5 }
 0x289   : > { %v5236_v47 = vpop.f32.mrf.mxu0  ;;  %v3517_v44 = vpack.c.b16 %v3501_v61, %v3500_v49 }
 0x28a   : > { %v6414_v14 = vpack.c.bf16 %v5297_v50, %v8284_v3  ;;  %v5393_v15 = vadd.f32 %v5392_v0, %v5297_v50  ;;  %v5432_v41 = vmul.f32 %v5297_v50, %v5297_v50  ;;  %4593 = vmatmul.bf16.gmra.mxu3 %v6295_v28  ;;  %v5056_v3 = vrot.slane %v5054_v4, 5 }
 0x28b   : > { %v4272_v46 = vpop.f32.mrf.mxu2  ;;  %v3623_v2 = vpop.f32.mrf.mxu1  ;;  %v5058_v0 = vshrl.u32 %v4682_v51, 16  ;;  %v5052_v42 = vrot.slane %v5051_v17, 4  ;;  %v4168_v51 = vpack.c.b16 %v4152_v57, %v4151_v26 }
 0x28c   : > { %6485 = vst [vmem:[%s8149_s16 + $0x28] sm:$0xff] %v6414_v14   ;;  %v5463_v34 = vadd.f32 %v5462_v33, %v5432_v41  ;;  %5275 = vmatmul.bf16.gmra.mxu0 %v5131_v13  ;;  %v4334_v16 = vadd.f32 %v4272_v46, %v3683_v55  ;;  %v3684_v39 = vadd.f32 %v3623_v2, %v7691_v35 }
 0x28d   : > { %v4554_v5 = vpop.f32.mrf.mxu3  ;;  %v5060_v40 = vrot.slane %v5058_v0, 4  ;;  %v5057_v54 = vsel %vm7094_vm5, %v5052_v42, %v5056_v3 }
 0x28e   : > { %v4616_v38 = vadd.f32 %v4554_v5, %v4334_v16  ;;  %v5115_v48 = vunpack.c.l.b16 %v5057_v54 }
 0x28f   : > { %v5061_v9 = vor.u32 %v5060_v40, %v5056_v3 }
 0x290   : > { %v5298_v37 = vadd.f32 %v5236_v47, %v4616_v38 }
 0x291   : > { %v5238_v33 = vpop.f32.mrf.mxu0  ;;  %v5062_v28 = vrot.slane %v5061_v9, 4 }
 0x292   : > { %v5394_v21 = vadd.f32 %v5393_v15, %v5298_v37  ;;  %v5433_v10 = vmul.f32 %v5298_v37, %v5298_v37 }
 0x293   : > { %v4274_v52 = vpop.f32.mrf.mxu2  ;;  %v3626_v23 = vpop.f32.mrf.mxu1  ;;  %v5067_v24 = vsel %vm7094_vm5, %v5062_v28, %v5066_v7 }
 0x294   : > { %v5464_v60 = vadd.f32 %v5463_v34, %v5433_v10  ;;  %v4335_v55 = vadd.f32 %v4274_v52, %v3684_v39  ;;  %v5116_v50 = vunpack.c.l.b16 %v5067_v24  ;;  %v3685_v4 = vadd.f32 %v3626_v23, %v7754_v19 }
 0x295   : > { %v4556_v20 = vpop.f32.mrf.mxu3 }
 0x296   : > { %v4617_v13 = vadd.f32 %v4556_v20, %v4335_v55  ;;  %3665 = vmatmul.bf16.gmra.mxu1 %v3517_v44  ;;  %v5132_v47 = vpack.c.b16 %v5116_v50, %v5115_v48 }
 0x298   : > { %v5299_v30 = vadd.f32 %v5238_v33, %v4617_v13  ;;  %4316 = vmatmul.bf16.gmra.mxu2 %v4168_v51 }
 0x299   : > { %v5241_v35 = vpop.f32.mrf.mxu0 }
 0x29a   : > { %v6419_v25 = vpack.c.bf16 %v5299_v30, %v5298_v37  ;;  %v5395_v63 = vadd.f32 %v5394_v21, %v5299_v30  ;;  %v5434_v59 = vmul.f32 %v5299_v30, %v5299_v30  ;;  %4598 = vmatmul.bf16.gmra.mxu3 %v6296_v29 }
 0x29b   : > { %v4277_v14 = vpop.f32.mrf.mxu2  ;;  %v3628_v56 = vpop.f32.mrf.mxu1 }
 0x29c   : > { %6486 = vst [vmem:[%s8149_s16 + $0x30] sm:$0xff] %v6419_v25   ;;  %v5465_v15 = vadd.f32 %v5464_v60, %v5434_v59  ;;  %5280 = vmatmul.bf16.gmra.mxu0 %v5132_v47  ;;  %v4336_v41 = vadd.f32 %v4277_v14, %v3685_v4  ;;  %v3686_v32 = vadd.f32 %v3628_v56, %v7760_v27 }
 0x29d   : > { %v4559_v36 = vpop.f32.mrf.mxu3 }
 0x29e   : > { %v4618_v45 = vadd.f32 %v4559_v36, %v4336_v41 }
 0x2a0   : > { %v5300_v46 = vadd.f32 %v5241_v35, %v4618_v45 }
 0x2a1   : > { %v5243_v2 = vpop.f32.mrf.mxu0 }
 0x2a2   : > { %v5396_v49 = vadd.f32 %v5395_v63, %v5300_v46  ;;  %v5435_v12 = vmul.f32 %v5300_v46, %v5300_v46 }
 0x2a3   : > { %v4279_v53 = vpop.f32.mrf.mxu2  ;;  %v3631_v34 = vpop.f32.mrf.mxu1 }
 0x2a4   : > { %v5466_v16 = vadd.f32 %v5465_v15, %v5435_v12  ;;  %v4337_v19 = vadd.f32 %v4279_v53, %v3686_v32  ;;  %v3687_v38 = vadd.f32 %v3631_v34, %v7775_v1 }
 0x2a5   : > { %v4561_v3 = vpop.f32.mrf.mxu3 }
 0x2a6   : > { %v4619_v0 = vadd.f32 %v4561_v3, %v4337_v19 }
 0x2a8   : > { %v5301_v5 = vadd.f32 %v5243_v2, %v4619_v0 }
 0x2a9   : > { %v5246_v61 = vpop.f32.mrf.mxu0 }
 0x2aa   : > { %v6424_v62 = vpack.c.bf16 %v5301_v5, %v5300_v46  ;;  %v5397_v17 = vadd.f32 %v5396_v49, %v5301_v5  ;;  %v5436_v18 = vmul.f32 %v5301_v5, %v5301_v5 }
 0x2ab   : > { %v4282_v40 = vpop.f32.mrf.mxu2  ;;  %v3633_v26 = vpop.f32.mrf.mxu1 }
 0x2ac   : > { %6487 = vst [vmem:[%s8149_s16 + $0x38] sm:$0xff] %v6424_v62   ;;  %v5467_v57 = vadd.f32 %v5466_v16, %v5436_v18  ;;  %v4338_v42 = vadd.f32 %v4282_v40, %v3687_v38  ;;  %v3688_v54 = vadd.f32 %v3633_v26, %v7808_v6 }
 0x2ad   : > { %v4564_v37 = vpop.f32.mrf.mxu3 }
 0x2ae   : > { %v4620_v27 = vadd.f32 %v4564_v37, %v4338_v42 }
 0x2b0   : > { %v5302_v9 = vadd.f32 %v5246_v61, %v4620_v27 }
 0x2b1   : > { %v5248_v7 = vpop.f32.mrf.mxu0 }
 0x2b2   : > { %v5398_v33 = vadd.f32 %v5397_v17, %v5302_v9  ;;  %v5437_v44 = vmul.f32 %v5302_v9, %v5302_v9 }
 0x2b3   : > { %v4284_v21 = vpop.f32.mrf.mxu2  ;;  %v3636_v10 = vpop.f32.mrf.mxu1 }
 0x2b4   : > { %v5468_v39 = vadd.f32 %v5467_v57, %v5437_v44  ;;  %v4339_v28 = vadd.f32 %v4284_v21, %v3688_v54  ;;  %v3689_v48 = vadd.f32 %v3636_v10, %v7813_v43 }
 0x2b5   : > { %v4566_v52 = vpop.f32.mrf.mxu3 }
 0x2b6   : > { %v4621_v1 = vadd.f32 %v4566_v52, %v4339_v28 }
 0x2b8   : > { %v5303_v23 = vadd.f32 %v5248_v7, %v4621_v1  ;;  %v8454_v7 = vld [vmem:[#allocation31_spill] sm:$0xff] }
 0x2b9   : > { %v5251_v51 = vpop.f32.mrf.mxu0 }
 0x2ba   : > { %v6429_v60 = vpack.c.bf16 %v5303_v23, %v5302_v9  ;;  %v5399_v55 = vadd.f32 %v5398_v33, %v5303_v23  ;;  %v5438_v24 = vmul.f32 %v5303_v23, %v5303_v23 }
 0x2bb   : > { %v4287_v20 = vpop.f32.mrf.mxu2  ;;  %v3638_v50 = vpop.f32.mrf.mxu1 }
 0x2bc   : > { %6488 = vst [vmem:[%s8149_s16 + $0x40] sm:$0xff] %v6429_v60   ;;  %v5469_v13 = vadd.f32 %v5468_v39, %v5438_v24  ;;  %v4340_v29 = vadd.f32 %v4287_v20, %v3689_v48  ;;  %v3690_v59 = vadd.f32 %v3638_v50, %v7815_v8 }
 0x2bd   : > { %v4569_v30 = vpop.f32.mrf.mxu3 }
 0x2be   : > { %v4622_v6 = vadd.f32 %v4569_v30, %v4340_v29 }
 0x2c0   : > { %v5304_v47 = vadd.f32 %v5251_v51, %v4622_v6  ;;  %v8455_v51 = vld [vmem:[#allocation25_spill] sm:$0xff] }
 0x2c1   : > { %v5253_v35 = vpop.f32.mrf.mxu0 }
 0x2c2   : > { %v5400_v25 = vadd.f32 %v5399_v55, %v5304_v47  ;;  %v5439_v63 = vmul.f32 %v5304_v47, %v5304_v47 }
 0x2c3   : > { %v4289_v4 = vpop.f32.mrf.mxu2  ;;  %v3641_v14 = vpop.f32.mrf.mxu1 }
 0x2c4   : > { %v5470_v56 = vadd.f32 %v5469_v13, %v5439_v63  ;;  %v4341_v15 = vadd.f32 %v4289_v4, %v3690_v59  ;;  %v3691_v12 = vadd.f32 %v3641_v14, %v7828_v31 }
 0x2c5   : > { %v4571_v41 = vpop.f32.mrf.mxu3 }
 0x2c6   : > { %v4623_v43 = vadd.f32 %v4571_v41, %v4341_v15 }
 0x2c8   : > { %v5305_v36 = vadd.f32 %v5253_v35, %v4623_v43 }
 0x2c9   : > { %v5256_v45 = vpop.f32.mrf.mxu0 }
 0x2ca   : > { %v6434_v46 = vpack.c.bf16 %v5305_v36, %v5304_v47  ;;  %v5401_v2 = vadd.f32 %v5400_v25, %v5305_v36  ;;  %v5440_v49 = vmul.f32 %v5305_v36, %v5305_v36  ;;  %v8456_v25 = vld [vmem:[#allocation18_spill] sm:$0xff] }
 0x2cb   : > { %v4292_v32 = vpop.f32.mrf.mxu2  ;;  %v3643_v53 = vpop.f32.mrf.mxu1 }
 0x2cc   : > { %6489 = vst [vmem:[%s8149_s16 + $0x48] sm:$0xff] %v6434_v46   ;;  %v5471_v34 = vadd.f32 %v5470_v56, %v5440_v49  ;;  %v4342_v16 = vadd.f32 %v4292_v32, %v3691_v12  ;;  %v3692_v62 = vadd.f32 %v3643_v53, %v7858_v22 }
 0x2cd   : > { %v4574_v19 = vpop.f32.mrf.mxu3 }
 0x2ce   : > { %v4624_v8 = vadd.f32 %v4574_v19, %v4342_v16 }
 0x2d0   : > { %v5306_v3 = vadd.f32 %v5256_v45, %v4624_v8 }
 0x2d1   : > { %v5258_v0 = vpop.f32.mrf.mxu0 }
 0x2d2   : > { %v5402_v5 = vadd.f32 %v5401_v2, %v5306_v3  ;;  %v5441_v61 = vmul.f32 %v5306_v3, %v5306_v3  ;;  %v8457_v2 = vld [vmem:[#allocation19_spill] sm:$0xff] }
 0x2d3   : > { %v4294_v17 = vpop.f32.mrf.mxu2  ;;  %v3646_v18 = vpop.f32.mrf.mxu1 }
 0x2d4   : > { %v5472_v38 = vadd.f32 %v5471_v34, %v5441_v61  ;;  %v4343_v40 = vadd.f32 %v4294_v17, %v3692_v62  ;;  %v3693_v33 = vadd.f32 %v3646_v18, %v8454_v7  ;;  %v8458_v62 = vld [vmem:[#allocation20_spill] sm:$0xff]  ;;  %v8459_v7 = vld [vmem:[#allocation21_spill] sm:$0xff] }
 0x2d5   : > { %v4576_v26 = vpop.f32.mrf.mxu3 }
 0x2d6   : > { %v4625_v31 = vadd.f32 %v4576_v26, %v4343_v40 }
 0x2d8   : > { %v5307_v57 = vadd.f32 %v5258_v0, %v4625_v31 }
 0x2d9   : > { %v5261_v42 = vpop.f32.mrf.mxu0 }
 0x2da   : > { %v6439_v37 = vpack.c.bf16 %v5307_v57, %v5306_v3  ;;  %v5403_v27 = vadd.f32 %v5402_v5, %v5307_v57  ;;  %v5442_v9 = vmul.f32 %v5307_v57, %v5307_v57 }
 0x2db   : > { %v4297_v44 = vpop.f32.mrf.mxu2  ;;  %v3648_v54 = vpop.f32.mrf.mxu1 }
 0x2dc   : > { %6490 = vst [vmem:[%s8149_s16 + $0x50] sm:$0xff] %v6439_v37   ;;  %v5473_v21 = vadd.f32 %v5472_v38, %v5442_v9  ;;  %v4344_v10 = vadd.f32 %v4297_v44, %v3693_v33  ;;  %v3694_v60 = vadd.f32 %v3648_v54, %v8455_v51 }
 0x2dd   : > { %v4579_v39 = vpop.f32.mrf.mxu3 }
 0x2de   : > { %v4626_v22 = vadd.f32 %v4579_v39, %v4344_v10 }
 0x2e0   : > { %v5308_v28 = vadd.f32 %v5261_v42, %v4626_v22 }
 0x2e1   : > { %v5263_v52 = vpop.f32.mrf.mxu0 }
 0x2e2   : > { %v5404_v1 = vadd.f32 %v5403_v27, %v5308_v28  ;;  %v5443_v23 = vmul.f32 %v5308_v28, %v5308_v28 }
 0x2e3   : > { %v4299_v55 = vpop.f32.mrf.mxu2  ;;  %v3651_v24 = vpop.f32.mrf.mxu1 }
 0x2e4   : > { %v5474_v48 = vadd.f32 %v5473_v21, %v5443_v23  ;;  %v4345_v20 = vadd.f32 %v4299_v55, %v3694_v60  ;;  %v3695_v63 = vadd.f32 %v3651_v24, %v8456_v25  ;;  %v8460_v60 = vld [vmem:[#allocation22_spill] sm:$0xff] }
 0x2e5   : > { %v4581_v50 = vpop.f32.mrf.mxu3 }
 0x2e6   : > { %v4627_v13 = vadd.f32 %v4581_v50, %v4345_v20 }
 0x2e8   : > { %v5309_v29 = vadd.f32 %v5263_v52, %v4627_v13 }
 0x2e9   : > { %v5266_v30 = vpop.f32.mrf.mxu0 }
 0x2ea   : > { %v6444_v6 = vpack.c.bf16 %v5309_v29, %v5308_v28  ;;  %v5405_v47 = vadd.f32 %v5404_v1, %v5309_v29  ;;  %v5444_v35 = vmul.f32 %v5309_v29, %v5309_v29 }
 0x2eb   : > { %v4302_v59 = vpop.f32.mrf.mxu2  ;;  %v3653_v4 = vpop.f32.mrf.mxu1 }
 0x2ec   : > { %6491 = vst [vmem:[%s8149_s16 + $0x58] sm:$0xff] %v6444_v6   ;;  %v5475_v14 = vadd.f32 %v5474_v48, %v5444_v35  ;;  %v4346_v56 = vadd.f32 %v4302_v59, %v3695_v63  ;;  %v3696_v49 = vadd.f32 %v3653_v4, %v8457_v2  ;;  %v8461_v35 = vld [vmem:[#allocation23_spill] sm:$0xff] }
 0x2ed   : > { %v4584_v15 = vpop.f32.mrf.mxu3 }
 0x2ee   : > { %v4628_v41 = vadd.f32 %v4584_v15, %v4346_v56 }
 0x2f0   : > { %v5310_v43 = vadd.f32 %v5266_v30, %v4628_v41 }
 0x2f1   : > { %v5268_v36 = vpop.f32.mrf.mxu0 }
 0x2f2   : > { %v5406_v45 = vadd.f32 %v5405_v47, %v5310_v43  ;;  %v5445_v46 = vmul.f32 %v5310_v43, %v5310_v43 }
 0x2f3   : > { %v4304_v12 = vpop.f32.mrf.mxu2  ;;  %v3656_v32 = vpop.f32.mrf.mxu1 }
 0x2f4   : > { %v5476_v53 = vadd.f32 %v5475_v14, %v5445_v46  ;;  %v4347_v34 = vadd.f32 %v4304_v12, %v3696_v49  ;;  %v3697_v17 = vadd.f32 %v3656_v32, %v8458_v62 }
 0x2f5   : > { %v4586_v16 = vpop.f32.mrf.mxu3 }
 0x2f6   : > { %v4629_v19 = vadd.f32 %v4586_v16, %v4347_v34 }
 0x2f8   : > { %v5311_v8 = vadd.f32 %v5268_v36, %v4629_v19  ;;  %v6801_v36 = vmov 0.0  }
 0x2f9   : > { %v5271_v3 = vpop.f32.mrf.mxu0  ;;  %5382 = vst [vmem:[%s8334_s8] sm:$0xff] %v6801_v36 }
 0x2fa   : > { %v6449_v0 = vpack.c.bf16 %v5311_v8, %v5310_v43  ;;  %v5407_v5 = vadd.f32 %v5406_v45, %v5311_v8  ;;  %v5446_v61 = vmul.f32 %v5311_v8, %v5311_v8 }
 0x2fb   : > { %v4307_v18 = vpop.f32.mrf.mxu2  ;;  %v3658_v38 = vpop.f32.mrf.mxu1 }
 0x2fc   : > { %6492 = vst [vmem:[%s8149_s16 + $0x60] sm:$0xff] %v6449_v0   ;;  %v5477_v40 = vadd.f32 %v5476_v53, %v5446_v61  ;;  %v4348_v26 = vadd.f32 %v4307_v18, %v3697_v17  ;;  %v3698_v33 = vadd.f32 %v3658_v38, %v8459_v7 }
 0x2fd   : > { %v4589_v31 = vpop.f32.mrf.mxu3 }
 0x2fe   : > { %v4630_v57 = vadd.f32 %v4589_v31, %v4348_v26 }
 0x300   : > { %v5312_v42 = vadd.f32 %v5271_v3, %v4630_v57 }
 0x301   : > { %v5273_v37 = vpop.f32.mrf.mxu0 }
 0x302   : > { %v5408_v27 = vadd.f32 %v5407_v5, %v5312_v42  ;;  %v5447_v9 = vmul.f32 %v5312_v42, %v5312_v42 }
 0x303   : > { %v4309_v44 = vpop.f32.mrf.mxu2  ;;  %v3661_v54 = vpop.f32.mrf.mxu1 }
 0x304   : > { %v5478_v21 = vadd.f32 %v5477_v40, %v5447_v9  ;;  %v4349_v10 = vadd.f32 %v4309_v44, %v3698_v33  ;;  %v3699_v55 = vadd.f32 %v3661_v54, %v8460_v60 }
 0x305   : > { %v4591_v39 = vpop.f32.mrf.mxu3 }
 0x306   : > { %v4631_v22 = vadd.f32 %v4591_v39, %v4349_v10 }
 0x308   : > { %v5313_v28 = vadd.f32 %v5273_v37, %v4631_v22 }
 0x309   : > { %v5276_v52 = vpop.f32.mrf.mxu0 }
 0x30a   : > { %v6454_v1 = vpack.c.bf16 %v5313_v28, %v5312_v42  ;;  %v5409_v23 = vadd.f32 %v5408_v27, %v5313_v28  ;;  %v5448_v51 = vmul.f32 %v5313_v28, %v5313_v28 }
 0x30b   : > { %v4312_v24 = vpop.f32.mrf.mxu2  ;;  %v3663_v48 = vpop.f32.mrf.mxu1 }
 0x30c   : > { %6493 = vst [vmem:[%s8149_s16 + $0x68] sm:$0xff] %v6454_v1   ;;  %v5479_v20 = vadd.f32 %v5478_v21, %v5448_v51  ;;  %v4350_v50 = vadd.f32 %v4312_v24, %v3699_v55  ;;  %v3700_v25 = vadd.f32 %v3663_v48, %v8461_v35 }
 0x30d   : > { %v4594_v13 = vpop.f32.mrf.mxu3 }
 0x30e   : > { %v4632_v29 = vadd.f32 %v4594_v13, %v4350_v50 }
 0x310   : > { %v5314_v30 = vadd.f32 %v5276_v52, %v4632_v29 }
 0x311   : > { %v5278_v63 = vpop.f32.mrf.mxu0 }
 0x312   : > { %v5410_v6 = vadd.f32 %v5409_v23, %v5314_v30  ;;  %v5449_v47 = vmul.f32 %v5314_v30, %v5314_v30 }
 0x313   : > { %v4314_v59 = vpop.f32.mrf.mxu2  ;;  %v3666_v15 = vpop.f32.mrf.mxu1 }
 0x314   : > { %v5480_v4 = vadd.f32 %v5479_v20, %v5449_v47  ;;  %v4351_v14 = vadd.f32 %v4314_v59, %v3700_v25  ;;  %v3701_v49 = vadd.f32 %v3666_v15, %v8073_v58 }
 0x315   : > { %v4596_v56 = vpop.f32.mrf.mxu3 }
 0x316   : > { %v4633_v41 = vadd.f32 %v4596_v56, %v4351_v14 }
 0x318   : > { %v5315_v43 = vadd.f32 %v5278_v63, %v4633_v41 }
 0x319   : > { %v5281_v34 = vpop.f32.mrf.mxu0 }
 0x31a   : > { %v6459_v45 = vpack.c.bf16 %v5315_v43, %v5314_v30  ;;  %v5411_v46 = vadd.f32 %v5410_v6, %v5315_v43  ;;  %v5450_v2 = vmul.f32 %v5315_v43, %v5315_v43 }
 0x31b   : > { %v4317_v12 = vpop.f32.mrf.mxu2  ;;  %v3668_v8 = vpop.f32.mrf.mxu1 }
 0x31c   : > { %6494 = vst [vmem:[%s8149_s16 + $0x70] sm:$0xff] %v6459_v45   ;;  %v5481_v32 = vadd.f32 %v5480_v4, %v5450_v2  ;;  %v4352_v53 = vadd.f32 %v4317_v12, %v3701_v49  ;;  %v3702_v61 = vadd.f32 %v3668_v8, %v8108_v11 }
 0x31d   : > { %v4599_v16 = vpop.f32.mrf.mxu3 }
 0x31e   : > { %v4634_v19 = vadd.f32 %v4599_v16, %v4352_v53 }
 0x320   : > { %v5316_v3 = vadd.f32 %v5281_v34, %v4634_v19 }
 0x321   : > { %v5283_v40 = vpop.f32.mrf.mxu0 }
 0x322   : > { %v5412_v0 = vadd.f32 %v5411_v46, %v5316_v3  ;;  %v5451_v5 = vmul.f32 %v5316_v3, %v5316_v3 }
 0x323   : > { %v4319_v62 = vpop.f32.mrf.mxu2 }
 0x324   : > { %v5482_v58 = vadd.f32 %v5481_v32, %v5451_v5  ;;  %v4353_v17 = vadd.f32 %v4319_v62, %v3702_v61 }
 0x325   : > { %v4601_v18 = vpop.f32.mrf.mxu3 }
 0x326   : > { %v4635_v38 = vadd.f32 %v4601_v18, %v4353_v17 }
 0x328   : > { %v5317_v26 = vadd.f32 %v5283_v40, %v4635_v38 }
 0x32a   : > { %v6464_v31 = vpack.c.bf16 %v5317_v26, %v5316_v3  ;;  %v5413_v11 = vadd.f32 %v5412_v0, %v5317_v26  ;;  %v5452_v57 = vmul.f32 %v5317_v26, %v5317_v26 }
 0x32c   : > { %6495 = vst [vmem:[%s8149_s16 + $0x78] sm:$0xff] %v6464_v31   ;;  %v5414_v42 = vrot.slane %v5413_v11, 4  ;;  %v5483_v37 = vadd.f32 %v5482_v58, %v5452_v57 }
 0x32d   : > { %6719 = shalt.err (!%p6716_p8)
}
 0x32e   : > { %s6802_s29 = smov 64   ;;  %s6803_s7 = smov 4   ;;  %v5415_v27 = vadd.f32 %v5414_v42, %v5413_v11  ;;  %v5484_v9 = vrot.slane %v5483_v37, 4 }
 0x32f   : > { %6530 = dma.vmem_to_hbm [thread:$0]  (%p6886_p11), %s5510_s17, 2048, %s5512_s15, %s5492_s23, %s6802_s29, %s6802_s29, %s6803_s7  }
 0x330   : > { %s6197_s16 = sshll.u32 %s6855_s22, 3  ;;  %v5416_v7 = vrot.slane %v5415_v27, 2  ;;  %v5485_v33 = vadd.f32 %v5484_v9, %v5483_v37  ;;  %s5526_s28 = sshll.u32 %s8334_s8, 4  ;;  %s5527_s28 = int_to_ptr.vmem [resolvable:$true] %s5526_s28 }
 0x331   : > { %s5524_s10 = scalar_lea.hbm %s8398_s5, %s6197_s16  ;;  %s5497_s22 = scalar_lea.sflag [#allocation11], %s6934_s25 }
 0x332   : > { %v5417_v44 = vadd.f32 %v5416_v7, %v5415_v27  ;;  %v5486_v54 = vrot.slane %v5485_v33, 2  ;;  %s5528_s12 = sshll.u32 %s5524_s10, 4  ;;  %s6740_s11 = scalar_lea.hbm %s8398_s5, 16  ;;  %s5529_s12 = int_to_ptr.hbm [resolvable:$true] %s5528_s12 }
 0x333   : > { %s6734_s17 = sshra.s32 %s5529_s12, 4  ;;  %s6735_s17 = int_to_ptr.hbm [resolvable:$true] %s6734_s17 }
 0x334   : > { %v5418_v21 = vrot.slane %v5417_v44, 1  ;;  %v5487_v10 = vadd.f32 %v5486_v54, %v5485_v33  ;;  %s6736_s15 = scalar_lea.hbm %s6735_s17, 8  ;;  %p6741_p2 = scmp.lt.s32.totalorder %s6735_s17, %s8398_s5 }
 0x335   : > { %p6737_p9 = scmp.ne.s32.totalorder %s6735_s17, %s6736_s15  ;;  %p6742_p3 = scmp.lt.s32.totalorder %s6740_s11, %s6736_s15 }
 0x336   : > { %v5419_v39 = vadd.f32 %v5418_v21, %v5417_v44  ;;  %v5488_v22 = vrot.slane %v5487_v10, 1 }
 0x337   : > { %p6738_p10 = pnand %p6737_p9, %p6886_p11  ;;  %p6743_p4 = por %p6742_p3, %p6741_p2 }
 0x338   : > { %v5489_v28 = vadd.f32 %v5488_v22, %v5487_v10  ;;  %5420 = vst [vmem:[%s8334_s8] sm:$0x1] %v5419_v39 }
 0x339   : > { %p6739_p1 = pneg %p6738_p10 }
 0x33a   : > { %5490 = vst [vmem:[%s8334_s8 + $0x1] sm:$0x1] %v5489_v28 }
 0x33b   : > { %p6744_p6 = pnand %p6743_p4, %p6739_p1 }
 0x33d   : > { %6747 = shalt.err (!%p6744_p6)
}
 0x33e   : > { %6531 = dma.vmem_to_hbm [thread:$0]  (%p6886_p11), %s5527_s28, 128, %s5529_s12, %s5497_s22  }
 0x33f PF: > { %s5540_s25 = sand.u32 1, %s6782_s18   ;;  %p8462_p13 = scmp.ge.s32.totalorder %s6794_s21, 2 }
 0x340   : > { %s5541_s8 = scalar_lea.sflag [#allocation5], %s5540_s25 }
 0x341   : > { %p6546_p0 = pnand %p8462_p13, %p6890_p12 }
 0x343   : > { %p6547_p7 = pneg %p6546_p0 }
 0x345   : > { %6773 = dma.done.wait (%p6547_p7), %s5541_s8, 2048  }
 0x346   : > { %6775 = vsyncadd (%p6547_p7), %s5541_s8, 4294965248  ;;  %s5551_s20 = scalar_lea.sflag [#allocation11], %s5540_s25 }
 0x347   : > { %6777 = dma.done.wait (%p6547_p7), %s5551_s20, 128  }
 0x348   : > { %6779 = vsyncadd (%p6547_p7), %s5551_s20, 4294967168  ;;  %s8463_s3 = sld [smem:[#allocation16_spill]]  ;;  %p23_p11 = scmp.ge.s32.totalorder %s6859_s24, 4  }
 0x349   : > { %s8464_s20 = sld [smem:[#allocation17_spill]]  ;;  %s8465_s18 = smov %s6786_s19 }
 0x34a   : > { %s8467_s21 = smov %s6859_s24  ;;  %25 = sbr.rel (!%p23_p11) target bundleno = 11 (0xb), region = 117 }
 0x34e   : > { %s8466_s19 = smov %s8463_s3 }
 0x34f   :  { %5557 = vsyncpa [#allocation4], 1 }
 0x350   :  { %5559 = vsyncpa [#allocation4 + $0x1], 1 }
 0x351   :  { %5560 = vsyncpa [#allocation7], 1 }
 0x352   :  { %5561 = vsyncpa [#allocation5], 1 }
 0x353   :  { %5563 = vsyncpa [#allocation5 + $0x1], 1 }
 0x354   :  { %5564 = vsyncpa [#allocation11], 1 }
 0x355   :  { %5566 = vsyncpa [#allocation11 + $0x1], 1 }

</bundles_post_ra>
